<compile_context>
chip_gen: v7x
topology: tpu7x:2x2x1
jax: 0.10.0
libtpu: 0.0.40
codegen_flags: <defaults>
</compile_context>

<pallas_src>
import jax
import jax.numpy as jnp
from jax import lax
from jax.experimental import pallas as pl
from jax.experimental.pallas import tpu as pltpu

_TARGET_BLOCK_BYTES = 1 << 20  # ~1 MiB per block: safe on v5e/v6e/v7x VMEM

# int32 bit patterns of the murmur3 / golden-ratio constants.
_GOLDEN = 0x9E3779B9 - (1 << 32)   # -1640531527
_M1 = 0x85EBCA6B - (1 << 32)       # -2048144789
_M2 = 0xC2B2AE35 - (1 << 32)       # -1028477387

# Acklam inverse-normal-CDF coefficients (max abs error ~1e-9 in exact arith).
_A = (-3.969683028665376e+01, 2.209460984245205e+02, -2.759285104469687e+02,
      1.383577518672690e+02, -3.066479806614716e+01, 2.506628277459239e+00)
_B = (-5.447609879822406e+01, 1.615858368580409e+02, -1.556989798598866e+02,
      6.680131188771972e+01, -1.328068155288572e+01)
_C = (-7.784894002430293e-03, -3.223964580411365e-01, -2.400758277161838e+00,
      -2.549732539343734e+00, 4.374664141464968e+00, 2.938163982698783e+00)
_D = (7.784695709041462e-03, 3.224671290700398e-01, 2.445134137142996e+00,
      3.754408661907416e+00)
_P_LOW = 0.02425


def _fmix32(h):
    """murmur3 32-bit finalizer on int32 (logical shifts emulated via mask)."""
    h = h ^ ((h >> 16) & 0xFFFF)
    h = h * _M1
    h = h ^ ((h >> 13) & 0x7FFFF)
    h = h * _M2
    h = h ^ ((h >> 16) & 0xFFFF)
    return h


def _inv_norm_cdf(p):
    """Acklam's inverse standard-normal CDF, branch-free (jnp.where selects)."""
    # Central region.
    q = p - 0.5
    r = q * q
    num_c = ((((_A[0] * r + _A[1]) * r + _A[2]) * r + _A[3]) * r + _A[4]) * r + _A[5]
    den_c = ((((_B[0] * r + _B[1]) * r + _B[2]) * r + _B[3]) * r + _B[4]) * r + 1.0
    x_central = num_c * q / den_c
    # Lower tail.
    ql = jnp.sqrt(-2.0 * jnp.log(p))
    num_l = ((((_C[0] * ql + _C[1]) * ql + _C[2]) * ql + _C[3]) * ql + _C[4]) * ql + _C[5]
    den_l = (((_D[0] * ql + _D[1]) * ql + _D[2]) * ql + _D[3]) * ql + 1.0
    x_low = num_l / den_l
    # Upper tail.
    qu = jnp.sqrt(-2.0 * jnp.log(1.0 - p))
    num_u = ((((_C[0] * qu + _C[1]) * qu + _C[2]) * qu + _C[3]) * qu + _C[4]) * qu + _C[5]
    den_u = (((_D[0] * qu + _D[1]) * qu + _D[2]) * qu + _D[3]) * qu + 1.0
    x_up = -num_u / den_u
    return jnp.where(p < _P_LOW, x_low, jnp.where(p > 1.0 - _P_LOW, x_up, x_central))


def _noise_kernel(seed_ref, scale_ref, x_ref, o_ref):
    br, bl = x_ref.shape
    seed = seed_ref[0]
    scale = scale_ref[0]

    # Unique per-element counter across the whole (flattened) tensor.
    base = pl.program_id(0) * (br * bl)
    ri = lax.broadcasted_iota(jnp.int32, (br, bl), 0)
    ci = lax.broadcasted_iota(jnp.int32, (br, bl), 1)
    idx = base + ri * bl + ci

    # Counter-based hash -> uniform in (0, 1) -> standard normal.
    h = _fmix32(idx ^ (seed * _GOLDEN))
    bits = (h >> 9) & 0x7FFFFF                      # 23 uniform bits
    p = (bits.astype(jnp.float32) + 0.5) * (1.0 / (1 << 23))
    z = _inv_norm_cdf(p)

    y = x_ref[...].astype(jnp.float32) + z * scale
    o_ref[...] = y.astype(o_ref.dtype)


def random_normal_noise(x, scale, seed, *, training=True):
    """x: any-shape float array. scale: scalar parameter (default scale_size=())."""
    if not training:
        return x
    orig_shape = x.shape
    orig_dtype = x.dtype
    n = x.size
    if n == 0:
        return x

    itemsize = jnp.dtype(orig_dtype).itemsize
    sub_min = {4: 8, 2: 16, 1: 32}.get(itemsize, 8)   # dtype-aware min sublanes

    # Widest lane width (multiple of 128) that divides n -> no pad, no slice.
    lane = None
    for cand in (2048, 1024, 512, 256, 128):
        if n % cand == 0:
            lane = cand
            break
    flat = x.reshape(-1)
    if lane is None:
        # TODO(synk): handle the ragged tail with a masked store in the last
        # grid step instead of pad + slice (each costs an extra HBM pass).
        lane = 128
        flat = jnp.pad(flat, (0, (-n) % lane))
    padded_n = flat.shape[0]
    rows = padded_n // lane
    mat = flat.reshape(rows, lane)

    # ~1 MiB blocks, rows a multiple of the dtype's min sublane count.
    target_rows = max(sub_min,
                      (_TARGET_BLOCK_BYTES // (lane * itemsize)) // sub_min * sub_min)
    block_rows = rows if rows <= target_rows else target_rows
    grid = (pl.cdiv(rows, block_rows),)

    seed_arr = jnp.asarray([seed], dtype=jnp.int32)
    # TODO(synk): only the default scalar scale_size=() is supported; a general
    # broadcastable non-scalar scale is not plumbed through the flat layout.
    scale_arr = jnp.asarray(scale, dtype=jnp.float32).reshape(1)

    out = pl.pallas_call(
        _noise_kernel,
        out_shape=jax.ShapeDtypeStruct(mat.shape, orig_dtype),
        grid=grid,
        in_specs=[
            pl.BlockSpec(memory_space=pltpu.SMEM),                 # seed
            pl.BlockSpec(memory_space=pltpu.SMEM),                 # scale
            pl.BlockSpec((block_rows, lane), lambda i: (i, 0)),    # x
        ],
        out_specs=pl.BlockSpec((block_rows, lane), lambda i: (i, 0)),
        compiler_params=pltpu.CompilerParams(
            dimension_semantics=("parallel",)),                    # independent blocks
    )(seed_arr, scale_arr, mat)

    out_flat = out.reshape(-1)
    if padded_n != n:
        out_flat = out_flat[:n]
    return out_flat.reshape(orig_shape)


if __name__ == "__main__":
    key = jax.random.PRNGKey(0)
    x = jax.random.normal(key, (2, 4, 16, 16), dtype=jnp.float32)

    # Parameter init per nn.Module.__init__: scale = zeros(scale_size=()).
    scale_param = jnp.zeros((), dtype=jnp.float32)

    # Training-mode forward through the Pallas kernel.
    y_train = jax.block_until_ready(
        random_normal_noise(x, scale_param, seed=1234, training=True))
    assert y_train.shape == x.shape and y_train.dtype == x.dtype
    # With scale initialized to zero, training output must equal x exactly.
    assert jnp.allclose(y_train, x, atol=0.0, rtol=0.0)

    # Eval-mode forward is identity (matches `if not self.training: return x`).
    y_eval = jax.block_until_ready(
        random_normal_noise(x, scale_param, seed=1234, training=False))
    assert jnp.array_equal(y_eval, x)

    # Sanity: a nonzero scale injects ~N(0, scale^2) noise.
    y_noisy = jax.block_until_ready(
        random_normal_noise(x, jnp.float32(0.5), seed=1234, training=True))
    noise = y_noisy - x
    noise_std = float(jnp.std(noise))
    assert 0.2 < noise_std < 0.9, noise_std
    assert abs(float(jnp.mean(noise))) < 0.1

    print("KERNEL_OK")
</pallas_src>

<mosaic_0001>
module attributes {stable_mosaic.version = 11 : i64} {
  func.func @_noise_kernel(%arg0: i32, %arg1: memref<1xi32, #tpu.memory_space<smem>>, %arg2: memref<1xf32, #tpu.memory_space<smem>>, %arg3: memref<1x2048xf32, #tpu.memory_space<vmem>>, %arg4: memref<1x2048xf32, #tpu.memory_space<vmem>>) attributes {dimension_semantics = [#tpu.dimension_semantics<parallel>], iteration_bounds = array<i64: 1>, scalar_prefetch = 0 : i64, scratch_operands = 0 : i64, tpu.core_type = #tpu.core_type<tc>, window_params = [{transform_indices = @transform_0, window_bounds = array<i64: 1>}, {transform_indices = @transform_1, window_bounds = array<i64: 1>}, {transform_indices = @transform_2, window_bounds = array<i64: 1, 2048>}, {transform_indices = @transform_3, window_bounds = array<i64: 1, 2048>}]} {
    %c0 = arith.constant 0 : index
    %0 = memref.load %arg1[%c0] : memref<1xi32, #tpu.memory_space<smem>>
    %c0_0 = arith.constant 0 : index
    %1 = memref.load %arg2[%c0_0] : memref<1xf32, #tpu.memory_space<smem>>
    %c2048_i32 = arith.constant 2048 : i32
    %2 = arith.muli %arg0, %c2048_i32 : i32
    %3 = tpu.iota {dimensions = array<i32: 0>} : vector<1x2048xi32>
    %4 = tpu.iota {dimensions = array<i32: 1>} : vector<1x2048xi32>
    %c2048_i32_1 = arith.constant 2048 : i32
    %5 = vector.broadcast %c2048_i32_1 : i32 to vector<1x2048xi32>
    %6 = arith.muli %3, %5 : vector<1x2048xi32>
    %7 = vector.broadcast %2 : i32 to vector<1x2048xi32>
    %8 = arith.addi %7, %6 : vector<1x2048xi32>
    %9 = arith.addi %8, %4 : vector<1x2048xi32>
    %c-1640531527_i32 = arith.constant -1640531527 : i32
    %10 = arith.muli %0, %c-1640531527_i32 : i32
    %11 = vector.broadcast %10 : i32 to vector<1x2048xi32>
    %12 = arith.xori %9, %11 : vector<1x2048xi32>
    %c16_i32 = arith.constant 16 : i32
    %13 = vector.broadcast %c16_i32 : i32 to vector<1x2048xi32>
    %14 = arith.shrsi %12, %13 : vector<1x2048xi32>
    %c65535_i32 = arith.constant 65535 : i32
    %15 = vector.broadcast %c65535_i32 : i32 to vector<1x2048xi32>
    %16 = arith.andi %14, %15 : vector<1x2048xi32>
    %17 = arith.xori %12, %16 : vector<1x2048xi32>
    %c-2048144789_i32 = arith.constant -2048144789 : i32
    %18 = vector.broadcast %c-2048144789_i32 : i32 to vector<1x2048xi32>
    %19 = arith.muli %17, %18 : vector<1x2048xi32>
    %c13_i32 = arith.constant 13 : i32
    %20 = vector.broadcast %c13_i32 : i32 to vector<1x2048xi32>
    %21 = arith.shrsi %19, %20 : vector<1x2048xi32>
    %c524287_i32 = arith.constant 524287 : i32
    %22 = vector.broadcast %c524287_i32 : i32 to vector<1x2048xi32>
    %23 = arith.andi %21, %22 : vector<1x2048xi32>
    %24 = arith.xori %19, %23 : vector<1x2048xi32>
    %c-1028477387_i32 = arith.constant -1028477387 : i32
    %25 = vector.broadcast %c-1028477387_i32 : i32 to vector<1x2048xi32>
    %26 = arith.muli %24, %25 : vector<1x2048xi32>
    %c16_i32_2 = arith.constant 16 : i32
    %27 = vector.broadcast %c16_i32_2 : i32 to vector<1x2048xi32>
    %28 = arith.shrsi %26, %27 : vector<1x2048xi32>
    %c65535_i32_3 = arith.constant 65535 : i32
    %29 = vector.broadcast %c65535_i32_3 : i32 to vector<1x2048xi32>
    %30 = arith.andi %28, %29 : vector<1x2048xi32>
    %31 = arith.xori %26, %30 : vector<1x2048xi32>
    %c9_i32 = arith.constant 9 : i32
    %32 = vector.broadcast %c9_i32 : i32 to vector<1x2048xi32>
    %33 = arith.shrsi %31, %32 : vector<1x2048xi32>
    %c8388607_i32 = arith.constant 8388607 : i32
    %34 = vector.broadcast %c8388607_i32 : i32 to vector<1x2048xi32>
    %35 = arith.andi %33, %34 : vector<1x2048xi32>
    %36 = arith.sitofp %35 : vector<1x2048xi32> to vector<1x2048xf32>
    %cst = arith.constant 5.000000e-01 : f32
    %37 = vector.broadcast %cst : f32 to vector<1x2048xf32>
    %38 = arith.addf %36, %37 : vector<1x2048xf32>
    %cst_4 = arith.constant 1.1920929E-7 : f32
    %39 = vector.broadcast %cst_4 : f32 to vector<1x2048xf32>
    %40 = arith.mulf %38, %39 : vector<1x2048xf32>
    %cst_5 = arith.constant 5.000000e-01 : f32
    %41 = vector.broadcast %cst_5 : f32 to vector<1x2048xf32>
    %42 = arith.subf %40, %41 : vector<1x2048xf32>
    %43 = arith.mulf %42, %42 : vector<1x2048xf32>
    %cst_6 = arith.constant -39.6968307 : f32
    %44 = vector.broadcast %cst_6 : f32 to vector<1x2048xf32>
    %45 = arith.mulf %44, %43 : vector<1x2048xf32>
    %cst_7 = arith.constant 220.946106 : f32
    %46 = vector.broadcast %cst_7 : f32 to vector<1x2048xf32>
    %47 = arith.addf %45, %46 : vector<1x2048xf32>
    %48 = arith.mulf %47, %43 : vector<1x2048xf32>
    %cst_8 = arith.constant -275.928497 : f32
    %49 = vector.broadcast %cst_8 : f32 to vector<1x2048xf32>
    %50 = arith.addf %48, %49 : vector<1x2048xf32>
    %51 = arith.mulf %50, %43 : vector<1x2048xf32>
    %cst_9 = arith.constant 138.357758 : f32
    %52 = vector.broadcast %cst_9 : f32 to vector<1x2048xf32>
    %53 = arith.addf %51, %52 : vector<1x2048xf32>
    %54 = arith.mulf %53, %43 : vector<1x2048xf32>
    %cst_10 = arith.constant -30.6647987 : f32
    %55 = vector.broadcast %cst_10 : f32 to vector<1x2048xf32>
    %56 = arith.addf %54, %55 : vector<1x2048xf32>
    %57 = arith.mulf %56, %43 : vector<1x2048xf32>
    %cst_11 = arith.constant 2.50662827 : f32
    %58 = vector.broadcast %cst_11 : f32 to vector<1x2048xf32>
    %59 = arith.addf %57, %58 : vector<1x2048xf32>
    %cst_12 = arith.constant -54.4760971 : f32
    %60 = vector.broadcast %cst_12 : f32 to vector<1x2048xf32>
    %61 = arith.mulf %60, %43 : vector<1x2048xf32>
    %cst_13 = arith.constant 161.585831 : f32
    %62 = vector.broadcast %cst_13 : f32 to vector<1x2048xf32>
    %63 = arith.addf %61, %62 : vector<1x2048xf32>
    %64 = arith.mulf %63, %43 : vector<1x2048xf32>
    %cst_14 = arith.constant -155.698975 : f32
    %65 = vector.broadcast %cst_14 : f32 to vector<1x2048xf32>
    %66 = arith.addf %64, %65 : vector<1x2048xf32>
    %67 = arith.mulf %66, %43 : vector<1x2048xf32>
    %cst_15 = arith.constant 66.8013153 : f32
    %68 = vector.broadcast %cst_15 : f32 to vector<1x2048xf32>
    %69 = arith.addf %67, %68 : vector<1x2048xf32>
    %70 = arith.mulf %69, %43 : vector<1x2048xf32>
    %cst_16 = arith.constant -13.2806816 : f32
    %71 = vector.broadcast %cst_16 : f32 to vector<1x2048xf32>
    %72 = arith.addf %70, %71 : vector<1x2048xf32>
    %73 = arith.mulf %72, %43 : vector<1x2048xf32>
    %cst_17 = arith.constant 1.000000e+00 : f32
    %74 = vector.broadcast %cst_17 : f32 to vector<1x2048xf32>
    %75 = arith.addf %73, %74 : vector<1x2048xf32>
    %76 = arith.mulf %59, %42 : vector<1x2048xf32>
    %77 = arith.divf %76, %75 : vector<1x2048xf32>
    %78 = math.log %40 : vector<1x2048xf32>
    %cst_18 = arith.constant -2.000000e+00 : f32
    %79 = vector.broadcast %cst_18 : f32 to vector<1x2048xf32>
    %80 = arith.mulf %79, %78 : vector<1x2048xf32>
    %81 = math.sqrt %80 : vector<1x2048xf32>
    %cst_19 = arith.constant -0.0077848942 : f32
    %82 = vector.broadcast %cst_19 : f32 to vector<1x2048xf32>
    %83 = arith.mulf %82, %81 : vector<1x2048xf32>
    %cst_20 = arith.constant -0.322396457 : f32
    %84 = vector.broadcast %cst_20 : f32 to vector<1x2048xf32>
    %85 = arith.addf %83, %84 : vector<1x2048xf32>
    %86 = arith.mulf %85, %81 : vector<1x2048xf32>
    %cst_21 = arith.constant -2.40075827 : f32
    %87 = vector.broadcast %cst_21 : f32 to vector<1x2048xf32>
    %88 = arith.addf %86, %87 : vector<1x2048xf32>
    %89 = arith.mulf %88, %81 : vector<1x2048xf32>
    %cst_22 = arith.constant -2.54973245 : f32
    %90 = vector.broadcast %cst_22 : f32 to vector<1x2048xf32>
    %91 = arith.addf %89, %90 : vector<1x2048xf32>
    %92 = arith.mulf %91, %81 : vector<1x2048xf32>
    %cst_23 = arith.constant 4.37466431 : f32
    %93 = vector.broadcast %cst_23 : f32 to vector<1x2048xf32>
    %94 = arith.addf %92, %93 : vector<1x2048xf32>
    %95 = arith.mulf %94, %81 : vector<1x2048xf32>
    %cst_24 = arith.constant 2.938164 : f32
    %96 = vector.broadcast %cst_24 : f32 to vector<1x2048xf32>
    %97 = arith.addf %95, %96 : vector<1x2048xf32>
    %cst_25 = arith.constant 0.00778469583 : f32
    %98 = vector.broadcast %cst_25 : f32 to vector<1x2048xf32>
    %99 = arith.mulf %98, %81 : vector<1x2048xf32>
    %cst_26 = arith.constant 0.322467119 : f32
    %100 = vector.broadcast %cst_26 : f32 to vector<1x2048xf32>
    %101 = arith.addf %99, %100 : vector<1x2048xf32>
    %102 = arith.mulf %101, %81 : vector<1x2048xf32>
    %cst_27 = arith.constant 2.44513416 : f32
    %103 = vector.broadcast %cst_27 : f32 to vector<1x2048xf32>
    %104 = arith.addf %102, %103 : vector<1x2048xf32>
    %105 = arith.mulf %104, %81 : vector<1x2048xf32>
    %cst_28 = arith.constant 3.7544086 : f32
    %106 = vector.broadcast %cst_28 : f32 to vector<1x2048xf32>
    %107 = arith.addf %105, %106 : vector<1x2048xf32>
    %108 = arith.mulf %107, %81 : vector<1x2048xf32>
    %cst_29 = arith.constant 1.000000e+00 : f32
    %109 = vector.broadcast %cst_29 : f32 to vector<1x2048xf32>
    %110 = arith.addf %108, %109 : vector<1x2048xf32>
    %111 = arith.divf %97, %110 : vector<1x2048xf32>
    %cst_30 = arith.constant 1.000000e+00 : f32
    %112 = vector.broadcast %cst_30 : f32 to vector<1x2048xf32>
    %113 = arith.subf %112, %40 : vector<1x2048xf32>
    %114 = math.log %113 : vector<1x2048xf32>
    %cst_31 = arith.constant -2.000000e+00 : f32
    %115 = vector.broadcast %cst_31 : f32 to vector<1x2048xf32>
    %116 = arith.mulf %115, %114 : vector<1x2048xf32>
    %117 = math.sqrt %116 : vector<1x2048xf32>
    %cst_32 = arith.constant -0.0077848942 : f32
    %118 = vector.broadcast %cst_32 : f32 to vector<1x2048xf32>
    %119 = arith.mulf %118, %117 : vector<1x2048xf32>
    %cst_33 = arith.constant -0.322396457 : f32
    %120 = vector.broadcast %cst_33 : f32 to vector<1x2048xf32>
    %121 = arith.addf %119, %120 : vector<1x2048xf32>
    %122 = arith.mulf %121, %117 : vector<1x2048xf32>
    %cst_34 = arith.constant -2.40075827 : f32
    %123 = vector.broadcast %cst_34 : f32 to vector<1x2048xf32>
    %124 = arith.addf %122, %123 : vector<1x2048xf32>
    %125 = arith.mulf %124, %117 : vector<1x2048xf32>
    %cst_35 = arith.constant -2.54973245 : f32
    %126 = vector.broadcast %cst_35 : f32 to vector<1x2048xf32>
    %127 = arith.addf %125, %126 : vector<1x2048xf32>
    %128 = arith.mulf %127, %117 : vector<1x2048xf32>
    %cst_36 = arith.constant 4.37466431 : f32
    %129 = vector.broadcast %cst_36 : f32 to vector<1x2048xf32>
    %130 = arith.addf %128, %129 : vector<1x2048xf32>
    %131 = arith.mulf %130, %117 : vector<1x2048xf32>
    %cst_37 = arith.constant 2.938164 : f32
    %132 = vector.broadcast %cst_37 : f32 to vector<1x2048xf32>
    %133 = arith.addf %131, %132 : vector<1x2048xf32>
    %cst_38 = arith.constant 0.00778469583 : f32
    %134 = vector.broadcast %cst_38 : f32 to vector<1x2048xf32>
    %135 = arith.mulf %134, %117 : vector<1x2048xf32>
    %cst_39 = arith.constant 0.322467119 : f32
    %136 = vector.broadcast %cst_39 : f32 to vector<1x2048xf32>
    %137 = arith.addf %135, %136 : vector<1x2048xf32>
    %138 = arith.mulf %137, %117 : vector<1x2048xf32>
    %cst_40 = arith.constant 2.44513416 : f32
    %139 = vector.broadcast %cst_40 : f32 to vector<1x2048xf32>
    %140 = arith.addf %138, %139 : vector<1x2048xf32>
    %141 = arith.mulf %140, %117 : vector<1x2048xf32>
    %cst_41 = arith.constant 3.7544086 : f32
    %142 = vector.broadcast %cst_41 : f32 to vector<1x2048xf32>
    %143 = arith.addf %141, %142 : vector<1x2048xf32>
    %144 = arith.mulf %143, %117 : vector<1x2048xf32>
    %cst_42 = arith.constant 1.000000e+00 : f32
    %145 = vector.broadcast %cst_42 : f32 to vector<1x2048xf32>
    %146 = arith.addf %144, %145 : vector<1x2048xf32>
    %cst_43 = arith.constant 0.000000e+00 : f32
    %147 = vector.broadcast %cst_43 : f32 to vector<1x2048xf32>
    %148 = arith.subf %147, %133 : vector<1x2048xf32>
    %149 = arith.divf %148, %146 : vector<1x2048xf32>
    %cst_44 = arith.constant 2.425000e-02 : f32
    %150 = vector.broadcast %cst_44 : f32 to vector<1x2048xf32>
    %151 = arith.cmpf olt, %40, %150 : vector<1x2048xf32>
    %cst_45 = arith.constant 9.757500e-01 : f32
    %152 = vector.broadcast %cst_45 : f32 to vector<1x2048xf32>
    %153 = arith.cmpf ogt, %40, %152 : vector<1x2048xf32>
    %154 = arith.select %153, %149, %77 : vector<1x2048xi1>, vector<1x2048xf32>
    %155 = arith.select %151, %111, %154 : vector<1x2048xi1>, vector<1x2048xf32>
    %c0_46 = arith.constant 0 : index
    %c0_47 = arith.constant 0 : index
    %156 = vector.load %arg3[%c0_46, %c0_47] : memref<1x2048xf32, #tpu.memory_space<vmem>>, vector<1x2048xf32>
    %157 = vector.broadcast %1 : f32 to vector<1x2048xf32>
    %158 = arith.mulf %155, %157 : vector<1x2048xf32>
    %159 = arith.addf %156, %158 : vector<1x2048xf32>
    %c0_48 = arith.constant 0 : index
    %c0_49 = arith.constant 0 : index
    %160 = vector.load %arg4[%c0_48, %c0_49] : memref<1x2048xf32, #tpu.memory_space<vmem>>, vector<1x2048xf32>
    tpu.vector_store %arg4[%c0_48, %c0_49], %159 {strides = array<i32>} : memref<1x2048xf32, #tpu.memory_space<vmem>>, vector<1x2048xf32>,
    return
  }
  func.func @transform_0(%arg0: i32) -> i32 {
    %c0_i32 = arith.constant 0 : i32
    %c0_i32_0 = arith.constant 0 : i32
    return %c0_i32 : i32
  }
  func.func @transform_1(%arg0: i32) -> i32 {
    %c0_i32 = arith.constant 0 : i32
    %c0_i32_0 = arith.constant 0 : i32
    return %c0_i32 : i32
  }
  func.func @transform_2(%arg0: i32) -> (i32, i32) {
    %c0_i32 = arith.constant 0 : i32
    %c0_i32_0 = arith.constant 0 : i32
    return %arg0, %c0_i32 : i32, i32
  }
  func.func @transform_3(%arg0: i32) -> (i32, i32) {
    %c0_i32 = arith.constant 0 : i32
    %c0_i32_0 = arith.constant 0 : i32
    return %arg0, %c0_i32 : i32, i32
  }
}

</mosaic_0001>

<bundles_post_ra>
// kernel: tpu_custom_call.1
= control target key start
LH: loop header
LB: loop body
LE: loop exit
PB: predicated region body
PF: predicated region fallthrough
CT: control target
= control target key end

     0   :  { %10 = vsyncpa [#allocation5], 0  ;;  %s4142_s0 = inlined_call_operand.<no memory space> [shape: s32[1], index: 0, kind: input, shape index: {}]   ;;  %s4143_s1 = inlined_call_operand.<no memory space> [shape: f32[1], index: 1, kind: input, shape index: {}]   ;;  %s4144_s2 = inlined_call_operand.hbm [shape: f32[1,2048], index: 2, kind: input, shape index: {}]   ;;  %s4145_s3 = inlined_call_operand.hbm [shape: f32[1,2048], index: 3, kind: output, shape index: {}]  }
   0x1   :  { %11 = vsyncpa [#allocation6], 0  ;;  %s2309_s12 = smov [#allocation4]   ;;  %s2261_s16 = scalar_lea.hbm %s4144_s2, 256 }
   0x2   :  { %s22_s13 = sshll.u32 %s2309_s12, 4  ;;  %p2262_p0 = scmp.ne.s32.totalorder %s4144_s2, %s2261_s16  ;;  %s23_s13 = int_to_ptr.vmem [resolvable:$true] %s22_s13 }
   0x3   :  { %p2265_p1 = scmp.lt.u32.totalorder %s2261_s16, %s4144_s2 }
   0x5   :  { %p2267_p2 = pnand %p2265_p1, %p2262_p0 }
   0x7   :  { %2270 = shalt.err (!%p2267_p2)
}
   0x8   :  { %s2271_s21 = scalar_lea.vmem %s23_s13, 256  ;;  %p2276_p4 = scmp.lt.s32.totalorder %s23_s13, %s23_s13 }
   0x9   :  { %p2272_p3 = scmp.ne.s32.totalorder %s23_s13, %s2271_s21  ;;  %p2277_p5 = scmp.lt.s32.totalorder %s2271_s21, %s2271_s21 }
   0xb   :  { %p2278_p6 = por %p2277_p5, %p2276_p4 }
   0xd   :  { %p2279_p7 = pnand %p2278_p6, %p2272_p3 }
   0xf   :  { %2282 = shalt.err (!%p2279_p7)
}
  0x10   :  { %25 = dma.hbm_to_vmem [thread:$0]  %s4144_s2, 256, %s23_s13, [#allocation5]  }
  0x11   :  { %2305 = dma.done.wait [#allocation5], 256  }
  0x12   :  { %2306 = vsyncadd [#allocation5], 4294967040  ;;  %v32_v0 = vlaneseq  ;;  %s70_s26 = smul.u32 2654435769, %s4142_s0 }
  0x14   :  { %v2344_v1 = vshrl.u32 %v32_v0, 7  ;;  %v35_v2 = vand.u32 127, %v32_v0  ;;  %v71_v11 = vstv %s70_s26 }
  0x16   :  { %4207 = vst [vmem:[#allocation10_spill] sm:$0xff] %v2344_v1  ;;  %v36_v3 = vadd.s32 128, %v35_v2  ;;  %v51_v4 = vmul.u32 2048, %v2344_v1  ;;  %v37_v5 = vadd.s32 256, %v35_v2  ;;  %v38_v6 = vadd.s32 384, %v35_v2 }
  0x17   :  { %v39_v7 = vadd.s32 512, %v35_v2  ;;  %v40_v8 = vadd.s32 640, %v35_v2  ;;  %v41_v9 = vadd.s32 768, %v35_v2  ;;  %v42_v10 = vadd.s32 896, %v35_v2 }
  0x18   :  { %v43_v12 = vadd.s32 1024, %v35_v2  ;;  %v44_v13 = vadd.s32 1152, %v35_v2  ;;  %v54_v14 = vadd.s32 %v51_v4, %v35_v2  ;;  %v55_v15 = vadd.s32 %v51_v4, %v36_v3 }
  0x19   :  { %v45_v16 = vadd.s32 1280, %v35_v2  ;;  %v46_v17 = vadd.s32 1408, %v35_v2  ;;  %v56_v18 = vadd.s32 %v51_v4, %v37_v5  ;;  %v57_v19 = vadd.s32 %v51_v4, %v38_v6 }
  0x1a   :  { %v47_v20 = vadd.s32 1536, %v35_v2  ;;  %v48_v21 = vadd.s32 1664, %v35_v2  ;;  %v58_v22 = vadd.s32 %v51_v4, %v39_v7  ;;  %v59_v23 = vadd.s32 %v51_v4, %v40_v8 }
  0x1b   :  { %v49_v24 = vadd.s32 1792, %v35_v2  ;;  %v50_v25 = vadd.s32 1920, %v35_v2  ;;  %v60_v26 = vadd.s32 %v51_v4, %v41_v9  ;;  %v61_v27 = vadd.s32 %v51_v4, %v42_v10 }
  0x1c   :  { %v62_v28 = vadd.s32 %v51_v4, %v43_v12  ;;  %v63_v29 = vadd.s32 %v51_v4, %v44_v13  ;;  %v72_v30 = vxor.u32 %v71_v11, %v54_v14  ;;  %v73_v31 = vxor.u32 %v71_v11, %v55_v15 }
  0x1d   :  { %v64_v32 = vadd.s32 %v51_v4, %v45_v16  ;;  %v65_v33 = vadd.s32 %v51_v4, %v46_v17  ;;  %v74_v34 = vxor.u32 %v71_v11, %v56_v18  ;;  %v75_v35 = vxor.u32 %v71_v11, %v57_v19 }
  0x1e   :  { %v66_v36 = vadd.s32 %v51_v4, %v47_v20  ;;  %v67_v37 = vadd.s32 %v51_v4, %v48_v21  ;;  %v76_v38 = vxor.u32 %v71_v11, %v58_v22  ;;  %v77_v39 = vxor.u32 %v71_v11, %v59_v23 }
  0x1f   :  { %v68_v40 = vadd.s32 %v51_v4, %v49_v24  ;;  %v69_v41 = vadd.s32 %v51_v4, %v50_v25  ;;  %v78_v42 = vxor.u32 %v71_v11, %v60_v26  ;;  %v79_v43 = vxor.u32 %v71_v11, %v61_v27 }
  0x20   :  { %v80_v44 = vxor.u32 %v71_v11, %v62_v28  ;;  %v81_v45 = vxor.u32 %v71_v11, %v63_v29  ;;  %v1954_v46 = vshrl.u32 %v72_v30, 16  ;;  %v1955_v47 = vshrl.u32 %v73_v31, 16 }
  0x21   :  { %v82_v48 = vxor.u32 %v71_v11, %v64_v32  ;;  %v83_v49 = vxor.u32 %v71_v11, %v65_v33  ;;  %v1956_v50 = vshrl.u32 %v74_v34, 16  ;;  %v1957_v51 = vshrl.u32 %v75_v35, 16 }
  0x22   :  { %v84_v52 = vxor.u32 %v71_v11, %v66_v36  ;;  %v85_v53 = vxor.u32 %v71_v11, %v67_v37  ;;  %v1958_v54 = vshrl.u32 %v76_v38, 16  ;;  %v1959_v55 = vshrl.u32 %v77_v39, 16 }
  0x23   :  { %v86_v56 = vxor.u32 %v71_v11, %v68_v40  ;;  %v87_v57 = vxor.u32 %v71_v11, %v69_v41  ;;  %v1960_v58 = vshrl.u32 %v78_v42, 16  ;;  %v1961_v59 = vshrl.u32 %v79_v43, 16 }
  0x24   :  { %v1962_v60 = vshrl.u32 %v80_v44, 16  ;;  %v1963_v61 = vshrl.u32 %v81_v45, 16  ;;  %v120_v62 = vxor.u32 %v1954_v46, %v72_v30  ;;  %v121_v63 = vxor.u32 %v1955_v47, %v73_v31 }
  0x25   :  { %v1964_v0 = vshrl.u32 %v82_v48, 16  ;;  %v1965_v2 = vshrl.u32 %v83_v49, 16  ;;  %v122_v3 = vxor.u32 %v1956_v50, %v74_v34  ;;  %v123_v4 = vxor.u32 %v1957_v51, %v75_v35 }
  0x26   :  { %v1966_v5 = vshrl.u32 %v84_v52, 16  ;;  %v1967_v6 = vshrl.u32 %v85_v53, 16  ;;  %v124_v7 = vxor.u32 %v1958_v54, %v76_v38  ;;  %v125_v8 = vxor.u32 %v1959_v55, %v77_v39 }
  0x27   :  { %v1968_v9 = vshrl.u32 %v86_v56, 16  ;;  %v1969_v10 = vshrl.u32 %v87_v57, 16  ;;  %v126_v12 = vxor.u32 %v1960_v58, %v78_v42  ;;  %v127_v13 = vxor.u32 %v1961_v59, %v79_v43 }
  0x28   :  { %v128_v14 = vxor.u32 %v1962_v60, %v80_v44  ;;  %v129_v11 = vxor.u32 %v1963_v61, %v81_v45  ;;  %v136_v15 = vmul.u32 2246822507, %v120_v62  ;;  %v137_v16 = vmul.u32 2246822507, %v121_v63 }
  0x29   :  { %v130_v17 = vxor.u32 %v1964_v0, %v82_v48  ;;  %v131_v18 = vxor.u32 %v1965_v2, %v83_v49  ;;  %v138_v19 = vmul.u32 2246822507, %v122_v3  ;;  %v139_v20 = vmul.u32 2246822507, %v123_v4 }
  0x2a   :  { %v132_v21 = vxor.u32 %v1966_v5, %v84_v52  ;;  %v133_v22 = vxor.u32 %v1967_v6, %v85_v53  ;;  %v140_v23 = vmul.u32 2246822507, %v124_v7  ;;  %v141_v24 = vmul.u32 2246822507, %v125_v8 }
  0x2b   :  { %v134_v25 = vxor.u32 %v1968_v9, %v86_v56  ;;  %v135_v26 = vxor.u32 %v1969_v10, %v87_v57  ;;  %v142_v27 = vmul.u32 2246822507, %v126_v12  ;;  %v143_v28 = vmul.u32 2246822507, %v127_v13 }
  0x2c   :  { %v144_v29 = vmul.u32 2246822507, %v128_v14  ;;  %v145_v30 = vmul.u32 2246822507, %v129_v11  ;;  %v1970_v31 = vshrl.u32 %v136_v15, 13  ;;  %v1971_v32 = vshrl.u32 %v137_v16, 13 }
  0x2d   :  { %v146_v33 = vmul.u32 2246822507, %v130_v17  ;;  %v147_v34 = vmul.u32 2246822507, %v131_v18  ;;  %v1972_v35 = vshrl.u32 %v138_v19, 13  ;;  %v1973_v36 = vshrl.u32 %v139_v20, 13 }
  0x2e   :  { %v148_v37 = vmul.u32 2246822507, %v132_v21  ;;  %v149_v38 = vmul.u32 2246822507, %v133_v22  ;;  %v1974_v39 = vshrl.u32 %v140_v23, 13  ;;  %v1975_v40 = vshrl.u32 %v141_v24, 13 }
  0x2f   :  { %v150_v41 = vmul.u32 2246822507, %v134_v25  ;;  %v151_v42 = vmul.u32 2246822507, %v135_v26  ;;  %v1976_v43 = vshrl.u32 %v142_v27, 13  ;;  %v1977_v44 = vshrl.u32 %v143_v28, 13 }
  0x30   :  { %v1978_v45 = vshrl.u32 %v144_v29, 13  ;;  %v1979_v46 = vshrl.u32 %v145_v30, 13  ;;  %v184_v47 = vxor.u32 %v1970_v31, %v136_v15  ;;  %v185_v48 = vxor.u32 %v1971_v32, %v137_v16 }
  0x31   :  { %v1980_v49 = vshrl.u32 %v146_v33, 13  ;;  %v1981_v50 = vshrl.u32 %v147_v34, 13  ;;  %v186_v51 = vxor.u32 %v1972_v35, %v138_v19  ;;  %v187_v52 = vxor.u32 %v1973_v36, %v139_v20 }
  0x32   :  { %v1982_v53 = vshrl.u32 %v148_v37, 13  ;;  %v1983_v54 = vshrl.u32 %v149_v38, 13  ;;  %v188_v55 = vxor.u32 %v1974_v39, %v140_v23  ;;  %v189_v56 = vxor.u32 %v1975_v40, %v141_v24 }
  0x33   :  { %v1984_v57 = vshrl.u32 %v150_v41, 13  ;;  %v1985_v58 = vshrl.u32 %v151_v42, 13  ;;  %v190_v59 = vxor.u32 %v1976_v43, %v142_v27  ;;  %v191_v60 = vxor.u32 %v1977_v44, %v143_v28 }
  0x34   :  { %v192_v61 = vxor.u32 %v1978_v45, %v144_v29  ;;  %v193_v62 = vxor.u32 %v1979_v46, %v145_v30  ;;  %v200_v63 = vmul.u32 3266489909, %v184_v47  ;;  %v201_v0 = vmul.u32 3266489909, %v185_v48 }
  0x35   :  { %v194_v2 = vxor.u32 %v1980_v49, %v146_v33  ;;  %v195_v3 = vxor.u32 %v1981_v50, %v147_v34  ;;  %v202_v4 = vmul.u32 3266489909, %v186_v51  ;;  %v203_v5 = vmul.u32 3266489909, %v187_v52 }
  0x36   :  { %v196_v6 = vxor.u32 %v1982_v53, %v148_v37  ;;  %v197_v7 = vxor.u32 %v1983_v54, %v149_v38  ;;  %v204_v8 = vmul.u32 3266489909, %v188_v55  ;;  %v205_v9 = vmul.u32 3266489909, %v189_v56 }
  0x37   :  { %v198_v10 = vxor.u32 %v1984_v57, %v150_v41  ;;  %v199_v12 = vxor.u32 %v1985_v58, %v151_v42  ;;  %v206_v13 = vmul.u32 3266489909, %v190_v59  ;;  %v207_v14 = vmul.u32 3266489909, %v191_v60 }
  0x38   :  { %v208_v11 = vmul.u32 3266489909, %v192_v61  ;;  %v209_v15 = vmul.u32 3266489909, %v193_v62  ;;  %v1986_v22 = vshrl.u32 %v200_v63, 16  ;;  %v1987_v23 = vshrl.u32 %v201_v0, 16 }
  0x39   :  { %v210_v16 = vmul.u32 3266489909, %v194_v2  ;;  %v211_v17 = vmul.u32 3266489909, %v195_v3  ;;  %v1988_v24 = vshrl.u32 %v202_v4, 16  ;;  %v1989_v25 = vshrl.u32 %v203_v5, 16 }
  0x3a   :  { %v212_v18 = vmul.u32 3266489909, %v196_v6  ;;  %v213_v19 = vmul.u32 3266489909, %v197_v7  ;;  %v1990_v26 = vshrl.u32 %v204_v8, 16  ;;  %v1991_v27 = vshrl.u32 %v205_v9, 16 }
  0x3b   :  { %v214_v20 = vmul.u32 3266489909, %v198_v10  ;;  %v215_v21 = vmul.u32 3266489909, %v199_v12  ;;  %v1992_v28 = vshrl.u32 %v206_v13, 16  ;;  %v1993_v29 = vshrl.u32 %v207_v14, 16 }
  0x3c   :  { %v1994_v30 = vshrl.u32 %v208_v11, 16  ;;  %v1995_v31 = vshrl.u32 %v209_v15, 16  ;;  %v1996_v32 = vshrl.u32 %v210_v16, 16  ;;  %v1997_v33 = vshrl.u32 %v211_v17, 16 }
  0x3d   :  { %v1998_v34 = vshrl.u32 %v212_v18, 16  ;;  %v1999_v35 = vshrl.u32 %v213_v19, 16  ;;  %v2000_v36 = vshrl.u32 %v214_v20, 16  ;;  %v2001_v37 = vshrl.u32 %v215_v21, 16 }
  0x3e   :  { %v248_v38 = vxor.u32 %v1986_v22, %v200_v63  ;;  %v249_v39 = vxor.u32 %v1987_v23, %v201_v0  ;;  %v250_v40 = vxor.u32 %v1988_v24, %v202_v4  ;;  %v251_v41 = vxor.u32 %v1989_v25, %v203_v5 }
  0x3f   :  { %v252_v42 = vxor.u32 %v1990_v26, %v204_v8  ;;  %v253_v43 = vxor.u32 %v1991_v27, %v205_v9  ;;  %v254_v44 = vxor.u32 %v1992_v28, %v206_v13  ;;  %v255_v45 = vxor.u32 %v1993_v29, %v207_v14 }
  0x40   :  { %v256_v46 = vxor.u32 %v1994_v30, %v208_v11  ;;  %v257_v47 = vxor.u32 %v1995_v31, %v209_v15  ;;  %v258_v48 = vxor.u32 %v1996_v32, %v210_v16  ;;  %v259_v49 = vxor.u32 %v1997_v33, %v211_v17 }
  0x41   :  { %v260_v50 = vxor.u32 %v1998_v34, %v212_v18  ;;  %v261_v51 = vxor.u32 %v1999_v35, %v213_v19  ;;  %v262_v52 = vxor.u32 %v2000_v36, %v214_v20  ;;  %v263_v53 = vxor.u32 %v2001_v37, %v215_v21 }
  0x42   :  { %v2002_v54 = vshrl.u32 %v248_v38, 9  ;;  %v2003_v55 = vshrl.u32 %v249_v39, 9  ;;  %v2004_v56 = vshrl.u32 %v250_v40, 9  ;;  %v2005_v57 = vshrl.u32 %v251_v41, 9 }
  0x43   :  { %v2006_v58 = vshrl.u32 %v252_v42, 9  ;;  %v2007_v59 = vshrl.u32 %v253_v43, 9  ;;  %v2008_v60 = vshrl.u32 %v254_v44, 9  ;;  %v2009_v61 = vshrl.u32 %v255_v45, 9 }
  0x44   :  { %v2010_v62 = vshrl.u32 %v256_v46, 9  ;;  %v2011_v63 = vshrl.u32 %v257_v47, 9  ;;  %v2012_v0 = vshrl.u32 %v258_v48, 9  ;;  %v2013_v2 = vshrl.u32 %v259_v49, 9 }
  0x45   :  { %v2014_v3 = vshrl.u32 %v260_v50, 9  ;;  %v2015_v4 = vshrl.u32 %v261_v51, 9  ;;  %v2016_v5 = vshrl.u32 %v262_v52, 9  ;;  %v2017_v6 = vshrl.u32 %v263_v53, 9 }
  0x46   :  { %v296_v7 = vcvt.s32.f32 %v2002_v54  ;;  %v297_v8 = vcvt.s32.f32 %v2003_v55  ;;  %v298_v9 = vcvt.s32.f32 %v2004_v56  ;;  %v299_v10 = vcvt.s32.f32 %v2005_v57 }
  0x47   :  { %v300_v12 = vcvt.s32.f32 %v2006_v58  ;;  %v301_v13 = vcvt.s32.f32 %v2007_v59  ;;  %v302_v14 = vcvt.s32.f32 %v2008_v60  ;;  %v303_v11 = vcvt.s32.f32 %v2009_v61 }
  0x48   :  { %v304_v15 = vcvt.s32.f32 %v2010_v62  ;;  %v305_v16 = vcvt.s32.f32 %v2011_v63  ;;  %v306_v17 = vcvt.s32.f32 %v2012_v0  ;;  %v307_v18 = vcvt.s32.f32 %v2013_v2 }
  0x49   :  { %v308_v19 = vcvt.s32.f32 %v2014_v3  ;;  %v309_v20 = vcvt.s32.f32 %v2015_v4  ;;  %v310_v21 = vcvt.s32.f32 %v2016_v5  ;;  %v311_v22 = vcvt.s32.f32 %v2017_v6 }
  0x4a   :  { %v312_v23 = vadd.f32 0.5, %v296_v7  ;;  %v313_v24 = vadd.f32 0.5, %v297_v8  ;;  %v314_v25 = vadd.f32 0.5, %v298_v9  ;;  %v315_v26 = vadd.f32 0.5, %v299_v10 }
  0x4b   :  { %v316_v27 = vadd.f32 0.5, %v300_v12  ;;  %v317_v28 = vadd.f32 0.5, %v301_v13  ;;  %v318_v29 = vadd.f32 0.5, %v302_v14  ;;  %v319_v30 = vadd.f32 0.5, %v303_v11 }
  0x4c   :  { %v320_v31 = vadd.f32 0.5, %v304_v15  ;;  %v321_v32 = vadd.f32 0.5, %v305_v16  ;;  %v322_v33 = vadd.f32 0.5, %v306_v17  ;;  %v323_v34 = vadd.f32 0.5, %v307_v18 }
  0x4d   :  { %v324_v35 = vadd.f32 0.5, %v308_v19  ;;  %v325_v36 = vadd.f32 0.5, %v309_v20  ;;  %v326_v37 = vadd.f32 0.5, %v310_v21  ;;  %v327_v38 = vadd.f32 0.5, %v311_v22 }
  0x4e   :  { %v2350_v39 = vmul.f32 1.1920929e-07, %v312_v23  ;;  %v2352_v40 = vmul.f32 1.1920929e-07, %v313_v24  ;;  %v2354_v41 = vmul.f32 1.1920929e-07, %v314_v25  ;;  %v2356_v42 = vmul.f32 1.1920929e-07, %v315_v26 }
  0x4f   :  { %v2358_v43 = vmul.f32 1.1920929e-07, %v316_v27  ;;  %v2360_v44 = vmul.f32 1.1920929e-07, %v317_v28  ;;  %v2362_v45 = vmul.f32 1.1920929e-07, %v318_v29  ;;  %v2364_v46 = vmul.f32 1.1920929e-07, %v319_v30 }
  0x50   :  { %4208 = vst [vmem:[#allocation11_spill] sm:$0xff] %v2350_v39  ;;  %4209 = vst [vmem:[#allocation12_spill] sm:$0xff] %v2352_v40  ;;  %v2366_v47 = vmul.f32 1.1920929e-07, %v320_v31  ;;  %v2368_v48 = vmul.f32 1.1920929e-07, %v321_v32  ;;  %v2370_v49 = vmul.f32 1.1920929e-07, %v322_v33  ;;  %v2372_v50 = vmul.f32 1.1920929e-07, %v323_v34 }
  0x51   :  { %4210 = vst [vmem:[#allocation13_spill] sm:$0xff] %v2354_v41  ;;  %4211 = vst [vmem:[#allocation14_spill] sm:$0xff] %v2356_v42  ;;  %v2374_v51 = vmul.f32 1.1920929e-07, %v324_v35  ;;  %v2376_v52 = vmul.f32 1.1920929e-07, %v325_v36  ;;  %v2378_v53 = vmul.f32 1.1920929e-07, %v326_v37  ;;  %v2380_v54 = vmul.f32 1.1920929e-07, %v327_v38 }
  0x52   :  { %4212 = vst [vmem:[#allocation15_spill] sm:$0xff] %v2358_v43  ;;  %4213 = vst [vmem:[#allocation16_spill] sm:$0xff] %v2360_v44  ;;  %v2383_v55 = vadd.f32 -0.5, %v2350_v39  ;;  %v2386_v56 = vadd.f32 -0.5, %v2352_v40  ;;  %v2389_v57 = vadd.f32 -0.5, %v2354_v41  ;;  %v2392_v58 = vadd.f32 -0.5, %v2356_v42 }
  0x53   :  { %4214 = vst [vmem:[#allocation17_spill] sm:$0xff] %v2362_v45  ;;  %4215 = vst [vmem:[#allocation18_spill] sm:$0xff] %v2364_v46  ;;  %v2395_v59 = vadd.f32 -0.5, %v2358_v43  ;;  %v2398_v60 = vadd.f32 -0.5, %v2360_v44  ;;  %v2401_v61 = vadd.f32 -0.5, %v2362_v45  ;;  %v2404_v62 = vadd.f32 -0.5, %v2364_v46 }
  0x54   :  { %4216 = vst [vmem:[#allocation19_spill] sm:$0xff] %v2366_v47  ;;  %4217 = vst [vmem:[#allocation20_spill] sm:$0xff] %v2368_v48  ;;  %v2407_v63 = vadd.f32 -0.5, %v2366_v47  ;;  %v2410_v0 = vadd.f32 -0.5, %v2368_v48  ;;  %v2413_v2 = vadd.f32 -0.5, %v2370_v49  ;;  %v2416_v3 = vadd.f32 -0.5, %v2372_v50 }
  0x55   :  { %4218 = vst [vmem:[#allocation21_spill] sm:$0xff] %v2370_v49  ;;  %4219 = vst [vmem:[#allocation22_spill] sm:$0xff] %v2372_v50  ;;  %v2419_v4 = vadd.f32 -0.5, %v2374_v51  ;;  %v2422_v5 = vadd.f32 -0.5, %v2376_v52  ;;  %v2425_v6 = vadd.f32 -0.5, %v2378_v53  ;;  %v2428_v7 = vadd.f32 -0.5, %v2380_v54 }
  0x56   :  { %4220 = vst [vmem:[#allocation23_spill] sm:$0xff] %v2374_v51  ;;  %4221 = vst [vmem:[#allocation24_spill] sm:$0xff] %v2376_v52  ;;  %v2432_v8 = vmul.f32 %v2383_v55, %v2383_v55  ;;  %v2436_v9 = vmul.f32 %v2386_v56, %v2386_v56  ;;  %v2440_v10 = vmul.f32 %v2389_v57, %v2389_v57  ;;  %2037 = vlog2.f32 %v2350_v39 }
  0x57   :  { %4222 = vst [vmem:[#allocation25_spill] sm:$0xff] %v2378_v53  ;;  %4223 = vst [vmem:[#allocation26_spill] sm:$0xff] %v2380_v54  ;;  %v2444_v12 = vmul.f32 %v2392_v58, %v2392_v58  ;;  %v2448_v13 = vmul.f32 %v2395_v59, %v2395_v59  ;;  %v2452_v14 = vmul.f32 %v2398_v60, %v2398_v60  ;;  %2039 = vlog2.f32 %v2352_v40 }
  0x58   :  { %4224 = vst [vmem:[#allocation27_spill] sm:$0xff] %v2395_v59  ;;  %4225 = vst [vmem:[#allocation28_spill] sm:$0xff] %v2398_v60  ;;  %v2456_v11 = vmul.f32 %v2401_v61, %v2401_v61  ;;  %v2460_v15 = vmul.f32 %v2404_v62, %v2404_v62  ;;  %v2464_v16 = vmul.f32 %v2407_v63, %v2407_v63  ;;  %v376_v23 = vmul.f32 -39.69683, %v2432_v8 }
  0x59   :  { %4226 = vst [vmem:[#allocation29_spill] sm:$0xff] %v2401_v61  ;;  %4227 = vst [vmem:[#allocation30_spill] sm:$0xff] %v2404_v62  ;;  %v2468_v17 = vmul.f32 %v2410_v0, %v2410_v0  ;;  %v2472_v18 = vmul.f32 %v2413_v2, %v2413_v2  ;;  %v2476_v19 = vmul.f32 %v2416_v3, %v2416_v3  ;;  %v377_v24 = vmul.f32 -39.69683, %v2436_v9 }
  0x5a   :  { %4228 = vst [vmem:[#allocation31_spill] sm:$0xff] %v2407_v63  ;;  %4229 = vst [vmem:[#allocation32_spill] sm:$0xff] %v2410_v0  ;;  %v2480_v20 = vmul.f32 %v2419_v4, %v2419_v4  ;;  %v2484_v21 = vmul.f32 %v2422_v5, %v2422_v5  ;;  %v2488_v22 = vmul.f32 %v2425_v6, %v2425_v6  ;;  %v378_v26 = vmul.f32 -39.69683, %v2440_v10 }
  0x5b   :  { %4230 = vst [vmem:[#allocation33_spill] sm:$0xff] %v2413_v2  ;;  %4231 = vst [vmem:[#allocation34_spill] sm:$0xff] %v2416_v3  ;;  %v2494_v25 = vmul.f32 %v2428_v7, %v2428_v7  ;;  %v379_v27 = vmul.f32 -39.69683, %v2444_v12  ;;  %v380_v28 = vmul.f32 -39.69683, %v2448_v13  ;;  %2041 = vlog2.f32 %v2354_v41 }
  0x5c   :  { %4232 = vst [vmem:[#allocation35_spill] sm:$0xff] %v2419_v4  ;;  %4233 = vst [vmem:[#allocation36_spill] sm:$0xff] %v2422_v5  ;;  %v381_v29 = vmul.f32 -39.69683, %v2452_v14  ;;  %v382_v30 = vmul.f32 -39.69683, %v2456_v11  ;;  %2043 = vlog2.f32 %v2356_v42 }
  0x5d   :  { %4234 = vst [vmem:[#allocation37_spill] sm:$0xff] %v2425_v6  ;;  %4235 = vst [vmem:[#allocation38_spill] sm:$0xff] %v2428_v7  ;;  %v383_v31 = vmul.f32 -39.69683, %v2460_v15  ;;  %v384_v32 = vmul.f32 -39.69683, %v2464_v16  ;;  %2045 = vlog2.f32 %v2358_v43 }
  0x5e   :  { %v385_v33 = vmul.f32 -39.69683, %v2468_v17  ;;  %v386_v34 = vmul.f32 -39.69683, %v2472_v18  ;;  %v387_v35 = vmul.f32 -39.69683, %v2476_v19  ;;  %2047 = vlog2.f32 %v2360_v44 }
  0x5f   :  { %v388_v36 = vmul.f32 -39.69683, %v2480_v20  ;;  %v389_v37 = vmul.f32 -39.69683, %v2484_v21  ;;  %v390_v38 = vmul.f32 -39.69683, %v2488_v22  ;;  %2049 = vlog2.f32 %v2362_v45 }
  0x60   :  { %v391_v1 = vmul.f32 -39.69683, %v2494_v25  ;;  %v392_v39 = vadd.f32 220.9461, %v376_v23  ;;  %v393_v7 = vadd.f32 220.9461, %v377_v24  ;;  %2051 = vlog2.f32 %v2364_v46 }
  0x61   :  { %v394_v6 = vadd.f32 220.9461, %v378_v26  ;;  %v395_v5 = vadd.f32 220.9461, %v379_v27  ;;  %v396_v40 = vadd.f32 220.9461, %v380_v28  ;;  %2053 = vlog2.f32 %v2366_v47 }
  0x62   :  { %v397_v4 = vadd.f32 220.9461, %v381_v29  ;;  %v398_v3 = vadd.f32 220.9461, %v382_v30  ;;  %v399_v2 = vadd.f32 220.9461, %v383_v31  ;;  %v408_v42 = vmul.f32 %v392_v39, %v2432_v8 }
  0x63   :  { %v400_v54 = vadd.f32 220.9461, %v384_v32  ;;  %v401_v41 = vadd.f32 220.9461, %v385_v33  ;;  %v402_v0 = vadd.f32 220.9461, %v386_v34  ;;  %v409_v27 = vmul.f32 %v393_v7, %v2436_v9  ;;  %v2523_v33 = vpop.eup %2037 }
  0x64   :  { %v403_v53 = vadd.f32 220.9461, %v387_v35  ;;  %v404_v23 = vadd.f32 220.9461, %v388_v36  ;;  %v405_v24 = vadd.f32 220.9461, %v389_v37  ;;  %v410_v28 = vmul.f32 %v394_v6, %v2440_v10  ;;  %v2529_v7 = vpop.eup %2039 }
  0x65   :  { %v406_v26 = vadd.f32 220.9461, %v390_v38  ;;  %v407_v29 = vadd.f32 220.9461, %v391_v1  ;;  %v411_v30 = vmul.f32 %v395_v5, %v2444_v12  ;;  %v412_v31 = vmul.f32 %v396_v40, %v2448_v13  ;;  %4236 = vst [vmem:[#allocation39_spill] sm:$0xff] %v2523_v33  ;;  %4237 = vst [vmem:[#allocation40_spill] sm:$0xff] %v2529_v7 }
  0x66   :  { %v413_v32 = vmul.f32 %v397_v4, %v2452_v14  ;;  %v414_v34 = vmul.f32 %v398_v3, %v2456_v11  ;;  %v415_v35 = vmul.f32 %v399_v2, %v2460_v15  ;;  %v416_v39 = vmul.f32 %v400_v54, %v2464_v16  ;;  %v2534_v4 = vpop.eup %2041 }
  0x67   :  { %v417_v36 = vmul.f32 %v401_v41, %v2468_v17  ;;  %v418_v1 = vmul.f32 %v402_v0, %v2472_v18  ;;  %v419_v5 = vmul.f32 %v403_v53, %v2476_v19  ;;  %v420_v40 = vmul.f32 %v404_v23, %v2480_v20  ;;  %4238 = vst [vmem:[#allocation41_spill] sm:$0xff] %v2534_v4  ;;  %v2538_v54 = vpop.eup %2043 }
  0x68   :  { %v424_v6 = vadd.f32 -275.9285, %v408_v42  ;;  %v421_v37 = vmul.f32 %v405_v24, %v2484_v21  ;;  %v422_v3 = vmul.f32 %v406_v26, %v2488_v22  ;;  %v425_v2 = vadd.f32 -275.9285, %v409_v27  ;;  %4239 = vst [vmem:[#allocation42_spill] sm:$0xff] %v2538_v54  ;;  %v2541_v43 = vpop.eup %2045 }
  0x69   :  { %v426_v38 = vadd.f32 -275.9285, %v410_v28  ;;  %v423_v41 = vmul.f32 %v407_v29, %v2494_v25  ;;  %v427_v45 = vadd.f32 -275.9285, %v411_v30  ;;  %v428_v44 = vadd.f32 -275.9285, %v412_v31  ;;  %v2544_v63 = vpop.eup %2047 }
  0x6a   :  { %v429_v0 = vadd.f32 -275.9285, %v413_v32  ;;  %4240 = vst [vmem:[#allocation43_spill] sm:$0xff] %v2541_v43  ;;  %v430_v53 = vadd.f32 -275.9285, %v414_v34  ;;  %4241 = vst [vmem:[#allocation44_spill] sm:$0xff] %v2544_v63  ;;  %v440_v28 = vmul.f32 %v424_v6, %v2432_v8  ;;  %v2547_v54 = vpop.eup %2049  ;;  %v441_v32 = vmul.f32 %v425_v2, %v2436_v9 }
  0x6b   :  { %v431_v23 = vadd.f32 -275.9285, %v415_v35  ;;  %v432_v42 = vadd.f32 -275.9285, %v416_v39  ;;  %v433_v24 = vadd.f32 -275.9285, %v417_v36  ;;  %v442_v34 = vmul.f32 %v426_v38, %v2440_v10 }
  0x6c   :  { %v434_v26 = vadd.f32 -275.9285, %v418_v1  ;;  %v435_v27 = vadd.f32 -275.9285, %v419_v5  ;;  %4242 = vst [vmem:[#allocation45_spill] sm:$0xff] %v2547_v54  ;;  %v443_v35 = vmul.f32 %v427_v45, %v2444_v12  ;;  %v444_v39 = vmul.f32 %v428_v44, %v2448_v13 }
  0x6d   :  { %v436_v29 = vadd.f32 -275.9285, %v420_v40  ;;  %v437_v30 = vadd.f32 -275.9285, %v421_v37  ;;  %v438_v31 = vadd.f32 -275.9285, %v422_v3  ;;  %v445_v36 = vmul.f32 %v429_v0, %v2452_v14 }
  0x6e   :  { %v439_v43 = vadd.f32 -275.9285, %v423_v41  ;;  %v446_v1 = vmul.f32 %v430_v53, %v2456_v11  ;;  %v447_v5 = vmul.f32 %v431_v23, %v2460_v15  ;;  %v448_v6 = vmul.f32 %v432_v42, %v2464_v16 }
  0x6f   :  { %v449_v40 = vmul.f32 %v433_v24, %v2468_v17  ;;  %v450_v37 = vmul.f32 %v434_v26, %v2472_v18  ;;  %v451_v3 = vmul.f32 %v435_v27, %v2476_v19  ;;  %v456_v2 = vadd.f32 138.35776, %v440_v28 }
  0x70   :  { %v452_v38 = vmul.f32 %v436_v29, %v2480_v20  ;;  %v453_v45 = vmul.f32 %v437_v30, %v2484_v21  ;;  %v454_v44 = vmul.f32 %v438_v31, %v2488_v22  ;;  %v457_v41 = vadd.f32 138.35776, %v441_v32  ;;  %v2567_v30 = vpop.eup %2051 }
  0x71   :  { %v455_v0 = vmul.f32 %v439_v43, %v2494_v25  ;;  %v458_v53 = vadd.f32 138.35776, %v442_v34  ;;  %v459_v23 = vadd.f32 138.35776, %v443_v35  ;;  %v460_v42 = vadd.f32 138.35776, %v444_v39 }
  0x72   :  { %v461_v24 = vadd.f32 138.35776, %v445_v36  ;;  %v462_v46 = vadd.f32 138.35776, %v446_v1  ;;  %2055 = vlog2.f32 %v2368_v48  ;;  %v463_v26 = vadd.f32 138.35776, %v447_v5 }
  0x73   :  { %v464_v27 = vadd.f32 138.35776, %v448_v6  ;;  %v465_v28 = vadd.f32 138.35776, %v449_v40  ;;  %v472_v29 = vmul.f32 %v456_v2, %v2432_v8  ;;  %4243 = vst [vmem:[#allocation46_spill] sm:$0xff] %v2567_v30  ;;  %v473_v43 = vmul.f32 %v457_v41, %v2436_v9 }
  0x74   :  { %v466_v31 = vadd.f32 138.35776, %v450_v37  ;;  %v467_v32 = vadd.f32 138.35776, %v451_v3  ;;  %v468_v54 = vadd.f32 138.35776, %v452_v38  ;;  %v474_v39 = vmul.f32 %v458_v53, %v2440_v10 }
  0x75   :  { %v469_v34 = vadd.f32 138.35776, %v453_v45  ;;  %v470_v35 = vadd.f32 138.35776, %v454_v44  ;;  %v471_v47 = vadd.f32 138.35776, %v455_v0  ;;  %v475_v36 = vmul.f32 %v459_v23, %v2444_v12 }
  0x76   :  { %v476_v1 = vmul.f32 %v460_v42, %v2448_v13  ;;  %v477_v5 = vmul.f32 %v461_v24, %v2452_v14  ;;  %v478_v6 = vmul.f32 %v462_v46, %v2456_v11  ;;  %v479_v40 = vmul.f32 %v463_v26, %v2460_v15 }
  0x77   :  { %v480_v37 = vmul.f32 %v464_v27, %v2464_v16  ;;  %v481_v3 = vmul.f32 %v465_v28, %v2468_v17  ;;  %v488_v2 = vadd.f32 -30.664799, %v472_v29  ;;  %v482_v38 = vmul.f32 %v466_v31, %v2472_v18  ;;  %v2585_v27 = vpop.eup %2053 }
  0x78   :  { %v483_v45 = vmul.f32 %v467_v32, %v2476_v19  ;;  %v484_v44 = vmul.f32 %v468_v54, %v2480_v20  ;;  %v489_v41 = vadd.f32 -30.664799, %v473_v43  ;;  %v485_v0 = vmul.f32 %v469_v34, %v2484_v21  ;;  %4244 = vst [vmem:[#allocation47_spill] sm:$0xff] %v2585_v27 }
  0x79   :  { %v486_v53 = vmul.f32 %v470_v35, %v2488_v22  ;;  %v487_v46 = vmul.f32 %v471_v47, %v2494_v25  ;;  %v490_v23 = vadd.f32 -30.664799, %v474_v39  ;;  %v491_v42 = vadd.f32 -30.664799, %v475_v36 }
  0x7a   :  { %v492_v24 = vadd.f32 -30.664799, %v476_v1  ;;  %v493_v26 = vadd.f32 -30.664799, %v477_v5  ;;  %2057 = vlog2.f32 %v2370_v49  ;;  %v494_v28 = vadd.f32 -30.664799, %v478_v6 }
  0x7b   :  { %v495_v29 = vadd.f32 -30.664799, %v479_v40  ;;  %v496_v31 = vadd.f32 -30.664799, %v480_v37  ;;  %v504_v54 = vmul.f32 %v488_v2, %v2432_v8  ;;  %v497_v43 = vadd.f32 -30.664799, %v481_v3 }
  0x7c   :  { %v2588_v32 = vpop.eup %2055  ;;  %v498_v34 = vadd.f32 -30.664799, %v482_v38  ;;  %v499_v35 = vadd.f32 -30.664799, %v483_v45  ;;  %v505_v47 = vmul.f32 %v489_v41, %v2436_v9  ;;  %v500_v39 = vadd.f32 -30.664799, %v484_v44 }
  0x7d   :  { %4245 = vst [vmem:[#allocation48_spill] sm:$0xff] %v2588_v32  ;;  %v501_v36 = vadd.f32 -30.664799, %v485_v0  ;;  %v506_v1 = vmul.f32 %v490_v23, %v2440_v10  ;;  %v536_v5 = vmul.f32 -54.476097, %v2432_v8  ;;  %v507_v6 = vmul.f32 %v491_v42, %v2444_v12 }
  0x7e   :  { %v502_v49 = vadd.f32 -30.664799, %v486_v53  ;;  %v503_v48 = vadd.f32 -30.664799, %v487_v46  ;;  %v537_v40 = vmul.f32 -54.476097, %v2436_v9  ;;  %v508_v37 = vmul.f32 %v492_v24, %v2448_v13 }
  0x7f   :  { %v509_v3 = vmul.f32 %v493_v26, %v2452_v14  ;;  %v510_v2 = vmul.f32 %v494_v28, %v2456_v11  ;;  %v538_v38 = vmul.f32 -54.476097, %v2440_v10  ;;  %v2600_v45 = vmul.f32 %v495_v29, %v2460_v15 }
  0x80   :  { %v2603_v44 = vmul.f32 %v496_v31, %v2464_v16  ;;  %v2606_v41 = vmul.f32 %v497_v43, %v2468_v17  ;;  %v539_v0 = vmul.f32 -54.476097, %v2444_v12  ;;  %v2610_v53 = vmul.f32 %v498_v34, %v2472_v18 }
  0x81   :  { %v2613_v46 = vmul.f32 %v499_v35, %v2476_v19  ;;  %v540_v23 = vmul.f32 -54.476097, %v2448_v13  ;;  %v552_v42 = vadd.f32 161.58583, %v536_v5  ;;  %v2617_v24 = vmul.f32 %v500_v39, %v2480_v20 }
  0x82   :  { %v2620_v26 = vmul.f32 %v501_v36, %v2484_v21  ;;  %v541_v28 = vmul.f32 -54.476097, %v2452_v14  ;;  %v553_v29 = vadd.f32 161.58583, %v537_v40  ;;  %v2624_v31 = vmul.f32 %v502_v49, %v2488_v22 }
  0x83   :  { %v520_v43 = vadd.f32 2.5066283, %v504_v54  ;;  %v542_v34 = vmul.f32 -54.476097, %v2456_v11  ;;  %v554_v35 = vadd.f32 161.58583, %v538_v38  ;;  %v2630_v5 = vmul.f32 %v503_v48, %v2494_v25 }
  0x84   :  { %v2627_v32 = vpop.eup %2057  ;;  %v2632_v39 = vadd.f32 2.5066283, %v505_v47  ;;  %v543_v36 = vmul.f32 -54.476097, %v2460_v15  ;;  %v555_v27 = vadd.f32 161.58583, %v539_v0  ;;  %v568_v54 = vmul.f32 %v552_v42, %v2432_v8 }
  0x85   :  { %4246 = vst [vmem:[#allocation49_spill] sm:$0xff] %v2627_v32  ;;  %v2635_v30 = vadd.f32 2.5066283, %v506_v1  ;;  %v544_v40 = vmul.f32 -54.476097, %v2464_v16  ;;  %v569_v48 = vmul.f32 %v553_v29, %v2436_v9  ;;  %v570_v4 = vmul.f32 %v554_v35, %v2440_v10 }
  0x86   :  { %v556_v49 = vadd.f32 161.58583, %v540_v23  ;;  %v2639_v63 = vadd.f32 2.5066283, %v507_v6  ;;  %v545_v38 = vmul.f32 -54.476097, %v2468_v17  ;;  %2059 = vlog2.f32 %v2372_v50 }
  0x87   :  { %v557_v32 = vadd.f32 161.58583, %v541_v28  ;;  %v546_v47 = vmul.f32 -54.476097, %v2472_v18  ;;  %v558_v52 = vadd.f32 161.58583, %v542_v34  ;;  %v571_v6 = vmul.f32 %v555_v27, %v2444_v12 }
  0x88   :  { %v2646_v1 = vadd.f32 2.5066283, %v508_v37  ;;  %v2648_v0 = vadd.f32 2.5066283, %v509_v3  ;;  %v559_v23 = vadd.f32 161.58583, %v543_v36  ;;  %v572_v28 = vmul.f32 %v556_v49, %v2448_v13 }
  0x89   :  { %v547_v42 = vmul.f32 -54.476097, %v2476_v19  ;;  %v560_v62 = vadd.f32 161.58583, %v544_v40  ;;  %v584_v29 = vadd.f32 -155.69897, %v568_v54  ;;  %v573_v35 = vmul.f32 %v557_v32, %v2452_v14 }
  0x8a   :  { %4247 = vst [vmem:[#allocation50_spill] sm:$0xff] %v2648_v0  ;;  %v548_v7 = vmul.f32 -54.476097, %v2480_v20  ;;  %v561_v34 = vadd.f32 161.58583, %v545_v38  ;;  %v574_v3 = vmul.f32 %v558_v52, %v2456_v11  ;;  %v575_v33 = vmul.f32 %v559_v23, %v2460_v15 }
  0x8b   :  { %v585_v61 = vadd.f32 -155.69897, %v569_v48  ;;  %v2655_v50 = vadd.f32 2.5066283, %v510_v2  ;;  %v562_v37 = vadd.f32 161.58583, %v546_v47  ;;  %v2661_v49 = vmul.f32 %v2383_v55, %v520_v43 }
  0x8c   :  { %v586_v36 = vadd.f32 -155.69897, %v570_v4  ;;  %v549_v27 = vmul.f32 -54.476097, %v2484_v21  ;;  %v587_v40 = vadd.f32 -155.69897, %v571_v6  ;;  %v576_v38 = vmul.f32 %v560_v62, %v2464_v16 }
  0x8d   :  { %4248 = vst [vmem:[#allocation51_spill] sm:$0xff] %v2655_v50  ;;  %4249 = vst [vmem:[#allocation52_spill] sm:$0xff] %v2661_v49  ;;  %v563_v54 = vadd.f32 161.58583, %v547_v42  ;;  %v588_v60 = vadd.f32 -155.69897, %v572_v28  ;;  %v600_v32 = vmul.f32 %v584_v29, %v2432_v8  ;;  %v577_v48 = vmul.f32 %v561_v34, %v2468_v17 }
  0x8e   :  { %v564_v2 = vadd.f32 161.58583, %v548_v7  ;;  %v589_v47 = vadd.f32 -155.69897, %v573_v35  ;;  %v601_v52 = vmul.f32 %v585_v61, %v2436_v9  ;;  %v550_v4 = vmul.f32 -54.476097, %v2488_v22 }
  0x8f   :  { %v578_v23 = vmul.f32 %v562_v37, %v2472_v18  ;;  %v590_v6 = vadd.f32 -155.69897, %v574_v3  ;;  %v602_v55 = vmul.f32 %v586_v36, %v2440_v10  ;;  %v551_v43 = vmul.f32 -54.476097, %v2494_v25 }
  0x90   :  { %v565_v42 = vadd.f32 161.58583, %v549_v27  ;;  %v591_v62 = vadd.f32 -155.69897, %v575_v33  ;;  %v603_v28 = vmul.f32 %v587_v40, %v2444_v12  ;;  %v2672_v29 = vpop.eup %2059  ;;  %v579_v7 = vmul.f32 %v563_v54, %v2476_v19 }
  0x91   :  { %4250 = vst [vmem:[#allocation53_spill] sm:$0xff] %v2672_v29  ;;  %v592_v34 = vadd.f32 -155.69897, %v576_v38  ;;  %v604_v61 = vmul.f32 %v588_v60, %v2448_v13  ;;  %v616_v35 = vadd.f32 66.801315, %v600_v32  ;;  %v580_v49 = vmul.f32 %v564_v2, %v2480_v20 }
  0x92   :  { %v593_v37 = vadd.f32 -155.69897, %v577_v48  ;;  %v605_v3 = vmul.f32 %v589_v47, %v2452_v14  ;;  %v617_v36 = vadd.f32 66.801315, %v601_v52  ;;  %v566_v50 = vadd.f32 161.58583, %v550_v4 }
  0x93   :  { %v594_v0 = vadd.f32 -155.69897, %v578_v23  ;;  %v606_v33 = vmul.f32 %v590_v6, %v2456_v11  ;;  %v618_v27 = vadd.f32 66.801315, %v602_v55  ;;  %v567_v40 = vadd.f32 161.58583, %v551_v43 }
  0x94   :  { %v581_v29 = vmul.f32 %v565_v42, %v2484_v21  ;;  %v607_v54 = vmul.f32 %v591_v62, %v2460_v15  ;;  %v619_v38 = vadd.f32 66.801315, %v603_v28  ;;  %v595_v59 = vadd.f32 -155.69897, %v579_v7 }
  0x95   :  { %v608_v60 = vmul.f32 %v592_v34, %v2464_v16  ;;  %v620_v32 = vadd.f32 66.801315, %v604_v61  ;;  %v632_v2 = vmul.f32 %v616_v35, %v2432_v8  ;;  %v596_v48 = vadd.f32 -155.69897, %v580_v49 }
  0x96   :  { %v609_v47 = vmul.f32 %v593_v37, %v2468_v17  ;;  %v621_v52 = vadd.f32 66.801315, %v605_v3  ;;  %v633_v4 = vmul.f32 %v617_v36, %v2436_v9  ;;  %v582_v23 = vmul.f32 %v566_v50, %v2488_v22 }
  0x97   :  { %v610_v6 = vmul.f32 %v594_v0, %v2472_v18  ;;  %v622_v55 = vadd.f32 66.801315, %v606_v33  ;;  %v634_v43 = vmul.f32 %v618_v27, %v2440_v10  ;;  %v583_v42 = vmul.f32 %v567_v40, %v2494_v25 }
  0x98   :  { %v597_v62 = vadd.f32 -155.69897, %v581_v29  ;;  %v623_v28 = vadd.f32 66.801315, %v607_v54  ;;  %v635_v7 = vmul.f32 %v619_v38, %v2444_v12  ;;  %v611_v49 = vmul.f32 %v595_v59, %v2476_v19 }
  0x99   :  { %v624_v34 = vadd.f32 66.801315, %v608_v60  ;;  %v636_v61 = vmul.f32 %v620_v32, %v2448_v13  ;;  %v648_v35 = vadd.f32 -13.280682, %v632_v2  ;;  %v612_v37 = vmul.f32 %v596_v48, %v2480_v20 }
  0x9a   :  { %v625_v50 = vadd.f32 66.801315, %v609_v47  ;;  %v637_v0 = vmul.f32 %v621_v52, %v2452_v14  ;;  %v649_v3 = vadd.f32 -13.280682, %v633_v4  ;;  %v598_v36 = vadd.f32 -155.69897, %v582_v23 }
  0x9b   :  { %v626_v33 = vadd.f32 66.801315, %v610_v6  ;;  %v638_v27 = vmul.f32 %v622_v55, %v2456_v11  ;;  %v650_v29 = vadd.f32 -13.280682, %v634_v43  ;;  %v599_v40 = vadd.f32 -155.69897, %v583_v42 }
  0x9c   :  { %v613_v54 = vmul.f32 %v597_v62, %v2484_v21  ;;  %v639_v59 = vmul.f32 %v623_v28, %v2460_v15  ;;  %v651_v38 = vadd.f32 -13.280682, %v635_v7  ;;  %v627_v60 = vadd.f32 66.801315, %v611_v49 }
  0x9d   :  { %v640_v32 = vmul.f32 %v624_v34, %v2464_v16  ;;  %v652_v2 = vadd.f32 -13.280682, %v636_v61  ;;  %v664_v48 = vmul.f32 %v648_v35, %v2432_v8  ;;  %v628_v47 = vadd.f32 66.801315, %v612_v37 }
  0x9e   :  { %v641_v52 = vmul.f32 %v625_v50, %v2468_v17  ;;  %v653_v4 = vadd.f32 -13.280682, %v637_v0  ;;  %v665_v23 = vmul.f32 %v649_v3, %v2436_v9  ;;  %v614_v6 = vmul.f32 %v598_v36, %v2488_v22 }
  0x9f   :  { %v642_v55 = vmul.f32 %v626_v33, %v2472_v18  ;;  %v654_v43 = vadd.f32 -13.280682, %v638_v27  ;;  %v666_v42 = vmul.f32 %v650_v29, %v2440_v10  ;;  %v615_v62 = vmul.f32 %v599_v40, %v2494_v25 }
  0xa0   :  { %v629_v28 = vadd.f32 66.801315, %v613_v54  ;;  %v655_v7 = vadd.f32 -13.280682, %v639_v59  ;;  %v667_v49 = vmul.f32 %v651_v38, %v2444_v12  ;;  %v643_v8 = vmul.f32 %v627_v60, %v2476_v19 }
  0xa1   :  { %v656_v34 = vadd.f32 -13.280682, %v640_v32  ;;  %v668_v61 = vmul.f32 %v652_v2, %v2448_v13  ;;  %v680_v35 = vadd.f32 1.0, %v664_v48  ;;  %v644_v9 = vmul.f32 %v628_v47, %v2480_v20 }
  0xa2   :  { %v657_v37 = vadd.f32 -13.280682, %v641_v52  ;;  %v669_v50 = vmul.f32 %v653_v4, %v2452_v14  ;;  %v681_v0 = vadd.f32 1.0, %v665_v23  ;;  %v630_v3 = vadd.f32 66.801315, %v614_v6 }
  0xa3   :  { %v658_v10 = vadd.f32 -13.280682, %v642_v55  ;;  %v670_v36 = vmul.f32 %v654_v43, %v2456_v11  ;;  %v682_v33 = vadd.f32 1.0, %v666_v42  ;;  %v631_v27 = vadd.f32 66.801315, %v615_v62 }
  0xa4   :  { %v645_v12 = vmul.f32 %v629_v28, %v2484_v21  ;;  %v671_v29 = vmul.f32 %v655_v7, %v2460_v15  ;;  %v683_v40 = vadd.f32 1.0, %v667_v49  ;;  %v659_v54 = vadd.f32 -13.280682, %v643_v8  ;;  %v4253_v8 = vld [vmem:[#allocation28_spill] sm:$0xff] }
  0xa5   :  { %v672_v13 = vmul.f32 %v656_v34, %v2464_v16  ;;  %v684_v59 = vadd.f32 1.0, %v668_v61  ;;  %2061 = vrcp.f32 %v680_v35  ;;  %v660_v38 = vadd.f32 -13.280682, %v644_v9 }
  0xa6   :  { %v673_v14 = vmul.f32 %v657_v37, %v2468_v17  ;;  %v685_v60 = vadd.f32 1.0, %v669_v50  ;;  %2063 = vrcp.f32 %v681_v0  ;;  %v646_v32 = vmul.f32 %v630_v3, %v2488_v22  ;;  %v4257_v37 = vld [vmem:[#allocation40_spill] sm:$0xff]  ;;  %v4258_v3 = vld [vmem:[#allocation30_spill] sm:$0xff] }
  0xa7   :  { %v674_v11 = vmul.f32 %v658_v10, %v2472_v18  ;;  %v686_v2 = vadd.f32 1.0, %v670_v36  ;;  %2065 = vrcp.f32 %v682_v33  ;;  %v527_v48 = vadd.f32 2.5066283, %v2600_v45  ;;  %v4259_v36 = vld [vmem:[#allocation41_spill] sm:$0xff] }
  0xa8   :  { %v647_v15 = vmul.f32 %v631_v27, %v2494_v25  ;;  %v687_v47 = vadd.f32 1.0, %v671_v29  ;;  %2067 = vrcp.f32 %v683_v40  ;;  %v528_v16 = vadd.f32 2.5066283, %v2603_v44  ;;  %v4260_v27 = vld [vmem:[#allocation24_spill] sm:$0xff]  ;;  %v4261_v40 = vld [vmem:[#allocation31_spill] sm:$0xff] }
  0xa9   :  { %v675_v52 = vmul.f32 %v659_v54, %v2476_v19  ;;  %v688_v4 = vadd.f32 1.0, %v672_v13  ;;  %2069 = vrcp.f32 %v684_v59  ;;  %v661_v17 = vadd.f32 -13.280682, %v645_v12  ;;  %v4262_v13 = vld [vmem:[#allocation42_spill] sm:$0xff] }
  0xaa   :  { %v676_v23 = vmul.f32 %v660_v38, %v2480_v20  ;;  %v689_v6 = vadd.f32 1.0, %v673_v14  ;;  %2071 = vrcp.f32 %v685_v60  ;;  %v529_v18 = vadd.f32 2.5066283, %v2606_v41  ;;  %v4263_v38 = vld [vmem:[#allocation25_spill] sm:$0xff]  ;;  %v4264_v60 = vld [vmem:[#allocation32_spill] sm:$0xff] }
  0xab   :  { %v662_v55 = vadd.f32 -13.280682, %v646_v32  ;;  %v690_v43 = vadd.f32 1.0, %v674_v11  ;;  %2073 = vrcp.f32 %v686_v2  ;;  %v530_v45 = vadd.f32 2.5066283, %v2610_v53  ;;  %v4265_v11 = vld [vmem:[#allocation43_spill] sm:$0xff] }
  0xac   :  { %v663_v42 = vadd.f32 -13.280682, %v647_v15  ;;  %v2726_v44 = vmul.f32 %v2386_v56, %v2632_v39  ;;  %2075 = vrcp.f32 %v687_v47  ;;  %v531_v19 = vadd.f32 2.5066283, %v2613_v46 }
  0xad   :  { %v2730_v62 = vadd.f32 2.5066283, %v2617_v24  ;;  %v691_v20 = vadd.f32 1.0, %v675_v52  ;;  %2077 = vrcp.f32 %v688_v4  ;;  %v677_v41 = vmul.f32 %v661_v17, %v2484_v21  ;;  %v4267_v52 = vld [vmem:[#allocation33_spill] sm:$0xff]  ;;  %v4268_v4 = vld [vmem:[#allocation44_spill] sm:$0xff] }
  0xae   :  { %v692_v28 = vadd.f32 1.0, %v676_v23  ;;  %v2735_v7 = vmul.f32 %v2389_v57, %v2635_v30  ;;  %2079 = vrcp.f32 %v689_v6  ;;  %v533_v56 = vadd.f32 2.5066283, %v2620_v26  ;;  %v4251_v26 = vld [vmem:[#allocation27_spill] sm:$0xff] }
  0xaf   :  { %v2737_v53 = vpop.eup %2061  ;;  %v534_v39 = vadd.f32 2.5066283, %v2624_v31  ;;  %v678_v46 = vmul.f32 %v662_v55, %v2488_v22  ;;  %2081 = vrcp.f32 %v690_v43  ;;  %v535_v49 = vadd.f32 2.5066283, %v2630_v5  ;;  %v4252_v22 = vld [vmem:[#allocation50_spill] sm:$0xff]  ;;  %v4254_v5 = vld [vmem:[#allocation39_spill] sm:$0xff] }
  0xb0   :  { %v2742_v24 = vpop.eup %2063  ;;  %v679_v21 = vmul.f32 %v663_v42, %v2494_v25  ;;  %v2748_v57 = vmul.f32 %v2392_v58, %v2639_v63  ;;  %2083 = vlog2.f32 %v2374_v51  ;;  %v2755_v31 = vmul.f32 %v4251_v26, %v2646_v1  ;;  %v4255_v58 = vld [vmem:[#allocation51_spill] sm:$0xff]  ;;  %v4256_v63 = vld [vmem:[#allocation29_spill] sm:$0xff] }
  0xb1   :  { %v2751_v30 = vpop.eup %2065  ;;  %v2759_v34 = vmul.f32 %v4253_v8, %v4252_v22  ;;  %2085 = vrcp.f32 %v691_v20  ;;  %v745_v61 = vmul.f32 0.6931472, %v4254_v5  ;;  %v693_v35 = vadd.f32 1.0, %v677_v41  ;;  %v4270_v43 = vld [vmem:[#allocation45_spill] sm:$0xff]  ;;  %v4273_v8 = vld [vmem:[#allocation48_spill] sm:$0xff] }
  0xb2   :  { %v2762_v25 = vpop.eup %2067  ;;  %v2766_v9 = vmul.f32 %v4256_v63, %v4255_v58  ;;  %2087 = vrcp.f32 %v692_v28  ;;  %v747_v50 = vmul.f32 0.6931472, %v4257_v37  ;;  %v694_v1 = vadd.f32 1.0, %v678_v46  ;;  %v4272_v46 = vld [vmem:[#allocation47_spill] sm:$0xff] }
  0xb3   :  { %v2769_v0 = vpop.eup %2069  ;;  %v2772_v10 = vmul.f32 %v4258_v3, %v527_v48  ;;  %v749_v33 = vmul.f32 0.6931472, %v4259_v36  ;;  %2089 = vlog2.f32 %v4260_v27  ;;  %v695_v29 = vadd.f32 1.0, %v679_v21  ;;  %v4266_v48 = vld [vmem:[#allocation26_spill] sm:$0xff]  ;;  %v4275_v63 = vld [vmem:[#allocation35_spill] sm:$0xff] }
  0xb4   :  { %v2776_v12 = vpop.eup %2071  ;;  %v2779_v54 = vmul.f32 %v4261_v40, %v528_v16  ;;  %v751_v59 = vmul.f32 0.6931472, %v4262_v13  ;;  %2091 = vlog2.f32 %v4263_v38  ;;  %v2786_v32 = vmul.f32 %v4264_v60, %v529_v18  ;;  %v4269_v18 = vld [vmem:[#allocation34_spill] sm:$0xff]  ;;  %v4278_v40 = vld [vmem:[#allocation37_spill] sm:$0xff] }
  0xb5   :  { %v2783_v14 = vpop.eup %2073  ;;  %v753_v2 = vmul.f32 0.6931472, %v4265_v11  ;;  %2093 = vlog2.f32 %v4266_v48  ;;  %v2790_v15 = vmul.f32 -2.0, %v745_v61  ;;  %v2795_v16 = vmul.f32 %v4267_v52, %v530_v45  ;;  %v4271_v45 = vld [vmem:[#allocation46_spill] sm:$0xff] }
  0xb6   :  { %v2792_v47 = vpop.eup %2075  ;;  %2095 = vrcp.f32 %v693_v35  ;;  %v755_v17 = vmul.f32 0.6931472, %v4268_v4  ;;  %v2798_v23 = vmul.f32 -2.0, %v747_v50  ;;  %v2803_v55 = vmul.f32 %v4269_v18, %v531_v19  ;;  %v4274_v19 = vld [vmem:[#allocation49_spill] sm:$0xff]  ;;  %v4279_v60 = vld [vmem:[#allocation38_spill] sm:$0xff] }
  0xb7   :  { %v2800_v6 = vpop.eup %2077  ;;  %2097 = vrcp.f32 %v694_v1  ;;  %v757_v42 = vmul.f32 0.6931472, %v4270_v43  ;;  %v2806_v20 = vmul.f32 -2.0, %v749_v33  ;;  %v759_v28 = vmul.f32 0.6931472, %v4271_v45  ;;  %v4276_v50 = vld [vmem:[#allocation53_spill] sm:$0xff] }
  0xb8   :  { %v2808_v41 = vpop.eup %2079  ;;  %2099 = vrcp.f32 %v695_v29  ;;  %v761_v21 = vmul.f32 0.6931472, %v4272_v46  ;;  %v2812_v26 = vmul.f32 -2.0, %v751_v59  ;;  %v763_v5 = vmul.f32 0.6931472, %v4273_v8  ;;  %v4277_v33 = vld [vmem:[#allocation36_spill] sm:$0xff] }
  0xb9   :  { %v2814_v22 = vpop.eup %2081  ;;  %v765_v61 = vmul.f32 0.6931472, %v4274_v19  ;;  %v2818_v35 = vmul.f32 -2.0, %v753_v2  ;;  %2101 = vrsqrt.f32 %v2790_v15  ;;  %v2823_v37 = vmul.f32 %v4275_v63, %v2730_v62  ;;  %v4300_v8 = vld [vmem:[#allocation18_spill] sm:$0xff] }
  0xba   :  { %v2084_v58 = vpop.eup %2083  ;;  %v767_v1 = vmul.f32 0.6931472, %v4276_v50  ;;  %v2826_v3 = vmul.f32 -2.0, %v755_v17  ;;  %2103 = vrsqrt.f32 %v2798_v23  ;;  %v2832_v29 = vmul.f32 %v4277_v33, %v533_v56 }
  0xbb   :  { %v2829_v36 = vpop.eup %2085  ;;  %v2835_v13 = vmul.f32 %v4278_v40, %v534_v39  ;;  %v2837_v59 = vmul.f32 -2.0, %v757_v42  ;;  %2105 = vrsqrt.f32 %v2806_v20  ;;  %v2843_v11 = vmul.f32 %v4279_v60, %v535_v49  ;;  %v4298_v60 = vld [vmem:[#allocation16_spill] sm:$0xff] }
  0xbc   :  { %v2840_v62 = vpop.eup %2087  ;;  %v2845_v2 = vmul.f32 -2.0, %v759_v28  ;;  %v2847_v52 = vmul.f32 -2.0, %v761_v21  ;;  %2107 = vrsqrt.f32 %v2812_v26  ;;  %v769_v4 = vmul.f32 0.6931472, %v2084_v58  ;;  %v4280_v28 = vld [vmem:[#allocation52_spill] sm:$0xff] }
  0xbd   :  { %v2090_v56 = vpop.eup %2089  ;;  %v2850_v17 = vmul.f32 -2.0, %v763_v5  ;;  %v2852_v39 = vmul.f32 -2.0, %v765_v61  ;;  %2109 = vrsqrt.f32 %v2818_v35  ;;  %v2855_v43 = vmul.f32 -2.0, %v767_v1  ;;  %v4302_v42 = vld [vmem:[#allocation20_spill] sm:$0xff] }
  0xbe   :  { %v2092_v18 = vpop.eup %2091  ;;  %2111 = vrsqrt.f32 %v2826_v3  ;;  %v2862_v46 = vmul.f32 %v2737_v53, %v4280_v28  ;;  %v2866_v21 = vmul.f32 %v2742_v24, %v2726_v44  ;;  %v2874_v19 = vmul.f32 %v2751_v30, %v2735_v7 }
  0xbf   :  { %v2094_v45 = vpop.eup %2093  ;;  %2113 = vrsqrt.f32 %v2837_v59  ;;  %v771_v61 = vmul.f32 0.6931472, %v2090_v56  ;;  %vm794_vm0 = vcmp.eq.f32.partialorder %v2790_v15, inf  ;;  %v773_v44 = vmul.f32 0.6931472, %v2092_v18 }
  0xc0   :  { %4281 = vst [vmem:[#allocation27_spill] sm:$0xff] %v2862_v46  ;;  %4282 = vst [vmem:[#allocation50_spill] sm:$0xff] %v2866_v21  ;;  %v2870_v5 = vpop.eup %2095  ;;  %2115 = vrsqrt.f32 %v2845_v2  ;;  %v2881_v24 = vmul.f32 -2.0, %v769_v4  ;;  %vm801_vm1 = vcmp.eq.f32.partialorder %v2798_v23, inf  ;;  %v2890_v30 = vmul.f32 %v2762_v25, %v2748_v57 }
  0xc1   :  { %4283 = vst [vmem:[#allocation28_spill] sm:$0xff] %v2874_v19  ;;  %v2879_v58 = vpop.eup %2097  ;;  %2117 = vrsqrt.f32 %v2847_v52  ;;  %v2894_v50 = vmul.f32 %v2769_v0, %v2755_v31  ;;  %v775_v1 = vmul.f32 0.6931472, %v2094_v45  ;;  %v2899_v40 = vmul.f32 %v2776_v12, %v2759_v34 }
  0xc2   :  { %v2886_v7 = vpop.eup %2099  ;;  %4284 = vst [vmem:[#allocation39_spill] sm:$0xff] %v2890_v30  ;;  %2119 = vrsqrt.f32 %v2850_v17  ;;  %vm796_vm2 = vcmp.eq.f32.partialorder %v2790_v15, 0.0  ;;  %vm808_vm3 = vcmp.eq.f32.partialorder %v2806_v20, inf  ;;  %v2908_v25 = vmul.f32 %v2783_v14, %v2766_v9 }
  0xc3   :  { %4285 = vst [vmem:[#allocation51_spill] sm:$0xff] %v2894_v50  ;;  %v2102_v33 = vpop.eup %2101  ;;  %4286 = vst [vmem:[#allocation29_spill] sm:$0xff] %v2899_v40  ;;  %2121 = vrsqrt.f32 %v2852_v39  ;;  %v2912_v0 = vmul.f32 %v2792_v47, %v2772_v10  ;;  %v2914_v34 = vmul.f32 -2.0, %v771_v61  ;;  %vm803_vm4 = vcmp.eq.f32.partialorder %v2798_v23, 0.0  ;;  %v4297_v61 = vld [vmem:[#allocation15_spill] sm:$0xff] }
  0xc4   :  { %v2104_v31 = vpop.eup %2103  ;;  %4287 = vst [vmem:[#allocation40_spill] sm:$0xff] %v2908_v25  ;;  %vm815_vm5 = vcmp.eq.f32.partialorder %v2812_v26, inf  ;;  %2123 = vrsqrt.f32 %v2855_v43  ;;  %v2921_v56 = vmul.f32 %v2800_v6, %v2779_v54  ;;  %v2923_v4 = vmul.f32 -2.0, %v773_v44 }
  0xc5   :  { %4288 = vst [vmem:[#allocation30_spill] sm:$0xff] %v2912_v0  ;;  %v2106_v12 = vpop.eup %2105  ;;  %vm822_vm6 = vcmp.eq.f32.partialorder %v2818_v35, inf  ;;  %vm829_vm7 = vcmp.eq.f32.partialorder %v2826_v3, inf  ;;  %2125 = vrsqrt.f32 %v2881_v24  ;;  %v2931_v14 = vmul.f32 %v2808_v41, %v2786_v32 }
  0xc6   :  { %4289 = vst [vmem:[#allocation41_spill] sm:$0xff] %v2921_v56  ;;  %v2108_v10 = vpop.eup %2107  ;;  %v2935_v47 = vmul.f32 %v2814_v22, %v2795_v16  ;;  %v2937_v54 = vmul.f32 -2.0, %v775_v1  ;;  %vm810_vm8 = vcmp.eq.f32.partialorder %v2806_v20, 0.0  ;;  %vm836_vm9 = vcmp.eq.f32.partialorder %v2837_v59, inf  ;;  %v4294_v1 = vld [vmem:[#allocation12_spill] sm:$0xff]  ;;  %v4296_v16 = vld [vmem:[#allocation14_spill] sm:$0xff] }
  0xc7   :  { %4290 = vst [vmem:[#allocation31_spill] sm:$0xff] %v2931_v14  ;;  %v2110_v18 = vpop.eup %2109  ;;  %v2944_v45 = vmul.f32 %v2829_v36, %v2803_v55  ;;  %v793_v32 = vmul.f32 %v2102_v33, %v2790_v15  ;;  %v800_v28 = vmul.f32 %v2104_v31, %v2798_v23  ;;  %vm824_vm12 = vcmp.eq.f32.partialorder %v2818_v35, 0.0  ;;  %v4293_v36 = vld [vmem:[#allocation11_spill] sm:$0xff]  ;;  %v4295_v31 = vld [vmem:[#allocation13_spill] sm:$0xff] }
  0xc8   :  { %4291 = vst [vmem:[#allocation42_spill] sm:$0xff] %v2935_v47  ;;  %v2112_v22 = vpop.eup %2111  ;;  %2127 = vrsqrt.f32 %v2914_v34  ;;  %vm838_vm15 = vcmp.eq.f32.partialorder %v2837_v59, 0.0  ;;  %vm857_vm11 = vcmp.eq.f32.partialorder %v2850_v17, inf  ;;  %v807_v9 = vmul.f32 %v2106_v12, %v2806_v20  ;;  %v4299_v12 = vld [vmem:[#allocation17_spill] sm:$0xff] }
  0xc9   :  { %4292 = vst [vmem:[#allocation32_spill] sm:$0xff] %v2944_v45  ;;  %v2114_v44 = vpop.eup %2113  ;;  %2129 = vrsqrt.f32 %v2923_v4  ;;  %v795_v41 = vsel %vm794_vm0, %v2790_v15, %v793_v32  ;;  %v814_v6 = vmul.f32 %v2108_v10, %v2812_v26  ;;  %v802_v57 = vsel %vm801_vm1, %v2798_v23, %v800_v28  ;;  %v4301_v10 = vld [vmem:[#allocation19_spill] sm:$0xff]  ;;  %v4303_v28 = vld [vmem:[#allocation21_spill] sm:$0xff] }
  0xca   :  { %v2116_v55 = vpop.eup %2115  ;;  %2131 = vrsqrt.f32 %v2937_v54  ;;  %v821_v63 = vmul.f32 %v2110_v18, %v2818_v35  ;;  %v828_v45 = vmul.f32 %v2112_v22, %v2826_v3  ;;  %vm859_vm13 = vcmp.eq.f32.partialorder %v2850_v17, 0.0 }
  0xcb   :  { %v2118_v53 = vpop.eup %2117  ;;  %vm866_vm0 = vcmp.eq.f32.partialorder %v2852_v39, 0.0  ;;  %v835_v33 = vmul.f32 %v2114_v44, %v2837_v59  ;;  %vm873_vm10 = vcmp.eq.f32.partialorder %v2855_v43, 0.0  ;;  %vm878_vm14 = vcmp.eq.f32.partialorder %v2881_v24, inf }
  0xcc   :  { %v2120_v49 = vpop.eup %2119  ;;  %v4304_v22 = vand.u32 2147483648, %v2790_v15  ;;  %v809_v32 = vsel %vm808_vm3, %v2806_v20, %v807_v9  ;;  %v842_v44 = vmul.f32 %v2116_v55, %v2845_v2  ;;  %vm880_vm1 = vcmp.eq.f32.partialorder %v2881_v24, 0.0 }
  0xcd   :  { %v2122_v47 = vpop.eup %2121  ;;  %v881_v25 = vand.u32 2147483648, %v2881_v24  ;;  %v4305_v56 = vand.u32 2147483648, %v2798_v23  ;;  %v816_v15 = vsel %vm815_vm5, %v2812_v26, %v814_v6  ;;  %v823_v9 = vsel %vm822_vm6, %v2818_v35, %v821_v63 }
  0xce   :  { %v2124_v18 = vpop.eup %2123  ;;  %v2995_v0 = vsel %vm796_vm2, %v4304_v22, %v795_v41  ;;  %v849_v41 = vmul.f32 %v2118_v53, %v2847_v52  ;;  %vm885_vm2 = vcmp.eq.f32.partialorder %v2914_v34, inf  ;;  %v830_v55 = vsel %vm829_vm7, %v2826_v3, %v828_v45 }
  0xcf   :  { %v2126_v14 = vpop.eup %2125  ;;  %v3007_v40 = vsel %vm803_vm4, %v4305_v56, %v802_v57  ;;  %v856_v23 = vmul.f32 %v2120_v49, %v2850_v17  ;;  %v863_v57 = vmul.f32 %v2122_v47, %v2852_v39  ;;  %v4306_v56 = vand.u32 2147483648, %v2806_v20 }
  0xd0   :  { %v837_v53 = vsel %vm836_vm9, %v2837_v59, %v835_v33  ;;  %v870_v63 = vmul.f32 %v2124_v18, %v2855_v43  ;;  %vm887_vm3 = vcmp.eq.f32.partialorder %v2914_v34, 0.0  ;;  %v4307_v45 = vand.u32 2147483648, %v2812_v26 }
  0xd1   :  { %v3026_v6 = vsel %vm810_vm8, %v4306_v56, %v809_v32  ;;  %vm4308_vm4 = vcmp.eq.f32.partialorder %v2812_v26, 0.0  ;;  %vm4309_vm5 = vcmp.eq.f32.partialorder %v2845_v2, inf  ;;  %v877_v47 = vmul.f32 %v2126_v14, %v2881_v24 }
  0xd2   :  { %v2128_v22 = vpop.eup %2127  ;;  %v3037_v49 = vsel %vm4308_vm4, %v4307_v45, %v816_v15  ;;  %v844_v20 = vsel %vm4309_vm5, %v2845_v2, %v842_v44  ;;  %v888_v32 = vand.u32 2147483648, %v2914_v34  ;;  %v4310_v18 = vand.u32 2147483648, %v2818_v35 }
  0xd3   :  { %v2130_v33 = vpop.eup %2129  ;;  %v4311_v50 = vand.u32 2147483648, %v2826_v3  ;;  %vm4312_vm6 = vcmp.eq.f32.partialorder %v2826_v3, 0.0  ;;  %vm4313_vm7 = vcmp.eq.f32.partialorder %v2847_v52, inf  ;;  %vm892_vm8 = vcmp.eq.f32.partialorder %v2923_v4, inf }
  0xd4   :  { %v3048_v56 = vsel %vm824_vm12, %v4310_v18, %v823_v9  ;;  %v851_v44 = vsel %vm4313_vm7, %v2847_v52, %v849_v41  ;;  %v2132_v14 = vpop.eup %2131  ;;  %v4314_v15 = vand.u32 2147483648, %v2837_v59  ;;  %v858_v9 = vsel %vm857_vm11, %v2850_v17, %v856_v23 }
  0xd5   :  { %v3054_v26 = vsel %vm4312_vm6, %v4311_v50, %v830_v55  ;;  %vm4315_vm9 = vcmp.eq.f32.partialorder %v2852_v39, inf  ;;  %vm894_vm12 = vcmp.eq.f32.partialorder %v2923_v4, 0.0  ;;  %v4316_v50 = vand.u32 2147483648, %v2845_v2 }
  0xd6   :  { %v3064_v35 = vsel %vm838_vm15, %v4314_v15, %v837_v53  ;;  %v865_v3 = vsel %vm4315_vm9, %v2852_v39, %v863_v57  ;;  %vm4317_vm4 = vcmp.eq.f32.partialorder %v2845_v2, 0.0  ;;  %vm4318_vm15 = vcmp.eq.f32.partialorder %v2855_v43, inf }
  0xd7   :  { %v3077_v41 = vsel %vm4317_vm4, %v4316_v50, %v844_v20  ;;  %v872_v59 = vsel %vm4318_vm15, %v2855_v43, %v870_v63  ;;  %v884_v55 = vmul.f32 %v2128_v22, %v2914_v34  ;;  %v895_v23 = vand.u32 2147483648, %v2923_v4 }
  0xd8   :  { %v4319_v53 = vand.u32 2147483648, %v2847_v52  ;;  %vm4320_vm11 = vcmp.eq.f32.partialorder %v2847_v52, 0.0  ;;  %v879_v2 = vsel %vm878_vm14, %v2881_v24, %v877_v47  ;;  %v891_v45 = vmul.f32 %v2130_v33, %v2923_v4 }
  0xd9   :  { %vm899_vm5 = vcmp.eq.f32.partialorder %v2937_v54, inf  ;;  %v4321_v63 = vand.u32 2147483648, %v2850_v17  ;;  %v4322_v20 = vand.u32 2147483648, %v2852_v39  ;;  %v898_v18 = vmul.f32 %v2132_v14, %v2937_v54 }
  0xda   :  { %v3088_v57 = vsel %vm4320_vm11, %v4319_v53, %v851_v44  ;;  %vm901_vm14 = vcmp.eq.f32.partialorder %v2937_v54, 0.0  ;;  %v4323_v47 = vand.u32 2147483648, %v2855_v43  ;;  %v902_v17 = vand.u32 2147483648, %v2937_v54 }
  0xdb   :  { %v3099_v22 = vsel %vm859_vm13, %v4321_v63, %v858_v9  ;;  %v3105_v52 = vsel %vm866_vm0, %v4322_v20, %v865_v3  ;;  %v904_v44 = vmul.f32 -0.007784894, %v2995_v0  ;;  %v905_v15 = vmul.f32 -0.007784894, %v3007_v40 }
  0xdc   :  { %v3113_v33 = vsel %vm873_vm10, %v4323_v47, %v872_v59  ;;  %v3120_v39 = vsel %vm880_vm1, %v881_v25, %v879_v2  ;;  %v886_v14 = vsel %vm885_vm2, %v2914_v34, %v884_v55  ;;  %v906_v9 = vmul.f32 -0.007784894, %v3026_v6 }
  0xdd   :  { %v907_v43 = vmul.f32 -0.007784894, %v3037_v49  ;;  %v893_v3 = vsel %vm892_vm8, %v2923_v4, %v891_v45  ;;  %v908_v50 = vmul.f32 -0.007784894, %v3048_v56  ;;  %v909_v59 = vmul.f32 -0.007784894, %v3054_v26 }
  0xde   :  { %v910_v24 = vmul.f32 -0.007784894, %v3064_v35  ;;  %v900_v25 = vsel %vm899_vm5, %v2937_v54, %v898_v18  ;;  %v911_v55 = vmul.f32 -0.007784894, %v3077_v41  ;;  %v912_v53 = vmul.f32 -0.007784894, %v3088_v57 }
  0xdf   :  { %v913_v2 = vmul.f32 -0.007784894, %v3099_v22  ;;  %v3141_v63 = vsel %vm887_vm3, %v888_v32, %v886_v14  ;;  %v914_v45 = vmul.f32 -0.007784894, %v3105_v52  ;;  %v915_v20 = vmul.f32 -0.007784894, %v3113_v33 }
  0xe0   :  { %v916_v47 = vmul.f32 -0.007784894, %v3120_v39  ;;  %v3148_v30 = vsel %vm894_vm12, %v895_v23, %v893_v3  ;;  %v917_v18 = vmul.f32 -0.007784894, %v3141_v63  ;;  %v920_v19 = vadd.f32 -0.32239646, %v904_v44 }
  0xe1   :  { %v921_v21 = vadd.f32 -0.32239646, %v905_v15  ;;  %v3153_v46 = vsel %vm901_vm14, %v902_v17, %v900_v25  ;;  %v918_v34 = vmul.f32 -0.007784894, %v3148_v30  ;;  %v922_v32 = vadd.f32 -0.32239646, %v906_v9 }
  0xe2   :  { %v923_v14 = vadd.f32 -0.32239646, %v907_v43  ;;  %v3158_v48 = vmul.f32 %v2840_v62, %v2823_v37  ;;  %v919_v4 = vmul.f32 -0.007784894, %v3153_v46  ;;  %v924_v23 = vadd.f32 -0.32239646, %v908_v50 }
  0xe3   :  { %v925_v3 = vadd.f32 -0.32239646, %v909_v59  ;;  %v3163_v44 = vmul.f32 %v2870_v5, %v2832_v29  ;;  %v926_v15 = vadd.f32 -0.32239646, %v910_v24  ;;  %v927_v54 = vadd.f32 -0.32239646, %v911_v55 }
  0xe4   :  { %4324 = vst [vmem:[#allocation43_spill] sm:$0xff] %v3158_v48  ;;  %v928_v17 = vadd.f32 -0.32239646, %v912_v53  ;;  %v3167_v25 = vmul.f32 %v2879_v58, %v2835_v13  ;;  %v929_v9 = vadd.f32 -0.32239646, %v913_v2  ;;  %v936_v50 = vmul.f32 %v920_v19, %v2995_v0 }
  0xe5   :  { %4325 = vst [vmem:[#allocation33_spill] sm:$0xff] %v3163_v44  ;;  %v930_v43 = vadd.f32 -0.32239646, %v914_v45  ;;  %v931_v38 = vadd.f32 -0.32239646, %v915_v20  ;;  %v937_v27 = vmul.f32 %v921_v21, %v3007_v40  ;;  %v938_v29 = vmul.f32 %v922_v32, %v3026_v6 }
  0xe6   :  { %4326 = vst [vmem:[#allocation44_spill] sm:$0xff] %v3167_v25  ;;  %v932_v37 = vadd.f32 -0.32239646, %v916_v47  ;;  %v933_v62 = vadd.f32 -0.32239646, %v917_v18  ;;  %v939_v5 = vmul.f32 %v923_v14, %v3037_v49  ;;  %v940_v24 = vmul.f32 %v924_v23, %v3048_v56 }
  0xe7   :  { %v934_v48 = vadd.f32 -0.32239646, %v918_v34  ;;  %v935_v59 = vadd.f32 -0.32239646, %v919_v4  ;;  %v941_v13 = vmul.f32 %v925_v3, %v3054_v26  ;;  %v942_v58 = vmul.f32 %v926_v15, %v3064_v35 }
  0xe8   :  { %v943_v55 = vmul.f32 %v927_v54, %v3077_v41  ;;  %v944_v53 = vmul.f32 %v928_v17, %v3088_v57  ;;  %v945_v2 = vmul.f32 %v929_v9, %v3099_v22  ;;  %v946_v19 = vmul.f32 %v930_v43, %v3105_v52 }
  0xe9   :  { %v947_v21 = vmul.f32 %v931_v38, %v3113_v33  ;;  %v948_v45 = vmul.f32 %v932_v37, %v3120_v39  ;;  %v949_v20 = vmul.f32 %v933_v62, %v3141_v63  ;;  %v950_v47 = vmul.f32 %v934_v48, %v3148_v30 }
  0xea   :  { %v952_v18 = vadd.f32 -2.4007583, %v936_v50  ;;  %v951_v34 = vmul.f32 %v935_v59, %v3153_v46  ;;  %v953_v32 = vadd.f32 -2.4007583, %v937_v27  ;;  %v954_v14 = vadd.f32 -2.4007583, %v938_v29 }
  0xeb   :  { %v955_v4 = vadd.f32 -2.4007583, %v939_v5  ;;  %v3187_v23 = vmul.f32 %v2886_v7, %v2843_v11  ;;  %v956_v3 = vadd.f32 -2.4007583, %v940_v24  ;;  %v957_v15 = vadd.f32 -2.4007583, %v941_v13 }
  0xec   :  { %v958_v54 = vadd.f32 -2.4007583, %v942_v58  ;;  %v959_v38 = vadd.f32 -2.4007583, %v943_v55  ;;  %v960_v17 = vadd.f32 -2.4007583, %v944_v53  ;;  %v968_v27 = vmul.f32 %v952_v18, %v2995_v0 }
  0xed   :  { %4327 = vst [vmem:[#allocation34_spill] sm:$0xff] %v3187_v23  ;;  %v961_v9 = vadd.f32 -2.4007583, %v945_v2  ;;  %v4328_v43 = vsub.f32 1.0, %v4293_v36  ;;  %v962_v48 = vadd.f32 -2.4007583, %v946_v19  ;;  %v969_v11 = vmul.f32 %v953_v32, %v3007_v40 }
  0xee   :  { %v963_v37 = vadd.f32 -2.4007583, %v947_v21  ;;  %v964_v62 = vadd.f32 -2.4007583, %v948_v45  ;;  %v965_v50 = vadd.f32 -2.4007583, %v949_v20  ;;  %v970_v7 = vmul.f32 %v954_v14, %v3026_v6 }
  0xef   :  { %2133 = vlog2.f32 %v4328_v43  ;;  %v966_v59 = vadd.f32 -2.4007583, %v950_v47  ;;  %v967_v29 = vadd.f32 -2.4007583, %v951_v34  ;;  %v971_v5 = vmul.f32 %v955_v4, %v3037_v49 }
  0xf0   :  { %v972_v24 = vmul.f32 %v956_v3, %v3048_v56  ;;  %v973_v13 = vmul.f32 %v957_v15, %v3054_v26  ;;  %v974_v58 = vmul.f32 %v958_v54, %v3064_v35  ;;  %v975_v55 = vmul.f32 %v959_v38, %v3077_v41 }
  0xf1   :  { %v976_v53 = vmul.f32 %v960_v17, %v3088_v57  ;;  %v977_v2 = vmul.f32 %v961_v9, %v3099_v22  ;;  %v978_v19 = vmul.f32 %v962_v48, %v3105_v52  ;;  %v979_v21 = vmul.f32 %v963_v37, %v3113_v33 }
  0xf2   :  { %v980_v45 = vmul.f32 %v964_v62, %v3120_v39  ;;  %v984_v20 = vadd.f32 -2.5497324, %v968_v27  ;;  %v981_v47 = vmul.f32 %v965_v50, %v3141_v63  ;;  %v982_v18 = vmul.f32 %v966_v59, %v3148_v30 }
  0xf3   :  { %v983_v34 = vmul.f32 %v967_v29, %v3153_v46  ;;  %v985_v32 = vadd.f32 -2.5497324, %v969_v11  ;;  %v986_v14 = vadd.f32 -2.5497324, %v970_v7  ;;  %v987_v4 = vadd.f32 -2.5497324, %v971_v5 }
  0xf4   :  { %v988_v3 = vadd.f32 -2.5497324, %v972_v24  ;;  %v4329_v15 = vsub.f32 1.0, %v4294_v1  ;;  %v989_v54 = vadd.f32 -2.5497324, %v973_v13  ;;  %v4330_v9 = vsub.f32 1.0, %v4295_v31 }
  0xf5   :  { %v990_v38 = vadd.f32 -2.5497324, %v974_v58  ;;  %v991_v17 = vadd.f32 -2.5497324, %v975_v55  ;;  %v992_v43 = vadd.f32 -2.5497324, %v976_v53  ;;  %v1000_v62 = vmul.f32 %v984_v20, %v2995_v0 }
  0xf6   :  { %2135 = vlog2.f32 %v4329_v15  ;;  %v993_v48 = vadd.f32 -2.5497324, %v977_v2  ;;  %v994_v37 = vadd.f32 -2.5497324, %v978_v19  ;;  %v995_v50 = vadd.f32 -2.5497324, %v979_v21 }
  0xf7   :  { %2137 = vlog2.f32 %v4330_v9  ;;  %v996_v59 = vadd.f32 -2.5497324, %v980_v45  ;;  %v997_v29 = vadd.f32 -2.5497324, %v981_v47  ;;  %v1001_v11 = vmul.f32 %v985_v32, %v3007_v40 }
  0xf8   :  { %v998_v7 = vadd.f32 -2.5497324, %v982_v18  ;;  %v999_v5 = vadd.f32 -2.5497324, %v983_v34  ;;  %v1002_v24 = vmul.f32 %v986_v14, %v3026_v6  ;;  %v1003_v13 = vmul.f32 %v987_v4, %v3037_v49 }
  0xf9   :  { %v3212_v27 = vpop.eup %2133  ;;  %v1004_v58 = vmul.f32 %v988_v3, %v3048_v56  ;;  %v1005_v55 = vmul.f32 %v989_v54, %v3054_v26  ;;  %v1006_v53 = vmul.f32 %v990_v38, %v3064_v35  ;;  %v1007_v2 = vmul.f32 %v991_v17, %v3077_v41 }
  0xfa   :  { %v1008_v19 = vmul.f32 %v992_v43, %v3088_v57  ;;  %v1009_v21 = vmul.f32 %v993_v48, %v3099_v22  ;;  %v1010_v45 = vmul.f32 %v994_v37, %v3105_v52  ;;  %v1016_v20 = vadd.f32 4.3746643, %v1000_v62 }
  0xfb   :  { %v1011_v47 = vmul.f32 %v995_v50, %v3113_v33  ;;  %v1012_v18 = vmul.f32 %v996_v59, %v3120_v39  ;;  %v1013_v34 = vmul.f32 %v997_v29, %v3141_v63  ;;  %v1017_v32 = vadd.f32 4.3746643, %v1001_v11 }
  0xfc   :  { %v1014_v14 = vmul.f32 %v998_v7, %v3148_v30  ;;  %v1015_v4 = vmul.f32 %v999_v5, %v3153_v46  ;;  %v1018_v3 = vadd.f32 4.3746643, %v1002_v24  ;;  %v1019_v15 = vadd.f32 4.3746643, %v1003_v13 }
  0xfd   :  { %v1020_v54 = vadd.f32 4.3746643, %v1004_v58  ;;  %v1021_v38 = vadd.f32 4.3746643, %v1005_v55  ;;  %v1022_v17 = vadd.f32 4.3746643, %v1006_v53  ;;  %v1032_v50 = vmul.f32 %v1016_v20, %v2995_v0 }
  0xfe   :  { %v4331_v9 = vsub.f32 1.0, %v4296_v16  ;;  %v1023_v48 = vadd.f32 4.3746643, %v1007_v2  ;;  %v1024_v37 = vadd.f32 4.3746643, %v1008_v19  ;;  %v1033_v5 = vmul.f32 %v1017_v32, %v3007_v40 }
  0xff   :  { %v1025_v62 = vadd.f32 4.3746643, %v1009_v21  ;;  %v1026_v29 = vadd.f32 4.3746643, %v1010_v45  ;;  %v1027_v11 = vadd.f32 4.3746643, %v1011_v47  ;;  %v1034_v58 = vmul.f32 %v1018_v3, %v3026_v6 }
 0x100   :  { %2139 = vlog2.f32 %v4331_v9  ;;  %v3231_v43 = vpop.eup %2135  ;;  %v1028_v7 = vadd.f32 4.3746643, %v1012_v18  ;;  %v1029_v24 = vadd.f32 4.3746643, %v1013_v34  ;;  %v1030_v13 = vadd.f32 4.3746643, %v1014_v14 }
 0x101   :  { %v3234_v59 = vpop.eup %2137  ;;  %v1064_v55 = vmul.f32 0.007784696, %v2995_v0  ;;  %v1031_v53 = vadd.f32 4.3746643, %v1015_v4  ;;  %v1035_v2 = vmul.f32 %v1019_v15, %v3037_v49  ;;  %v1036_v19 = vmul.f32 %v1020_v54, %v3048_v56 }
 0x102   :  { %v1065_v21 = vmul.f32 0.007784696, %v3007_v40  ;;  %v1037_v20 = vmul.f32 %v1021_v38, %v3054_v26  ;;  %v1038_v45 = vmul.f32 %v1022_v17, %v3064_v35  ;;  %v1039_v47 = vmul.f32 %v1023_v48, %v3077_v41 }
 0x103   :  { %v1066_v18 = vmul.f32 0.007784696, %v3026_v6  ;;  %v1040_v34 = vmul.f32 %v1024_v37, %v3088_v57  ;;  %v1041_v32 = vmul.f32 %v1025_v62, %v3099_v22  ;;  %v1042_v14 = vmul.f32 %v1026_v29, %v3105_v52 }
 0x104   :  { %v1067_v4 = vmul.f32 0.007784696, %v3037_v49  ;;  %v1043_v3 = vmul.f32 %v1027_v11, %v3113_v33  ;;  %v1044_v15 = vmul.f32 %v1028_v7, %v3120_v39  ;;  %v1068_v54 = vmul.f32 0.007784696, %v3048_v56 }
 0x105   :  { %v1080_v38 = vadd.f32 0.32246712, %v1064_v55  ;;  %v3254_v17 = vmul.f32 %v1029_v24, %v3141_v63  ;;  %v3256_v9 = vadd.f32 2.938164, %v1032_v50  ;;  %v1069_v48 = vmul.f32 0.007784696, %v3054_v26 }
 0x106   :  { %v1081_v37 = vadd.f32 0.32246712, %v1065_v21  ;;  %v3260_v62 = vmul.f32 %v1030_v13, %v3148_v30  ;;  %v3262_v29 = vadd.f32 2.938164, %v1033_v5  ;;  %v1070_v11 = vmul.f32 0.007784696, %v3064_v35 }
 0x107   :  { %v1082_v23 = vadd.f32 0.32246712, %v1066_v18  ;;  %v3268_v55 = vmul.f32 %v1031_v53, %v3153_v46  ;;  %v3270_v24 = vadd.f32 2.938164, %v1034_v58  ;;  %v1071_v50 = vmul.f32 0.007784696, %v3077_v41 }
 0x108   :  { %v1083_v25 = vadd.f32 0.32246712, %v1067_v4  ;;  %v3273_v44 = vadd.f32 2.938164, %v1035_v2  ;;  %v1072_v13 = vmul.f32 0.007784696, %v3088_v57  ;;  %v1096_v5 = vmul.f32 %v1080_v38, %v2995_v0 }
 0x109   :  { %v1084_v21 = vadd.f32 0.32246712, %v1068_v54  ;;  %v1073_v16 = vmul.f32 0.007784696, %v3099_v22  ;;  %v1085_v18 = vadd.f32 0.32246712, %v1069_v48  ;;  %v1097_v31 = vmul.f32 %v1081_v37, %v3007_v40 }
 0x10a   :  { %v3265_v7 = vpop.eup %2139  ;;  %4332 = vst [vmem:[#allocation45_spill] sm:$0xff] %v3273_v44  ;;  %v4333_v53 = vsub.f32 1.0, %v4297_v61  ;;  %v3281_v58 = vadd.f32 2.938164, %v1036_v19  ;;  %v3283_v1 = vadd.f32 2.938164, %v1037_v20  ;;  %v1098_v2 = vmul.f32 %v1082_v23, %v3026_v6 }
 0x10b   :  { %v1086_v4 = vadd.f32 0.32246712, %v1070_v11  ;;  %v3286_v36 = vadd.f32 2.938164, %v1038_v45  ;;  %v1087_v54 = vadd.f32 0.32246712, %v1071_v50  ;;  %v1099_v38 = vmul.f32 %v1083_v25, %v3037_v49 }
 0x10c   :  { %2141 = vlog2.f32 %v4333_v53  ;;  %v4334_v44 = vsub.f32 1.0, %v4298_v60  ;;  %v3291_v48 = vadd.f32 2.938164, %v1039_v47  ;;  %v1088_v37 = vadd.f32 0.32246712, %v1072_v13 }
 0x10d   :  { %v1100_v53 = vmul.f32 %v1084_v21, %v3048_v56  ;;  %v1112_v19 = vadd.f32 2.4451342, %v1096_v5  ;;  %v3294_v61 = vadd.f32 2.938164, %v1040_v34  ;;  %v1089_v20 = vadd.f32 0.32246712, %v1073_v16 }
 0x10e   :  { %2143 = vlog2.f32 %v4334_v44  ;;  %4335 = vst [vmem:[#allocation46_spill] sm:$0xff] %v3291_v48  ;;  %v1101_v11 = vmul.f32 %v1085_v18, %v3054_v26  ;;  %v1113_v23 = vadd.f32 2.4451342, %v1097_v31  ;;  %v3297_v45 = vadd.f32 2.938164, %v1041_v32 }
 0x10f   :  { %4336 = vst [vmem:[#allocation47_spill] sm:$0xff] %v3294_v61  ;;  %v1102_v50 = vmul.f32 %v1086_v4, %v3064_v35  ;;  %v1114_v25 = vadd.f32 2.4451342, %v1098_v2  ;;  %v4338_v60 = vsub.f32 1.0, %v4299_v12  ;;  %v3302_v44 = vadd.f32 2.938164, %v1042_v14 }
 0x110   :  { %4337 = vst [vmem:[#allocation48_spill] sm:$0xff] %v3297_v45  ;;  %v3304_v47 = vadd.f32 2.938164, %v1043_v3  ;;  %v1103_v13 = vmul.f32 %v1087_v54, %v3077_v41  ;;  %v1115_v34 = vadd.f32 2.4451342, %v1099_v38  ;;  %v1104_v16 = vmul.f32 %v1088_v37, %v3088_v57 }
 0x111   :  { %2145 = vlog2.f32 %v4338_v60  ;;  %4339 = vst [vmem:[#allocation49_spill] sm:$0xff] %v3302_v44  ;;  %v1116_v21 = vadd.f32 2.4451342, %v1100_v53  ;;  %v1128_v31 = vmul.f32 %v1112_v19, %v2995_v0  ;;  %v4341_v32 = vsub.f32 1.0, %v4300_v8 }
 0x112   :  { %4340 = vst [vmem:[#allocation35_spill] sm:$0xff] %v3304_v47  ;;  %v1105_v5 = vmul.f32 %v1089_v20, %v3099_v22  ;;  %v1117_v18 = vadd.f32 2.4451342, %v1101_v11  ;;  %v1129_v60 = vmul.f32 %v1113_v23, %v3007_v40  ;;  %v4342_v14 = vsub.f32 1.0, %v4301_v10 }
 0x113   :  { %2147 = vlog2.f32 %v4341_v32  ;;  %v3315_v3 = vadd.f32 2.938164, %v1044_v15  ;;  %v1118_v4 = vadd.f32 2.4451342, %v1102_v50  ;;  %v1130_v2 = vmul.f32 %v1114_v25, %v3026_v6 }
 0x114   :  { %2149 = vlog2.f32 %v4342_v14  ;;  %v4344_v54 = vsub.f32 1.0, %v4302_v42  ;;  %v1074_v37 = vmul.f32 0.007784696, %v3105_v52  ;;  %v1119_v53 = vadd.f32 2.4451342, %v1103_v13 }
 0x115   :  { %4343 = vst [vmem:[#allocation53_spill] sm:$0xff] %v3315_v3  ;;  %v1131_v19 = vmul.f32 %v1115_v34, %v3037_v49  ;;  %v4345_v20 = vsub.f32 1.0, %v4303_v28  ;;  %v1075_v11 = vmul.f32 0.007784696, %v3113_v33  ;;  %v1120_v15 = vadd.f32 2.4451342, %v1104_v16 }
 0x116   :  { %2151 = vlog2.f32 %v4344_v54  ;;  %v3320_v38 = vpop.eup %2141  ;;  %v1132_v23 = vmul.f32 %v1116_v21, %v3048_v56  ;;  %v1144_v50 = vadd.f32 3.7544086, %v1128_v31  ;;  %v1076_v32 = vmul.f32 0.007784696, %v3120_v39 }
 0x117   :  { %2153 = vlog2.f32 %v4345_v20  ;;  %v1121_v14 = vadd.f32 2.4451342, %v1105_v5  ;;  %v1133_v54 = vmul.f32 %v1117_v18, %v3054_v26  ;;  %v1145_v42 = vadd.f32 3.7544086, %v1129_v60 }
 0x118   :  { %v3328_v25 = vpop.eup %2143  ;;  %v1077_v13 = vmul.f32 0.007784696, %v3141_v63  ;;  %v1078_v34 = vmul.f32 0.007784696, %v3148_v30  ;;  %v1134_v20 = vmul.f32 %v1118_v4, %v3064_v35  ;;  %v1146_v28 = vadd.f32 3.7544086, %v1130_v2 }
 0x119   :  { %v1079_v16 = vmul.f32 0.007784696, %v3153_v46  ;;  %v1090_v10 = vadd.f32 0.32246712, %v1074_v37  ;;  %v1135_v21 = vmul.f32 %v1119_v53, %v3077_v41  ;;  %v1147_v31 = vadd.f32 3.7544086, %v1131_v19 }
 0x11a   :  { %v1091_v12 = vadd.f32 0.32246712, %v1075_v11  ;;  %v1136_v5 = vmul.f32 %v1120_v15, %v3088_v57  ;;  %v1148_v18 = vadd.f32 3.7544086, %v1132_v23  ;;  %v1160_v60 = vmul.f32 %v1144_v50, %v2995_v0 }
 0x11b   :  { %v3337_v8 = vpop.eup %2145  ;;  %v1092_v3 = vadd.f32 0.32246712, %v1076_v32  ;;  %v1137_v47 = vmul.f32 %v1121_v14, %v3099_v22  ;;  %v1149_v44 = vadd.f32 3.7544086, %v1133_v54  ;;  %v1161_v4 = vmul.f32 %v1145_v42, %v3007_v40 }
 0x11c   :  { %v1093_v37 = vadd.f32 0.32246712, %v1077_v13  ;;  %v1094_v45 = vadd.f32 0.32246712, %v1078_v34  ;;  %v1150_v53 = vadd.f32 3.7544086, %v1134_v20  ;;  %v1162_v19 = vmul.f32 %v1146_v28, %v3026_v6 }
 0x11d   :  { %v3343_v2 = vpop.eup %2147  ;;  %v1095_v11 = vadd.f32 0.32246712, %v1079_v16  ;;  %v1106_v15 = vmul.f32 %v1090_v10, %v3105_v52  ;;  %v1151_v23 = vadd.f32 3.7544086, %v1135_v21  ;;  %v1163_v0 = vmul.f32 %v1147_v31, %v3037_v49 }
 0x11e   :  { %v3346_v61 = vpop.eup %2149  ;;  %v1107_v32 = vmul.f32 %v1091_v12, %v3113_v33  ;;  %v1152_v42 = vadd.f32 3.7544086, %v1136_v5  ;;  %v1164_v40 = vmul.f32 %v1148_v18, %v3048_v56  ;;  %v1176_v14 = vadd.f32 1.0, %v1160_v60 }
 0x11f   :  { %v1108_v28 = vmul.f32 %v1092_v3, %v3120_v39  ;;  %v1153_v6 = vadd.f32 3.7544086, %v1137_v47  ;;  %v1165_v13 = vmul.f32 %v1149_v44, %v3054_v26  ;;  %v1177_v34 = vadd.f32 1.0, %v1161_v4 }
 0x120   :  { %v3350_v50 = vpop.eup %2151  ;;  %v1109_v10 = vmul.f32 %v1093_v37, %v3141_v63  ;;  %v1110_v49 = vmul.f32 %v1094_v45, %v3148_v30  ;;  %v1166_v20 = vmul.f32 %v1150_v53, %v3064_v35  ;;  %v1178_v16 = vadd.f32 1.0, %v1162_v19 }
 0x121   :  { %v3354_v54 = vpop.eup %2153  ;;  %v1111_v12 = vmul.f32 %v1095_v11, %v3153_v46  ;;  %v1122_v21 = vadd.f32 2.4451342, %v1106_v15  ;;  %v1167_v56 = vmul.f32 %v1151_v23, %v3077_v41  ;;  %v1179_v31 = vadd.f32 1.0, %v1163_v0  ;;  %v4348_v0 = vld [vmem:[#allocation22_spill] sm:$0xff] }
 0x122   :  { %v1123_v5 = vadd.f32 2.4451342, %v1107_v32  ;;  %v1168_v3 = vmul.f32 %v1152_v42, %v3088_v57  ;;  %v1180_v47 = vadd.f32 1.0, %v1164_v40  ;;  %2155 = vrcp.f32 %v1176_v14 }
 0x123   :  { %v1124_v26 = vadd.f32 2.4451342, %v1108_v28  ;;  %v1169_v44 = vmul.f32 %v1153_v6, %v3099_v22  ;;  %v1181_v18 = vadd.f32 1.0, %v1165_v13  ;;  %2157 = vrcp.f32 %v1177_v34  ;;  %v4349_v28 = vld [vmem:[#allocation24_spill] sm:$0xff] }
 0x124   :  { %v1125_v45 = vadd.f32 2.4451342, %v1109_v10  ;;  %v1126_v60 = vadd.f32 2.4451342, %v1110_v49  ;;  %v1182_v35 = vadd.f32 1.0, %v1166_v20  ;;  %2159 = vrcp.f32 %v1178_v16  ;;  %v4350_v10 = vld [vmem:[#allocation25_spill] sm:$0xff] }
 0x125   :  { %v3366_v4 = vadd.f32 2.938164, %v3254_v17  ;;  %v1127_v37 = vadd.f32 2.4451342, %v1111_v12  ;;  %v1183_v41 = vadd.f32 1.0, %v1167_v56  ;;  %2161 = vrcp.f32 %v1179_v31 }
 0x126   :  { %v3369_v53 = vadd.f32 2.938164, %v3260_v62  ;;  %v1138_v57 = vmul.f32 %v1122_v21, %v3105_v52  ;;  %v1184_v19 = vadd.f32 1.0, %v1168_v3  ;;  %2163 = vrcp.f32 %v1180_v47  ;;  %v4351_v21 = vld [vmem:[#allocation26_spill] sm:$0xff] }
 0x127   :  { %4346 = vst [vmem:[#allocation36_spill] sm:$0xff] %v3366_v4  ;;  %v1139_v22 = vmul.f32 %v1123_v5, %v3113_v33  ;;  %v1140_v11 = vmul.f32 %v1124_v26, %v3120_v39  ;;  %v1185_v15 = vadd.f32 1.0, %v1169_v44  ;;  %2165 = vrcp.f32 %v1181_v18 }
 0x128   :  { %4347 = vst [vmem:[#allocation37_spill] sm:$0xff] %v3369_v53  ;;  %v1141_v23 = vmul.f32 %v1125_v45, %v3141_v63  ;;  %v1142_v17 = vmul.f32 %v1126_v60, %v3148_v30  ;;  %2167 = vrcp.f32 %v1182_v35  ;;  %v1235_v32 = vsub.f32 1.0, %v4348_v0 }
 0x129   :  { %v1143_v62 = vmul.f32 %v1127_v37, %v3153_v46  ;;  %2169 = vrcp.f32 %v1183_v41  ;;  %v1236_v42 = vsub.f32 1.0, %v2374_v51  ;;  %v1241_v40 = vmul.f32 0.6931472, %v3212_v27 }
 0x12a   :  { %v1154_v14 = vadd.f32 3.7544086, %v1138_v57  ;;  %2171 = vrcp.f32 %v1184_v19  ;;  %v1237_v6 = vsub.f32 1.0, %v4349_v28  ;;  %v1243_v13 = vmul.f32 0.6931472, %v3231_v43 }
 0x12b   :  { %v1155_v34 = vadd.f32 3.7544086, %v1139_v22  ;;  %2173 = vrcp.f32 %v1185_v15  ;;  %v1238_v49 = vsub.f32 1.0, %v4350_v10  ;;  %v1245_v20 = vmul.f32 0.6931472, %v3234_v59 }
 0x12c   :  { %v3384_v16 = vpop.eup %2155  ;;  %v1156_v12 = vadd.f32 3.7544086, %v1140_v11  ;;  %v1239_v56 = vsub.f32 1.0, %v4351_v21  ;;  %v1247_v31 = vmul.f32 0.6931472, %v3265_v7  ;;  %2175 = vlog2.f32 %v1235_v32 }
 0x12d   :  { %v3388_v27 = vpop.eup %2157  ;;  %v1157_v5 = vadd.f32 3.7544086, %v1141_v23  ;;  %v1249_v3 = vmul.f32 0.6931472, %v3320_v38  ;;  %2177 = vlog2.f32 %v1236_v42  ;;  %v3391_v43 = vmul.f32 -2.0, %v1241_v40 }
 0x12e   :  { %v3393_v47 = vpop.eup %2159  ;;  %v1158_v26 = vadd.f32 3.7544086, %v1142_v17  ;;  %v1251_v59 = vmul.f32 0.6931472, %v3328_v25  ;;  %2179 = vlog2.f32 %v1237_v6  ;;  %v3396_v44 = vmul.f32 -2.0, %v1243_v13 }
 0x12f   :  { %v3398_v18 = vpop.eup %2161  ;;  %v1159_v7 = vadd.f32 3.7544086, %v1143_v62  ;;  %v1253_v45 = vmul.f32 0.6931472, %v3337_v8  ;;  %2181 = vlog2.f32 %v1238_v49  ;;  %v3401_v60 = vmul.f32 -2.0, %v1245_v20 }
 0x130   :  { %v3403_v38 = vpop.eup %2163  ;;  %v1170_v35 = vmul.f32 %v1154_v14, %v3105_v52  ;;  %v1255_v37 = vmul.f32 0.6931472, %v3343_v2  ;;  %2183 = vlog2.f32 %v1239_v56  ;;  %v3407_v41 = vmul.f32 -2.0, %v1247_v31 }
 0x131   :  { %v3409_v25 = vpop.eup %2165  ;;  %v1171_v57 = vmul.f32 %v1155_v34, %v3113_v33  ;;  %v1257_v19 = vmul.f32 0.6931472, %v3346_v61  ;;  %v3413_v22 = vmul.f32 -2.0, %v1249_v3  ;;  %2185 = vrsqrt.f32 %v3391_v43 }
 0x132   :  { %v3416_v8 = vpop.eup %2167  ;;  %v1172_v11 = vmul.f32 %v1156_v12, %v3120_v39  ;;  %v1259_v52 = vmul.f32 0.6931472, %v3350_v50  ;;  %v3420_v2 = vmul.f32 -2.0, %v1251_v59  ;;  %2187 = vrsqrt.f32 %v3396_v44 }
 0x133   :  { %v3423_v15 = vpop.eup %2169  ;;  %v1173_v33 = vmul.f32 %v1157_v5, %v3141_v63  ;;  %v1261_v61 = vmul.f32 0.6931472, %v3354_v54  ;;  %v3427_v23 = vmul.f32 -2.0, %v1253_v45  ;;  %2189 = vrsqrt.f32 %v3401_v60 }
 0x134   :  { %4352 = vst [vmem:[#allocation38_spill] sm:$0xff] %v3423_v15  ;;  %v3430_v17 = vpop.eup %2171  ;;  %v1174_v39 = vmul.f32 %v1158_v26, %v3148_v30  ;;  %v1175_v50 = vmul.f32 %v1159_v7, %v3153_v46  ;;  %v3434_v32 = vmul.f32 -2.0, %v1255_v37  ;;  %2191 = vrsqrt.f32 %v3407_v41 }
 0x135   :  { %4353 = vst [vmem:[#allocation52_spill] sm:$0xff] %v3430_v17  ;;  %v3437_v62 = vpop.eup %2173  ;;  %v3440_v63 = vadd.f32 2.938164, %v3268_v55  ;;  %v3442_v54 = vadd.f32 1.0, %v1170_v35  ;;  %v3444_v42 = vmul.f32 -2.0, %v1257_v19  ;;  %2193 = vrsqrt.f32 %v3413_v22 }
 0x136   :  { %4354 = vst [vmem:[#allocation54_spill] sm:$0xff] %v3437_v62  ;;  %v2176_v40 = vpop.eup %2175  ;;  %v3447_v14 = vadd.f32 1.0, %v1171_v57  ;;  %v3449_v30 = vadd.f32 1.0, %v1172_v11  ;;  %v3451_v46 = vmul.f32 -2.0, %v1259_v52  ;;  %2195 = vrsqrt.f32 %v3420_v2 }
 0x137   :  { %4355 = vst [vmem:[#allocation55_spill] sm:$0xff] %v3440_v63  ;;  %v2178_v6 = vpop.eup %2177  ;;  %v3454_v13 = vadd.f32 1.0, %v1173_v33  ;;  %v1263_v55 = vmul.f32 0.6931472, %v2176_v40  ;;  %v3456_v34 = vmul.f32 -2.0, %v1261_v61  ;;  %2197 = vrsqrt.f32 %v3427_v23 }
 0x138   :  { %v2180_v49 = vpop.eup %2179  ;;  %v3459_v20 = vadd.f32 1.0, %v1174_v39  ;;  %v3461_v12 = vadd.f32 1.0, %v1175_v50  ;;  %v1265_v56 = vmul.f32 0.6931472, %v2178_v6  ;;  %2199 = vrsqrt.f32 %v3434_v32 }
 0x139   :  { %v2182_v31 = vpop.eup %2181  ;;  %v1267_v5 = vmul.f32 0.6931472, %v2180_v49  ;;  %v3464_v3 = vmul.f32 -2.0, %v1263_v55  ;;  %vm1290_vm10 = vcmp.eq.f32.partialorder %v3391_v43, inf  ;;  %2201 = vrsqrt.f32 %v3444_v42 }
 0x13a   :  { %v2184_v26 = vpop.eup %2183  ;;  %v3468_v59 = vmul.f32 -2.0, %v1265_v56  ;;  %vm1297_vm13 = vcmp.eq.f32.partialorder %v3396_v44, inf  ;;  %2203 = vrsqrt.f32 %v3451_v46  ;;  %vm1292_vm0 = vcmp.eq.f32.partialorder %v3391_v43, 0.0 }
 0x13b   :  { %v2186_v45 = vpop.eup %2185  ;;  %vm1304_vm1 = vcmp.eq.f32.partialorder %v3401_v60, inf  ;;  %2205 = vrsqrt.f32 %v3456_v34  ;;  %v1269_v19 = vmul.f32 0.6931472, %v2182_v31  ;;  %v3478_v11 = vmul.f32 -2.0, %v1267_v5 }
 0x13c   :  { %v2188_v57 = vpop.eup %2187  ;;  %vm1299_vm2 = vcmp.eq.f32.partialorder %v3396_v44, 0.0  ;;  %vm1311_vm3 = vcmp.eq.f32.partialorder %v3407_v41, inf  ;;  %2207 = vrsqrt.f32 %v3464_v3  ;;  %vm1306_vm6 = vcmp.eq.f32.partialorder %v3401_v60, 0.0 }
 0x13d   :  { %v2190_v52 = vpop.eup %2189  ;;  %vm1313_vm7 = vcmp.eq.f32.partialorder %v3407_v41, 0.0  ;;  %vm1318_vm8 = vcmp.eq.f32.partialorder %v3413_v22, inf  ;;  %2209 = vrsqrt.f32 %v3468_v59  ;;  %v1271_v55 = vmul.f32 0.6931472, %v2184_v26 }
 0x13e   :  { %v2192_v39 = vpop.eup %2191  ;;  %v1289_v49 = vmul.f32 %v2186_v45, %v3391_v43  ;;  %v3497_v5 = vmul.f32 -2.0, %v1269_v19  ;;  %v1296_v61 = vmul.f32 %v2188_v57, %v3396_v44  ;;  %v1303_v50 = vmul.f32 %v2190_v52, %v3401_v60 }
 0x13f   :  { %v2194_v6 = vpop.eup %2193  ;;  %2211 = vrsqrt.f32 %v3478_v11  ;;  %v1310_v26 = vmul.f32 %v2192_v39, %v3407_v41  ;;  %vm1334_vm5 = vcmp.eq.f32.partialorder %v3427_v23, 0.0  ;;  %vm1346_vm4 = vcmp.eq.f32.partialorder %v3444_v42, inf }
 0x140   :  { %v2196_v31 = vpop.eup %2195  ;;  %v1349_v45 = vand.u32 2147483648, %v3444_v42  ;;  %vm1353_vm15 = vcmp.eq.f32.partialorder %v3451_v46, inf  ;;  %v1356_v19 = vand.u32 2147483648, %v3451_v46  ;;  %vm1360_vm9 = vcmp.eq.f32.partialorder %v3456_v34, inf }
 0x141   :  { %v2198_v40 = vpop.eup %2197  ;;  %v1363_v52 = vand.u32 2147483648, %v3456_v34  ;;  %v3514_v56 = vmul.f32 -2.0, %v1271_v55  ;;  %v1291_v33 = vsel %vm1290_vm10, %v3391_v43, %v1289_v49  ;;  %v1317_v37 = vmul.f32 %v2194_v6, %v3413_v22 }
 0x142   :  { %v2200_v57 = vpop.eup %2199  ;;  %vm1355_vm14 = vcmp.eq.f32.partialorder %v3451_v46, 0.0  ;;  %vm1362_vm12 = vcmp.eq.f32.partialorder %v3456_v34, 0.0  ;;  %v1370_v35 = vand.u32 2147483648, %v3464_v3  ;;  %v1298_v21 = vsel %vm1297_vm13, %v3396_v44, %v1296_v61 }
 0x143   :  { %v2202_v39 = vpop.eup %2201  ;;  %v1305_v55 = vsel %vm1304_vm1, %v3401_v60, %v1303_v50  ;;  %vm1374_vm11 = vcmp.eq.f32.partialorder %v3468_v59, inf  ;;  %2213 = vrsqrt.f32 %v3497_v5  ;;  %v1312_v49 = vsel %vm1311_vm3, %v3407_v41, %v1310_v26 }
 0x144   :  { %v2204_v7 = vpop.eup %2203  ;;  %v1324_v10 = vmul.f32 %v2196_v31, %v3420_v2  ;;  %v1331_v28 = vmul.f32 %v2198_v40, %v3427_v23  ;;  %v1338_v51 = vmul.f32 %v2200_v57, %v3434_v32  ;;  %vm1369_vm10 = vcmp.eq.f32.partialorder %v3464_v3, 0.0 }
 0x145   :  { %v2206_v6 = vpop.eup %2205  ;;  %v4356_v50 = vand.u32 2147483648, %v3391_v43  ;;  %v1345_v63 = vmul.f32 %v2202_v39, %v3444_v42  ;;  %vm1376_vm13 = vcmp.eq.f32.partialorder %v3468_v59, 0.0  ;;  %v1377_v26 = vand.u32 2147483648, %v3468_v59 }
 0x146   :  { %v2208_v61 = vpop.eup %2207  ;;  %v4357_v40 = vand.u32 2147483648, %v3396_v44  ;;  %v1319_v53 = vsel %vm1318_vm8, %v3413_v22, %v1317_v37  ;;  %v1352_v43 = vmul.f32 %v2204_v7, %v3451_v46  ;;  %v4358_v39 = vand.u32 2147483648, %v3401_v60 }
 0x147   :  { %v3542_v0 = vsel %vm1292_vm0, %v4356_v50, %v1291_v33  ;;  %v2210_v31 = vpop.eup %2209  ;;  %v1359_v33 = vmul.f32 %v2206_v6, %v3456_v34  ;;  %v4359_v4 = vand.u32 2147483648, %v3407_v41  ;;  %vm1381_vm0 = vcmp.eq.f32.partialorder %v3478_v11, inf }
 0x148   :  { %v3551_v57 = vsel %vm1299_vm2, %v4357_v40, %v1298_v21  ;;  %v3562_v50 = vsel %vm1306_vm6, %v4358_v39, %v1305_v55  ;;  %2215 = vrsqrt.f32 %v3514_v56  ;;  %vm4360_vm1 = vcmp.eq.f32.partialorder %v3420_v2, inf }
 0x149   :  { %v3568_v21 = vsel %vm1313_vm7, %v4359_v4, %v1312_v49  ;;  %v1326_v44 = vsel %vm4360_vm1, %v3420_v2, %v1324_v10  ;;  %vm4361_vm2 = vcmp.eq.f32.partialorder %v3427_v23, inf  ;;  %vm4362_vm3 = vcmp.eq.f32.partialorder %v3434_v32, inf  ;;  %v2212_v4 = vpop.eup %2211 }
 0x14a   :  { %v1333_v60 = vsel %vm4361_vm2, %v3427_v23, %v1331_v28  ;;  %v1340_v7 = vsel %vm4362_vm3, %v3434_v32, %v1338_v51  ;;  %v1366_v41 = vmul.f32 %v2208_v61, %v3464_v3  ;;  %v4363_v37 = vand.u32 2147483648, %v3413_v22 }
 0x14b   :  { %vm4364_vm6 = vcmp.eq.f32.partialorder %v3413_v22, 0.0  ;;  %v1347_v10 = vsel %vm1346_vm4, %v3444_v42, %v1345_v63  ;;  %v1373_v6 = vmul.f32 %v2210_v31, %v3468_v59  ;;  %vm1383_vm7 = vcmp.eq.f32.partialorder %v3478_v11, 0.0 }
 0x14c   :  { %v3586_v55 = vsel %vm4364_vm6, %v4363_v37, %v1319_v53  ;;  %v1354_v51 = vsel %vm1353_vm15, %v3451_v46, %v1352_v43  ;;  %v1361_v28 = vsel %vm1360_vm9, %v3456_v34, %v1359_v33  ;;  %v1380_v22 = vmul.f32 %v2212_v4, %v3478_v11 }
 0x14d   :  { %v1384_v53 = vand.u32 2147483648, %v3478_v11  ;;  %v4365_v49 = vand.u32 2147483648, %v3420_v2  ;;  %vm4366_vm8 = vcmp.eq.f32.partialorder %v3420_v2, 0.0  ;;  %v4367_v61 = vand.u32 2147483648, %v3427_v23  ;;  %v2214_v39 = vpop.eup %2213 }
 0x14e   :  { %v4368_v40 = vand.u32 2147483648, %v3434_v32  ;;  %vm4369_vm9 = vcmp.eq.f32.partialorder %v3434_v32, 0.0  ;;  %vm1388_vm4 = vcmp.eq.f32.partialorder %v3497_v5, inf  ;;  %vm4370_vm15 = vcmp.eq.f32.partialorder %v3444_v42, 0.0 }
 0x14f   :  { %v3605_v63 = vsel %vm4366_vm8, %v4365_v49, %v1326_v44  ;;  %v3611_v31 = vsel %vm1334_vm5, %v4367_v61, %v1333_v60  ;;  %v3622_v33 = vsel %vm4370_vm15, %v1349_v45, %v1347_v10  ;;  %vm4371_vm1 = vcmp.eq.f32.partialorder %v3464_v3, inf }
 0x150   :  { %v3617_v43 = vsel %vm4369_vm9, %v4368_v40, %v1340_v7  ;;  %v1368_v2 = vsel %vm4371_vm1, %v3464_v3, %v1366_v41  ;;  %vm1390_vm2 = vcmp.eq.f32.partialorder %v3497_v5, 0.0  ;;  %v1391_v23 = vand.u32 2147483648, %v3497_v5 }
 0x151   :  { %v3631_v32 = vsel %vm1355_vm14, %v1356_v19, %v1354_v51  ;;  %v3635_v44 = vsel %vm1362_vm12, %v1363_v52, %v1361_v28  ;;  %v1375_v42 = vsel %vm1374_vm11, %v3468_v59, %v1373_v6  ;;  %vm1395_vm5 = vcmp.eq.f32.partialorder %v3514_v56, inf }
 0x152   :  { %v1382_v45 = vsel %vm1381_vm0, %v3478_v11, %v1380_v22  ;;  %v1387_v60 = vmul.f32 %v2214_v39, %v3497_v5  ;;  %vm1397_vm3 = vcmp.eq.f32.partialorder %v3514_v56, 0.0  ;;  %v1398_v46 = vand.u32 2147483648, %v3514_v56  ;;  %v2216_v6 = vpop.eup %2215 }
 0x153   :  { %v3649_v34 = vsel %vm1369_vm10, %v1370_v35, %v1368_v2  ;;  %v1400_v19 = vmul.f32 -0.007784894, %v3542_v0  ;;  %v1401_v52 = vmul.f32 -0.007784894, %v3551_v57  ;;  %v1402_v7 = vmul.f32 -0.007784894, %v3562_v50 }
 0x154   :  { %v3656_v41 = vsel %vm1376_vm13, %v1377_v26, %v1375_v42  ;;  %v1403_v4 = vmul.f32 -0.007784894, %v3568_v21  ;;  %v1404_v37 = vmul.f32 -0.007784894, %v3586_v55  ;;  %v1405_v10 = vmul.f32 -0.007784894, %v3605_v63 }
 0x155   :  { %v3663_v3 = vsel %vm1383_vm7, %v1384_v53, %v1382_v45  ;;  %v1406_v35 = vmul.f32 -0.007784894, %v3611_v31  ;;  %v1407_v51 = vmul.f32 -0.007784894, %v3617_v43  ;;  %v1408_v28 = vmul.f32 -0.007784894, %v3622_v33 }
 0x156   :  { %v1389_v59 = vsel %vm1388_vm4, %v3497_v5, %v1387_v60  ;;  %v1394_v26 = vmul.f32 %v2216_v6, %v3514_v56  ;;  %v1409_v22 = vmul.f32 -0.007784894, %v3631_v32  ;;  %v1410_v49 = vmul.f32 -0.007784894, %v3635_v44 }
 0x157   :  { %2217 = vrcp.f32 %v3442_v54  ;;  %v1411_v11 = vmul.f32 -0.007784894, %v3649_v34  ;;  %v1412_v53 = vmul.f32 -0.007784894, %v3656_v41  ;;  %v1413_v61 = vmul.f32 -0.007784894, %v3663_v3 }
 0x158   :  { %v1396_v40 = vsel %vm1395_vm5, %v3514_v56, %v1394_v26  ;;  %v1416_v2 = vadd.f32 -0.32239646, %v1400_v19  ;;  %v1417_v39 = vadd.f32 -0.32239646, %v1401_v52  ;;  %v1418_v42 = vadd.f32 -0.32239646, %v1402_v7 }
 0x159   :  { %v3683_v45 = vsel %vm1390_vm2, %v1391_v23, %v1389_v59  ;;  %v1419_v60 = vadd.f32 -0.32239646, %v1403_v4  ;;  %v1420_v6 = vadd.f32 -0.32239646, %v1404_v37  ;;  %v1421_v54 = vadd.f32 -0.32239646, %v1405_v10 }
 0x15a   :  { %v3687_v62 = vsel %vm1397_vm3, %v1398_v46, %v1396_v40  ;;  %v1414_v17 = vmul.f32 -0.007784894, %v3683_v45  ;;  %v1422_v15 = vadd.f32 -0.32239646, %v1406_v35  ;;  %v1423_v48 = vadd.f32 -0.32239646, %v1407_v51 }
 0x15b   :  { %v3692_v19 = vmul.f32 %v3384_v16, %v3256_v9  ;;  %v1415_v52 = vmul.f32 -0.007784894, %v3687_v62  ;;  %v1424_v5 = vadd.f32 -0.32239646, %v1408_v28  ;;  %v1425_v23 = vadd.f32 -0.32239646, %v1409_v22 }
 0x15c   :  { %2219 = vrcp.f32 %v3447_v14  ;;  %v1426_v7 = vadd.f32 -0.32239646, %v1410_v49  ;;  %v1427_v4 = vadd.f32 -0.32239646, %v1411_v11  ;;  %v1428_v37 = vadd.f32 -0.32239646, %v1412_v53 }
 0x15d   :  { %4372 = vst [vmem:[#allocation56_spill] sm:$0xff] %v3692_v19  ;;  %v1429_v56 = vadd.f32 -0.32239646, %v1413_v61  ;;  %v1432_v46 = vmul.f32 %v1416_v2, %v3542_v0  ;;  %v1433_v10 = vmul.f32 %v1417_v39, %v3551_v57  ;;  %v1434_v35 = vmul.f32 %v1418_v42, %v3562_v50 }
 0x15e   :  { %v1430_v51 = vadd.f32 -0.32239646, %v1414_v17  ;;  %v1435_v9 = vmul.f32 %v1419_v60, %v3568_v21  ;;  %v1436_v16 = vmul.f32 %v1420_v6, %v3586_v55  ;;  %v1437_v28 = vmul.f32 %v1421_v54, %v3605_v63 }
 0x15f   :  { %v1431_v59 = vadd.f32 -0.32239646, %v1415_v52  ;;  %v1438_v14 = vmul.f32 %v1422_v15, %v3611_v31  ;;  %v1439_v26 = vmul.f32 %v1423_v48, %v3617_v43  ;;  %v1440_v22 = vmul.f32 %v1424_v5, %v3622_v33 }
 0x160   :  { %v1441_v49 = vmul.f32 %v1425_v23, %v3631_v32  ;;  %v1442_v11 = vmul.f32 %v1426_v7, %v3635_v44  ;;  %v1443_v53 = vmul.f32 %v1427_v4, %v3649_v34  ;;  %v1444_v17 = vmul.f32 %v1428_v37, %v3656_v41 }
 0x161   :  { %v3709_v61 = vpop.eup %2217  ;;  %v1445_v40 = vmul.f32 %v1429_v56, %v3663_v3  ;;  %v1448_v2 = vadd.f32 -2.4007583, %v1432_v46  ;;  %v1449_v39 = vadd.f32 -2.4007583, %v1433_v10  ;;  %v1450_v42 = vadd.f32 -2.4007583, %v1434_v35 }
 0x162   :  { %v1446_v15 = vmul.f32 %v1430_v51, %v3683_v45  ;;  %v1451_v48 = vadd.f32 -2.4007583, %v1435_v9  ;;  %v1452_v60 = vadd.f32 -2.4007583, %v1436_v16  ;;  %v1453_v6 = vadd.f32 -2.4007583, %v1437_v28 }
 0x163   :  { %v1447_v54 = vmul.f32 %v1431_v59, %v3687_v62  ;;  %v1454_v52 = vadd.f32 -2.4007583, %v1438_v14  ;;  %v1455_v5 = vadd.f32 -2.4007583, %v1439_v26  ;;  %v1456_v23 = vadd.f32 -2.4007583, %v1440_v22 }
 0x164   :  { %v3716_v7 = vmul.f32 %v3388_v27, %v3262_v29  ;;  %v1457_v4 = vadd.f32 -2.4007583, %v1441_v49  ;;  %v1458_v37 = vadd.f32 -2.4007583, %v1442_v11  ;;  %v1459_v56 = vadd.f32 -2.4007583, %v1443_v53 }
 0x165   :  { %v1460_v46 = vadd.f32 -2.4007583, %v1444_v17  ;;  %v1461_v10 = vadd.f32 -2.4007583, %v1445_v40  ;;  %v1464_v35 = vmul.f32 %v1448_v2, %v3542_v0  ;;  %v1465_v51 = vmul.f32 %v1449_v39, %v3551_v57 }
 0x166   :  { %4373 = vst [vmem:[#allocation57_spill] sm:$0xff] %v3716_v7  ;;  %v3720_v9 = vpop.eup %2219  ;;  %v1462_v16 = vadd.f32 -2.4007583, %v1446_v15  ;;  %v1466_v28 = vmul.f32 %v1450_v42, %v3562_v50  ;;  %v1467_v59 = vmul.f32 %v1451_v48, %v3568_v21  ;;  %v1468_v14 = vmul.f32 %v1452_v60, %v3586_v55 }
 0x167   :  { %v1463_v29 = vadd.f32 -2.4007583, %v1447_v54  ;;  %v1469_v27 = vmul.f32 %v1453_v6, %v3605_v63  ;;  %v1470_v26 = vmul.f32 %v1454_v52, %v3611_v31  ;;  %v1471_v22 = vmul.f32 %v1455_v5, %v3617_v43 }
 0x168   :  { %v1472_v49 = vmul.f32 %v1456_v23, %v3622_v33  ;;  %v1473_v11 = vmul.f32 %v1457_v4, %v3631_v32  ;;  %v1474_v53 = vmul.f32 %v1458_v37, %v3635_v44  ;;  %v1475_v17 = vmul.f32 %v1459_v56, %v3649_v34 }
 0x169   :  { %v1476_v40 = vmul.f32 %v1460_v46, %v3656_v41  ;;  %v1477_v2 = vmul.f32 %v1461_v10, %v3663_v3  ;;  %v1480_v39 = vadd.f32 -2.5497324, %v1464_v35  ;;  %v1481_v42 = vadd.f32 -2.5497324, %v1465_v51 }
 0x16a   :  { %v1478_v15 = vmul.f32 %v1462_v16, %v3683_v45  ;;  %v1482_v48 = vadd.f32 -2.5497324, %v1466_v28  ;;  %v1483_v60 = vadd.f32 -2.5497324, %v1467_v59  ;;  %v1484_v6 = vadd.f32 -2.5497324, %v1468_v14 }
 0x16b   :  { %v1479_v54 = vmul.f32 %v1463_v29, %v3687_v62  ;;  %v1485_v52 = vadd.f32 -2.5497324, %v1469_v27  ;;  %v1486_v5 = vadd.f32 -2.5497324, %v1470_v26  ;;  %v1487_v23 = vadd.f32 -2.5497324, %v1471_v22 }
 0x16c   :  { %2221 = vrcp.f32 %v3449_v30  ;;  %v1488_v4 = vadd.f32 -2.5497324, %v1472_v49  ;;  %v1489_v37 = vadd.f32 -2.5497324, %v1473_v11  ;;  %v1490_v56 = vadd.f32 -2.5497324, %v1474_v53 }
 0x16d   :  { %v3739_v46 = vmul.f32 %v3393_v47, %v3270_v24  ;;  %v1491_v10 = vadd.f32 -2.5497324, %v1475_v17  ;;  %v1492_v35 = vadd.f32 -2.5497324, %v1476_v40  ;;  %v1493_v51 = vadd.f32 -2.5497324, %v1477_v2 }
 0x16e   :  { %v1494_v16 = vadd.f32 -2.5497324, %v1478_v15  ;;  %v1496_v28 = vmul.f32 %v1480_v39, %v3542_v0  ;;  %v1497_v59 = vmul.f32 %v1481_v42, %v3551_v57  ;;  %v1498_v14 = vmul.f32 %v1482_v48, %v3562_v50 }
 0x16f   :  { %4374 = vst [vmem:[#allocation58_spill] sm:$0xff] %v3739_v46  ;;  %v1495_v29 = vadd.f32 -2.5497324, %v1479_v54  ;;  %v1499_v30 = vmul.f32 %v1483_v60, %v3568_v21  ;;  %v1500_v27 = vmul.f32 %v1484_v6, %v3586_v55  ;;  %v1501_v26 = vmul.f32 %v1485_v52, %v3605_v63  ;;  %v4399_v46 = vld [vmem:[#allocation36_spill] sm:$0xff] }
 0x170   :  { %v1502_v24 = vmul.f32 %v1486_v5, %v3611_v31  ;;  %v1503_v47 = vmul.f32 %v1487_v23, %v3617_v43  ;;  %v1504_v22 = vmul.f32 %v1488_v4, %v3622_v33  ;;  %v1505_v49 = vmul.f32 %v1489_v37, %v3631_v32 }
 0x171   :  { %v1506_v11 = vmul.f32 %v1490_v56, %v3635_v44  ;;  %v1507_v53 = vmul.f32 %v1491_v10, %v3649_v34  ;;  %v1508_v17 = vmul.f32 %v1492_v35, %v3656_v41  ;;  %v1509_v40 = vmul.f32 %v1493_v51, %v3663_v3 }
 0x172   :  { %v1510_v2 = vmul.f32 %v1494_v16, %v3683_v45  ;;  %v1512_v39 = vadd.f32 4.3746643, %v1496_v28  ;;  %v1513_v42 = vadd.f32 4.3746643, %v1497_v59  ;;  %v1514_v15 = vadd.f32 4.3746643, %v1498_v14 }
 0x173   :  { %v1511_v48 = vmul.f32 %v1495_v29, %v3687_v62  ;;  %v1515_v60 = vadd.f32 4.3746643, %v1499_v30  ;;  %v1516_v6 = vadd.f32 4.3746643, %v1500_v27  ;;  %v1517_v54 = vadd.f32 4.3746643, %v1501_v26 }
 0x174   :  { %2223 = vrcp.f32 %v3454_v13  ;;  %v1518_v52 = vadd.f32 4.3746643, %v1502_v24  ;;  %v1519_v5 = vadd.f32 4.3746643, %v1503_v47  ;;  %v1520_v23 = vadd.f32 4.3746643, %v1504_v22 }
 0x175   :  { %2225 = vrcp.f32 %v3459_v20  ;;  %v1521_v4 = vadd.f32 4.3746643, %v1505_v49  ;;  %v1522_v37 = vadd.f32 4.3746643, %v1506_v11  ;;  %v1523_v56 = vadd.f32 4.3746643, %v1507_v53 }
 0x176   :  { %v3759_v10 = vpop.eup %2221  ;;  %v1524_v35 = vadd.f32 4.3746643, %v1508_v17  ;;  %v1525_v51 = vadd.f32 4.3746643, %v1509_v40  ;;  %v1526_v16 = vadd.f32 4.3746643, %v1510_v2  ;;  %v1528_v28 = vmul.f32 %v1512_v39, %v3542_v0 }
 0x177   :  { %v1527_v59 = vadd.f32 4.3746643, %v1511_v48  ;;  %v1529_v14 = vmul.f32 %v1513_v42, %v3551_v57  ;;  %v1530_v13 = vmul.f32 %v1514_v15, %v3562_v50  ;;  %v1531_v29 = vmul.f32 %v1515_v60, %v3568_v21  ;;  %v4375_v48 = vld [vmem:[#allocation45_spill] sm:$0xff] }
 0x178   :  { %v1532_v30 = vmul.f32 %v1516_v6, %v3586_v55  ;;  %v1533_v20 = vmul.f32 %v1517_v54, %v3605_v63  ;;  %v1534_v27 = vmul.f32 %v1518_v52, %v3611_v31  ;;  %v1535_v26 = vmul.f32 %v1519_v5, %v3617_v43 }
 0x179   :  { %v1536_v24 = vmul.f32 %v1520_v23, %v3622_v33  ;;  %v1537_v47 = vmul.f32 %v1521_v4, %v3631_v32  ;;  %v1538_v22 = vmul.f32 %v1522_v37, %v3635_v44  ;;  %v1539_v49 = vmul.f32 %v1523_v56, %v3649_v34 }
 0x17a   :  { %v1540_v11 = vmul.f32 %v1524_v35, %v3656_v41  ;;  %v1541_v53 = vmul.f32 %v1525_v51, %v3663_v3  ;;  %v1542_v17 = vmul.f32 %v1526_v16, %v3683_v45  ;;  %v3776_v40 = vadd.f32 2.938164, %v1528_v28 }
 0x17b   :  { %v1543_v2 = vmul.f32 %v1527_v59, %v3687_v62  ;;  %v3779_v39 = vadd.f32 2.938164, %v1529_v14  ;;  %v3781_v42 = vadd.f32 2.938164, %v1530_v13  ;;  %v3783_v15 = vadd.f32 2.938164, %v1531_v29 }
 0x17c   :  { %v3787_v60 = vmul.f32 %v3398_v18, %v4375_v48  ;;  %v3789_v6 = vadd.f32 2.938164, %v1532_v30  ;;  %v3791_v54 = vadd.f32 2.938164, %v1533_v20  ;;  %v3793_v52 = vadd.f32 2.938164, %v1534_v27 }
 0x17d   :  { %v3797_v5 = vmul.f32 %v3403_v38, %v3281_v58  ;;  %v3799_v23 = vadd.f32 2.938164, %v1535_v26  ;;  %v3801_v4 = vadd.f32 2.938164, %v1536_v24  ;;  %v3803_v37 = vadd.f32 2.938164, %v1537_v47 }
 0x17e   :  { %4376 = vst [vmem:[#allocation45_spill] sm:$0xff] %v3787_v60  ;;  %v2224_v56 = vpop.eup %2223  ;;  %2227 = vrcp.f32 %v3461_v12  ;;  %v3806_v18 = vadd.f32 2.938164, %v1538_v22  ;;  %v3808_v35 = vadd.f32 2.938164, %v1539_v49  ;;  %v3814_v58 = vmul.f32 %v3409_v25, %v3283_v1  ;;  %v4385_v30 = vld [vmem:[#allocation46_spill] sm:$0xff] }
 0x17f   :  { %4377 = vst [vmem:[#allocation59_spill] sm:$0xff] %v3797_v5  ;;  %v3810_v51 = vadd.f32 2.938164, %v1540_v11  ;;  %v2226_v16 = vpop.eup %2225  ;;  %v3816_v38 = vadd.f32 2.938164, %v1541_v53  ;;  %v3824_v12 = vmul.f32 %v3416_v8, %v3286_v36  ;;  %v4386_v20 = vld [vmem:[#allocation38_spill] sm:$0xff]  ;;  %v3867_v7 = vmul.f32 %v2224_v56, %v4399_v46 }
 0x180   :  { %4378 = vst [vmem:[#allocation60_spill] sm:$0xff] %v3808_v35  ;;  %4380 = vst [vmem:[#allocation62_spill] sm:$0xff] %v3814_v58  ;;  %v3818_v28 = vadd.f32 2.938164, %v1542_v17  ;;  %v3820_v59 = vadd.f32 2.938164, %v1543_v2  ;;  %v3831_v1 = vmul.f32 %v4386_v20, %v4385_v30 }
 0x181   :  { %4379 = vst [vmem:[#allocation61_spill] sm:$0xff] %v3810_v51  ;;  %4381 = vst [vmem:[#allocation63_spill] sm:$0xff] %v3816_v38  ;;  %v1560_v14 = vmul.f32 0.007784696, %v3542_v0  ;;  %v1561_v13 = vmul.f32 0.007784696, %v3551_v57 }
 0x182   :  { %4382 = vst [vmem:[#allocation64_spill] sm:$0xff] %v3818_v28  ;;  %4383 = vst [vmem:[#allocation65_spill] sm:$0xff] %v3820_v59  ;;  %v1562_v29 = vmul.f32 0.007784696, %v3562_v50  ;;  %v1563_v25 = vmul.f32 0.007784696, %v3568_v21 }
 0x183   :  { %4384 = vst [vmem:[#allocation66_spill] sm:$0xff] %v3824_v12  ;;  %4387 = vst [vmem:[#allocation46_spill] sm:$0xff] %v3831_v1  ;;  %v1564_v27 = vmul.f32 0.007784696, %v3586_v55  ;;  %v1565_v26 = vmul.f32 0.007784696, %v3605_v63 }
 0x184   :  { %v4388_v24 = vld [vmem:[#allocation47_spill] sm:$0xff]  ;;  %v4389_v47 = vld [vmem:[#allocation52_spill] sm:$0xff]  ;;  %v1566_v8 = vmul.f32 0.007784696, %v3611_v31  ;;  %v1567_v22 = vmul.f32 0.007784696, %v3617_v43 }
 0x185   :  { %v3838_v36 = vmul.f32 %v4389_v47, %v4388_v24  ;;  %v1568_v49 = vmul.f32 0.007784696, %v3622_v33  ;;  %v4391_v11 = vld [vmem:[#allocation48_spill] sm:$0xff]  ;;  %v4392_v53 = vld [vmem:[#allocation54_spill] sm:$0xff]  ;;  %v1569_v2 = vmul.f32 0.007784696, %v3631_v32 }
 0x186   :  { %v3845_v17 = vmul.f32 %v4392_v53, %v4391_v11  ;;  %v1570_v48 = vmul.f32 0.007784696, %v3635_v44  ;;  %v1571_v30 = vmul.f32 0.007784696, %v3649_v34  ;;  %v4394_v20 = vld [vmem:[#allocation49_spill] sm:$0xff]  ;;  %v4396_v12 = vld [vmem:[#allocation35_spill] sm:$0xff] }
 0x187   :  { %4390 = vst [vmem:[#allocation38_spill] sm:$0xff] %v3838_v36  ;;  %v3852_v24 = vmul.f32 %v3709_v61, %v4394_v20  ;;  %v1572_v47 = vmul.f32 0.007784696, %v3656_v41  ;;  %v1573_v36 = vmul.f32 0.007784696, %v3663_v3  ;;  %v3859_v11 = vmul.f32 %v3720_v9, %v4396_v12  ;;  %v4398_v5 = vld [vmem:[#allocation53_spill] sm:$0xff] }
 0x188   :  { %4393 = vst [vmem:[#allocation47_spill] sm:$0xff] %v3845_v17  ;;  %v1574_v1 = vmul.f32 0.007784696, %v3683_v45  ;;  %v1575_v53 = vmul.f32 0.007784696, %v3687_v62  ;;  %v3864_v60 = vmul.f32 %v3759_v10, %v4398_v5  ;;  %v2228_v38 = vpop.eup %2227  ;;  %v4400_v9 = vld [vmem:[#allocation37_spill] sm:$0xff] }
 0x189   :  { %4395 = vst [vmem:[#allocation52_spill] sm:$0xff] %v3852_v24  ;;  %4397 = vst [vmem:[#allocation48_spill] sm:$0xff] %v3859_v11  ;;  %v1576_v17 = vadd.f32 0.32246712, %v1560_v14  ;;  %v1577_v58 = vadd.f32 0.32246712, %v1561_v13  ;;  %v3870_v12 = vmul.f32 %v2226_v16, %v4400_v9 }
 0x18a   :  { %v1578_v61 = vadd.f32 0.32246712, %v1562_v29  ;;  %v1579_v20 = vadd.f32 0.32246712, %v1563_v25  ;;  %v1580_v24 = vadd.f32 0.32246712, %v1564_v27 }
 0x18b   :  { %v1581_v19 = vadd.f32 0.32246712, %v1565_v26  ;;  %v1582_v59 = vadd.f32 0.32246712, %v1566_v8  ;;  %v1583_v28 = vadd.f32 0.32246712, %v1567_v22  ;;  %v1592_v5 = vmul.f32 %v1576_v17, %v3542_v0 }
 0x18c   :  { %v1584_v11 = vadd.f32 0.32246712, %v1568_v49  ;;  %v1585_v14 = vadd.f32 0.32246712, %v1569_v2  ;;  %v1586_v13 = vadd.f32 0.32246712, %v1570_v48  ;;  %v1593_v25 = vmul.f32 %v1577_v58, %v3551_v57 }
 0x18d   :  { %v1587_v51 = vadd.f32 0.32246712, %v1571_v30  ;;  %v1588_v35 = vadd.f32 0.32246712, %v1572_v47  ;;  %v1589_v10 = vadd.f32 0.32246712, %v1573_v36  ;;  %v1594_v46 = vmul.f32 %v1578_v61, %v3562_v50 }
 0x18e   :  { %v1590_v29 = vadd.f32 0.32246712, %v1574_v1  ;;  %v1595_v56 = vmul.f32 %v1579_v20, %v3568_v21  ;;  %v1591_v27 = vadd.f32 0.32246712, %v1575_v53  ;;  %v1596_v26 = vmul.f32 %v1580_v24, %v3586_v55  ;;  %v4401_v61 = vld [vmem:[#allocation55_spill] sm:$0xff] }
 0x18f   :  { %v1597_v16 = vmul.f32 %v1581_v19, %v3605_v63  ;;  %v1598_v8 = vmul.f32 %v1582_v59, %v3611_v31  ;;  %v1599_v22 = vmul.f32 %v1583_v28, %v3617_v43  ;;  %v1600_v36 = vmul.f32 %v1584_v11, %v3622_v33 }
 0x190   :  { %v1601_v49 = vmul.f32 %v1585_v14, %v3631_v32  ;;  %v1602_v1 = vmul.f32 %v1586_v13, %v3635_v44  ;;  %v1603_v58 = vmul.f32 %v1587_v51, %v3649_v34  ;;  %v1604_v17 = vmul.f32 %v1588_v35, %v3656_v41 }
 0x191   :  { %v1605_v2 = vmul.f32 %v1589_v10, %v3663_v3  ;;  %v1608_v48 = vadd.f32 2.4451342, %v1592_v5  ;;  %v1606_v30 = vmul.f32 %v1590_v29, %v3683_v45  ;;  %v1609_v19 = vadd.f32 2.4451342, %v1593_v25 }
 0x192   :  { %v1610_v24 = vadd.f32 2.4451342, %v1594_v46  ;;  %v1611_v59 = vadd.f32 2.4451342, %v1595_v56  ;;  %v1607_v28 = vmul.f32 %v1591_v27, %v3687_v62  ;;  %v1612_v47 = vadd.f32 2.4451342, %v1596_v26 }
 0x193   :  { %v1613_v11 = vadd.f32 2.4451342, %v1597_v16  ;;  %v1614_v53 = vadd.f32 2.4451342, %v1598_v8  ;;  %v3889_v20 = vmul.f32 %v2228_v38, %v4401_v61  ;;  %v1615_v9 = vadd.f32 2.4451342, %v1599_v22 }
 0x194   :  { %v1616_v51 = vadd.f32 2.4451342, %v1600_v36  ;;  %v1617_v14 = vadd.f32 2.4451342, %v1601_v49  ;;  %v1618_v35 = vadd.f32 2.4451342, %v1602_v1  ;;  %v1624_v5 = vmul.f32 %v1608_v48, %v3542_v0 }
 0x195   :  { %v1619_v13 = vadd.f32 2.4451342, %v1603_v58  ;;  %v1620_v10 = vadd.f32 2.4451342, %v1604_v17  ;;  %v1621_v29 = vadd.f32 2.4451342, %v1605_v2  ;;  %v1625_v46 = vmul.f32 %v1609_v19, %v3551_v57 }
 0x196   :  { %v1622_v25 = vadd.f32 2.4451342, %v1606_v30  ;;  %v1626_v56 = vmul.f32 %v1610_v24, %v3562_v50  ;;  %v1623_v27 = vadd.f32 2.4451342, %v1607_v28  ;;  %v1627_v26 = vmul.f32 %v1611_v59, %v3568_v21 }
 0x197   :  { %v1628_v38 = vmul.f32 %v1612_v47, %v3586_v55  ;;  %v1629_v16 = vmul.f32 %v1613_v11, %v3605_v63  ;;  %v1630_v8 = vmul.f32 %v1614_v53, %v3611_v31  ;;  %v1631_v22 = vmul.f32 %v1615_v9, %v3617_v43 }
 0x198   :  { %v1632_v36 = vmul.f32 %v1616_v51, %v3622_v33  ;;  %v1633_v49 = vmul.f32 %v1617_v14, %v3631_v32  ;;  %v1634_v1 = vmul.f32 %v1618_v35, %v3635_v44  ;;  %v1635_v58 = vmul.f32 %v1619_v13, %v3649_v34 }
 0x199   :  { %v1636_v17 = vmul.f32 %v1620_v10, %v3656_v41  ;;  %v1640_v2 = vadd.f32 3.7544086, %v1624_v5  ;;  %v1637_v48 = vmul.f32 %v1621_v29, %v3663_v3  ;;  %v1638_v30 = vmul.f32 %v1622_v25, %v3683_v45 }
 0x19a   :  { %v1641_v19 = vadd.f32 3.7544086, %v1625_v46  ;;  %v1642_v24 = vadd.f32 3.7544086, %v1626_v56  ;;  %v1639_v59 = vmul.f32 %v1623_v27, %v3687_v62  ;;  %v1643_v28 = vadd.f32 3.7544086, %v1627_v26 }
 0x19b   :  { %v1644_v47 = vadd.f32 3.7544086, %v1628_v38  ;;  %v1645_v11 = vadd.f32 3.7544086, %v1629_v16  ;;  %v1646_v53 = vadd.f32 3.7544086, %v1630_v8  ;;  %v3910_v51 = vstv %s4143_s1 }
 0x19c   :  { %v1647_v61 = vadd.f32 3.7544086, %v1631_v22  ;;  %v1648_v9 = vadd.f32 3.7544086, %v1632_v36  ;;  %v1649_v14 = vadd.f32 3.7544086, %v1633_v49  ;;  %v1656_v10 = vmul.f32 %v1640_v2, %v3542_v0 }
 0x19d   :  { %v1650_v35 = vadd.f32 3.7544086, %v1634_v1  ;;  %v1651_v13 = vadd.f32 3.7544086, %v1635_v58  ;;  %v1652_v5 = vadd.f32 3.7544086, %v1636_v17  ;;  %v1657_v46 = vmul.f32 %v1641_v19, %v3551_v57 }
 0x19e   :  { %v1653_v29 = vadd.f32 3.7544086, %v1637_v48  ;;  %v1654_v25 = vadd.f32 3.7544086, %v1638_v30  ;;  %v1655_v56 = vadd.f32 3.7544086, %v1639_v59  ;;  %v1658_v27 = vmul.f32 %v1642_v24, %v3562_v50 }
 0x19f   :  { %v1659_v26 = vmul.f32 %v1643_v28, %v3568_v21  ;;  %v1660_v38 = vmul.f32 %v1644_v47, %v3586_v55  ;;  %v1661_v16 = vmul.f32 %v1645_v11, %v3605_v63  ;;  %v1662_v8 = vmul.f32 %v1646_v53, %v3611_v31  ;;  %v4402_v11 = vld [vmem:[#allocation11_spill] sm:$0xff]  ;;  %s2311_s1 = smov [#allocation7]  }
 0x1a0   :  { %v1663_v22 = vmul.f32 %v1647_v61, %v3617_v43  ;;  %v1664_v0 = vmul.f32 %v1648_v9, %v3622_v33  ;;  %v1665_v36 = vmul.f32 %v1649_v14, %v3631_v32  ;;  %v1666_v49 = vmul.f32 %v1650_v35, %v3635_v44  ;;  %v4404_v14 = vld [vmem:[#allocation13_spill] sm:$0xff]  ;;  %v4405_v35 = vld [vmem:[#allocation60_spill] sm:$0xff]  ;;  %s1945_s27 = sshll.u32 %s2311_s1, 4  ;;  %s1946_s27 = int_to_ptr.vmem [resolvable:$true] %s1945_s27 }
 0x1a1   :  { %v1667_v57 = vmul.f32 %v1651_v13, %v3649_v34  ;;  %v1672_v1 = vadd.f32 1.0, %v1656_v10  ;;  %v1668_v50 = vmul.f32 %v1652_v5, %v3656_v41  ;;  %v1669_v21 = vmul.f32 %v1653_v29, %v3663_v3  ;;  %v4406_v10 = vld [vmem:[#allocation61_spill] sm:$0xff]  ;;  %v4407_v29 = vld [vmem:[#allocation63_spill] sm:$0xff]  ;;  %s2283_s28 = scalar_lea.vmem %s1946_s27, 256  ;;  %p2288_p9 = scmp.lt.s32.totalorder %s1946_s27, %s1946_s27 }
 0x1a2   :  { %v1670_v55 = vmul.f32 %v1654_v25, %v3683_v45  ;;  %v1673_v63 = vadd.f32 1.0, %v1657_v46  ;;  %v1671_v31 = vmul.f32 %v1655_v56, %v3687_v62  ;;  %v1674_v58 = vadd.f32 1.0, %v1658_v27  ;;  %v4408_v46 = vld [vmem:[#allocation14_spill] sm:$0xff]  ;;  %v4409_v56 = vld [vmem:[#allocation64_spill] sm:$0xff]  ;;  %p2284_p8 = scmp.ne.s32.totalorder %s1946_s27, %s2283_s28  ;;  %p2289_p10 = scmp.lt.s32.totalorder %s2283_s28, %s2283_s28 }
 0x1a3   :  { %v1675_v43 = vadd.f32 1.0, %v1659_v26  ;;  %v1676_v17 = vadd.f32 1.0, %v1660_v38  ;;  %v1677_v33 = vadd.f32 1.0, %v1661_v16  ;;  %v1678_v2 = vadd.f32 1.0, %v1662_v8  ;;  %v4410_v26 = vld [vmem:[#allocation65_spill] sm:$0xff]  ;;  %v4411_v16 = vld [vmem:[#allocation15_spill] sm:$0xff] }
 0x1a4   :  { %v1679_v32 = vadd.f32 1.0, %v1663_v22  ;;  %v1680_v48 = vadd.f32 1.0, %v1664_v0  ;;  %v1681_v44 = vadd.f32 1.0, %v1665_v36  ;;  %v1682_v30 = vadd.f32 1.0, %v1666_v49  ;;  %v4412_v8 = vld [vmem:[#allocation16_spill] sm:$0xff]  ;;  %v4413_v22 = vld [vmem:[#allocation17_spill] sm:$0xff]  ;;  %p2290_p11 = por %p2289_p10, %p2288_p9 }
 0x1a5   :  { %v1683_v34 = vadd.f32 1.0, %v1667_v57  ;;  %2229 = vrcp.f32 %v1672_v1  ;;  %v1684_v19 = vadd.f32 1.0, %v1668_v50  ;;  %v1685_v41 = vadd.f32 1.0, %v1669_v21  ;;  %v4414_v36 = vld [vmem:[#allocation18_spill] sm:$0xff]  ;;  %v4415_v1 = vld [vmem:[#allocation19_spill] sm:$0xff] }
 0x1a6   :  { %v3928_v24 = vadd.f32 1.0, %v1670_v55  ;;  %2231 = vrcp.f32 %v1673_v63  ;;  %v3930_v3 = vadd.f32 1.0, %v1671_v31  ;;  %v1688_v62 = vsub.f32 0.0, %v3776_v40  ;;  %v4403_v40 = vld [vmem:[#allocation12_spill] sm:$0xff]  ;;  %p2291_p12 = pnand %p2290_p11, %p2284_p8 }
 0x1a7   :  { %v1689_v45 = vsub.f32 0.0, %v3779_v39  ;;  %2233 = vrcp.f32 %v1674_v58  ;;  %v1690_v59 = vsub.f32 0.0, %v3781_v42  ;;  %v1691_v28 = vsub.f32 0.0, %v3783_v15  ;;  %v4416_v31 = vld [vmem:[#allocation20_spill] sm:$0xff]  ;;  %v4417_v58 = vld [vmem:[#allocation21_spill] sm:$0xff] }
 0x1a8   :  { %v1692_v47 = vsub.f32 0.0, %v3789_v6  ;;  %2235 = vrcp.f32 %v1675_v43  ;;  %vm1736_vm12 = vcmp.lt.f32.partialorder %v4402_v11, 0.02425  ;;  %v1693_v53 = vsub.f32 0.0, %v3791_v54  ;;  %v4426_v6 = vld [vmem:[#allocation25_spill] sm:$0xff] }
 0x1a9   :  { %v1694_v61 = vsub.f32 0.0, %v3793_v52  ;;  %v1695_v9 = vsub.f32 0.0, %v3799_v23  ;;  %2237 = vrcp.f32 %v1676_v17  ;;  %vm1737_vm11 = vcmp.lt.f32.partialorder %v4403_v40, 0.02425 }
 0x1aa   :  { %v1696_v39 = vsub.f32 0.0, %v3801_v4  ;;  %v1697_v42 = vsub.f32 0.0, %v3803_v37  ;;  %v1698_v15 = vsub.f32 0.0, %v3806_v18  ;;  %2239 = vrcp.f32 %v1677_v33  ;;  %v4418_v33 = vld [vmem:[#allocation22_spill] sm:$0xff] }
 0x1ab   :  { %vm1738_vm14 = vcmp.lt.f32.partialorder %v4404_v14, 0.02425  ;;  %v1699_v13 = vsub.f32 0.0, %v4405_v35  ;;  %v1700_v5 = vsub.f32 0.0, %v4406_v10  ;;  %v1701_v25 = vsub.f32 0.0, %v4407_v29  ;;  %v4441_v4 = vld [vmem:[#allocation66_spill] sm:$0xff] }
 0x1ac   :  { %2241 = vrcp.f32 %v1678_v2  ;;  %vm1739_vm10 = vcmp.lt.f32.partialorder %v4408_v46, 0.02425  ;;  %v1702_v27 = vsub.f32 0.0, %v4409_v56  ;;  %v1703_v38 = vsub.f32 0.0, %v4410_v26  ;;  %v4419_v2 = vld [vmem:[#allocation27_spill] sm:$0xff]  ;;  %v4444_v37 = vld [vmem:[#allocation46_spill] sm:$0xff] }
 0x1ad   :  { %2243 = vrcp.f32 %v1679_v32  ;;  %vm1752_vm6 = vcmp.gt.f32.partialorder %v4402_v11, 0.97575  ;;  %vm1753_vm7 = vcmp.gt.f32.partialorder %v4403_v40, 0.97575  ;;  %vm1754_vm8 = vcmp.gt.f32.partialorder %v4404_v14, 0.97575 }
 0x1ae   :  { %2245 = vrcp.f32 %v1680_v48  ;;  %vm1755_vm4 = vcmp.gt.f32.partialorder %v4408_v46, 0.97575  ;;  %vm1756_vm15 = vcmp.gt.f32.partialorder %v4411_v16, 0.97575  ;;  %vm1757_vm1 = vcmp.gt.f32.partialorder %v4412_v8, 0.97575 }
 0x1af   :  { %2247 = vrcp.f32 %v1681_v44  ;;  %v2230_v0 = vpop.eup %2229  ;;  %vm1760_vm9 = vcmp.gt.f32.partialorder %v4415_v1, 0.97575  ;;  %v2310_v50 = vmov 1966171168   ;;  %vm1761_vm2 = vcmp.gt.f32.partialorder %v4416_v31, 0.97575 }
 0x1b0   :  { %2249 = vrcp.f32 %v1682_v30  ;;  %v2232_v49 = vpop.eup %2231  ;;  %v1705_v57 = vmul.f32 %v2230_v0, %v1688_v62  ;;  %v3966_v21 = vunpack.c.l.s4 %v2310_v50  ;;  %vm1746_vm3 = vcmp.lt.f32.partialorder %v4417_v58, 0.02425  ;;  %v4422_v62 = vld [vmem:[#allocation56_spill] sm:$0xff]  ;;  %v4447_v18 = vld [vmem:[#allocation38_spill] sm:$0xff]  ;;  %v4451_v35 = vld [vmem:[#allocation47_spill] sm:$0xff] }
 0x1b1   :  { %2251 = vrcp.f32 %v1683_v34  ;;  %v2234_v55 = vpop.eup %2233  ;;  %v1707_v63 = vmul.f32 %v2232_v49, %v1689_v45  ;;  %vm1763_vm0 = vcmp.gt.f32.partialorder %v4418_v33, 0.97575  ;;  %v4420_v34 = vld [vmem:[#allocation23_spill] sm:$0xff]  ;;  %v4454_v10 = vld [vmem:[#allocation52_spill] sm:$0xff] }
 0x1b2   :  { %2253 = vrcp.f32 %v1684_v19  ;;  %v2236_v43 = vpop.eup %2235  ;;  %v1709_v17 = vmul.f32 %v2234_v55, %v1690_v59  ;;  %v1768_v32 = vsel %vm1752_vm6, %v1705_v57, %v4419_v2  ;;  %v1841_v48 = vunpack.c.0.s8 %v3966_v21  ;;  %v4421_v19 = vld [vmem:[#allocation50_spill] sm:$0xff]  ;;  %v4425_v57 = vld [vmem:[#allocation57_spill] sm:$0xff]  ;;  %v4430_v2 = vld [vmem:[#allocation51_spill] sm:$0xff] }
 0x1b3   :  { %2255 = vrcp.f32 %v1685_v41  ;;  %v2238_v44 = vpop.eup %2237  ;;  %v1711_v30 = vmul.f32 %v2236_v43, %v1691_v28  ;;  %vm1764_vm5 = vcmp.gt.f32.partialorder %v4420_v34, 0.97575  ;;  %v1769_v41 = vsel %vm1753_vm7, %v1707_v63, %v4421_v19  ;;  %v4424_v28 = vld [vmem:[#allocation28_spill] sm:$0xff]  ;;  %v4428_v63 = vld [vmem:[#allocation58_spill] sm:$0xff] }
 0x1b4   :  { %2257 = vrcp.f32 %v3928_v24  ;;  %v1784_v45 = vsel %vm1736_vm12, %v4422_v62, %v1768_v32  ;;  %v2240_v59 = vpop.eup %2239  ;;  %v1713_v0 = vmul.f32 %v2238_v44, %v1692_v47  ;;  %vm1748_vm6 = vcmp.lt.f32.partialorder %v4420_v34, 0.02425  ;;  %v4423_v24 = vld [vmem:[#allocation24_spill] sm:$0xff]  ;;  %v4431_v44 = vld [vmem:[#allocation45_spill] sm:$0xff]  ;;  %v4433_v62 = vld [vmem:[#allocation59_spill] sm:$0xff] }
 0x1b5   :  { %2259 = vrcp.f32 %v3930_v3  ;;  %vm1765_vm13 = vcmp.gt.f32.partialorder %v4423_v24, 0.97575  ;;  %v1770_v49 = vsel %vm1754_vm8, %v1709_v17, %v4424_v28  ;;  %v1785_v50 = vsel %vm1737_vm11, %v4425_v57, %v1769_v41  ;;  %v4427_v3 = vld [vmem:[#allocation39_spill] sm:$0xff]  ;;  %v4435_v28 = vld [vmem:[#allocation40_spill] sm:$0xff] }
 0x1b6   :  { %v2242_v11 = vpop.eup %2241  ;;  %v1715_v55 = vmul.f32 %v2240_v59, %v1693_v53  ;;  %vm1749_vm12 = vcmp.lt.f32.partialorder %v4423_v24, 0.02425  ;;  %vm1766_vm7 = vcmp.gt.f32.partialorder %v4426_v6, 0.97575  ;;  %v1771_v47 = vsel %vm1755_vm4, %v1711_v30, %v4427_v3  ;;  %v4429_v53 = vld [vmem:[#allocation26_spill] sm:$0xff]  ;;  %v4456_v29 = vld [vmem:[#allocation48_spill] sm:$0xff] }
 0x1b7   :  { %v1786_v43 = vsel %vm1738_vm14, %v4428_v63, %v1770_v49  ;;  %v4008_v17 = vmul.f32 %v3910_v51, %v1784_v45  ;;  %v2244_v40 = vpop.eup %2243  ;;  %v1717_v54 = vmul.f32 %v2242_v11, %v1694_v61  ;;  %vm1750_vm11 = vcmp.lt.f32.partialorder %v4426_v6, 0.02425  ;;  %v4432_v61 = vld [vmem:[#allocation29_spill] sm:$0xff]  ;;  %v4439_v11 = vld [vmem:[#allocation30_spill] sm:$0xff] }
 0x1b8   :  { %vm1767_vm8 = vcmp.gt.f32.partialorder %v4429_v53, 0.97575  ;;  %v1772_v32 = vsel %vm1756_vm15, %v1713_v0, %v4430_v2  ;;  %v1787_v14 = vsel %vm1739_vm10, %v4431_v44, %v1771_v47  ;;  %v4021_v30 = vmul.f32 %v3910_v51, %v1785_v50  ;;  %v2246_v19 = vpop.eup %2245  ;;  %v4443_v63 = vld [vmem:[#allocation41_spill] sm:$0xff]  ;;  %v4446_v2 = vld [vmem:[#allocation31_spill] sm:$0xff] }
 0x1b9   :  { %v1719_v52 = vmul.f32 %v2244_v40, %v1695_v9  ;;  %vm1751_vm14 = vcmp.lt.f32.partialorder %v4429_v53, 0.02425  ;;  %v1773_v41 = vsel %vm1757_vm1, %v1715_v55, %v4432_v61  ;;  %vm4434_vm4 = vcmp.lt.f32.partialorder %v4411_v16, 0.02425  ;;  %v2248_v59 = vpop.eup %2247  ;;  %v4437_v9 = vld [vmem:[#allocation62_spill] sm:$0xff] }
 0x1ba   :  { %v1788_v45 = vsel %vm4434_vm4, %v4433_v62, %v1772_v32  ;;  %v1805_v46 = vmul.f32 %v3910_v51, %v1786_v43  ;;  %v1721_v0 = vmul.f32 %v2246_v19, %v1696_v39  ;;  %vm4436_vm10 = vcmp.gt.f32.partialorder %v4413_v22, 0.97575  ;;  %v2250_v50 = vpop.eup %2249  ;;  %v4449_v19 = vld [vmem:[#allocation42_spill] sm:$0xff]  ;;  %v4453_v62 = vld [vmem:[#allocation32_spill] sm:$0xff] }
 0x1bb   :  { %v1774_v23 = vsel %vm4436_vm10, %v1717_v54, %v4435_v28  ;;  %vm4438_vm15 = vcmp.lt.f32.partialorder %v4412_v8, 0.02425  ;;  %v1806_v57 = vmul.f32 %v3910_v51, %v1787_v14  ;;  %v1723_v16 = vmul.f32 %v2248_v59, %v1697_v42  ;;  %v2252_v47 = vpop.eup %2251  ;;  %v4455_v28 = vld [vmem:[#allocation43_spill] sm:$0xff] }
 0x1bc   :  { %v1789_v49 = vsel %vm4438_vm15, %v4437_v9, %v1773_v41  ;;  %vm4440_vm1 = vcmp.gt.f32.partialorder %v4414_v36, 0.97575  ;;  %vm4442_vm4 = vcmp.lt.f32.partialorder %v4413_v22, 0.02425  ;;  %v1807_v3 = vmul.f32 %v3910_v51, %v1788_v45  ;;  %v2254_v54 = vpop.eup %2253 }
 0x1bd   :  { %v1775_v55 = vsel %vm4440_vm1, %v1719_v52, %v4439_v11  ;;  %v1790_v39 = vsel %vm4442_vm4, %v4441_v4, %v1774_v23  ;;  %v1725_v8 = vmul.f32 %v2250_v50, %v1698_v15  ;;  %v1776_v43 = vsel %vm1760_vm9, %v1721_v0, %v4443_v63  ;;  %v2256_v14 = vpop.eup %2255 }
 0x1be   :  { %vm4445_vm10 = vcmp.lt.f32.partialorder %v4414_v36, 0.02425  ;;  %v1808_v40 = vmul.f32 %v3910_v51, %v1789_v49  ;;  %v1727_v22 = vmul.f32 %v2252_v47, %v1699_v13  ;;  %v1777_v32 = vsel %vm1761_vm2, %v1723_v16, %v4446_v2  ;;  %v2258_v41 = vpop.eup %2257  ;;  %v4458_v49 = vld [vmem:[#allocation33_spill] sm:$0xff]  ;;  %v4459_v16 = vld [vmem:[#allocation44_spill] sm:$0xff] }
 0x1bf   :  { %v1791_v42 = vsel %vm4445_vm10, %v4444_v37, %v1775_v55  ;;  %vm4448_vm15 = vcmp.lt.f32.partialorder %v4415_v1, 0.02425  ;;  %v1809_v44 = vmul.f32 %v3910_v51, %v1790_v39  ;;  %v1729_v36 = vmul.f32 %v2254_v54, %v1700_v5  ;;  %v2260_v0 = vpop.eup %2259  ;;  %v4460_v55 = vld [vmem:[#allocation34_spill] sm:$0xff] }
 0x1c0   :  { %v1792_v15 = vsel %vm4448_vm15, %v4447_v18, %v1776_v43  ;;  %vm4450_vm9 = vcmp.gt.f32.partialorder %v4417_v58, 0.97575  ;;  %vm4452_vm1 = vcmp.lt.f32.partialorder %v4416_v31, 0.02425  ;;  %v1810_v61 = vmul.f32 %v3910_v51, %v1791_v42  ;;  %v4461_v37 = vld [vmem:[#allocation10_spill] sm:$0xff] }
 0x1c1   :  { %v1778_v52 = vsel %vm4450_vm9, %v1725_v8, %v4449_v19  ;;  %v1793_v13 = vsel %vm4452_vm1, %v4451_v35, %v1777_v32  ;;  %v1731_v1 = vmul.f32 %v2256_v14, %v1701_v25  ;;  %v1779_v45 = vsel %vm1763_vm0, %v1727_v22, %v4453_v62  ;;  %v1801_v19 = vld [vmem:[#allocation4 + $0x8] sm:$0xff] }
 0x1c2   :  { %v1794_v5 = vsel %vm1746_vm3, %v4454_v10, %v1778_v52  ;;  %v1811_v59 = vmul.f32 %v3910_v51, %v1792_v15  ;;  %v1733_v31 = vmul.f32 %v2258_v41, %v1702_v27  ;;  %v1780_v23 = vsel %vm1764_vm5, %v1729_v36, %v4455_v28 }
 0x1c3   :  { %vm4457_vm2 = vcmp.lt.f32.partialorder %v4418_v33, 0.02425  ;;  %v1812_v9 = vmul.f32 %v3910_v51, %v1793_v13  ;;  %v1735_v58 = vmul.f32 %v2260_v0, %v1703_v38  ;;  %v1781_v50 = vsel %vm1765_vm13, %v1731_v1, %v4458_v49 }
 0x1c4   :  { %v1795_v25 = vsel %vm4457_vm2, %v4456_v29, %v1779_v45  ;;  %v1796_v56 = vsel %vm1748_vm6, %v3864_v60, %v1780_v23  ;;  %v1813_v27 = vmul.f32 %v3910_v51, %v1794_v5  ;;  %v1782_v33 = vsel %vm1766_vm7, %v1733_v31, %v4459_v16 }
 0x1c5   :  { %v1797_v11 = vsel %vm1749_vm12, %v3867_v7, %v1781_v50  ;;  %v1814_v26 = vmul.f32 %v3910_v51, %v1795_v25  ;;  %v1815_v38 = vmul.f32 %v3910_v51, %v1796_v56  ;;  %v1783_v4 = vsel %vm1767_vm8, %v1735_v58, %v4460_v55 }
 0x1c6   :  { %v1798_v60 = vsel %vm1750_vm11, %v3870_v12, %v1782_v33  ;;  %v1816_v34 = vmul.f32 %v3910_v51, %v1797_v11  ;;  %v1835_v39 = vcombine.low %v4008_v17, %v4021_v30  ;;  %v1799_v7 = vsel %vm1751_vm14, %v3889_v20, %v1783_v4 }
 0x1c7   :  { %v1817_v24 = vmul.f32 %v3910_v51, %v1798_v60  ;;  %v1836_v47 = vcombine.low %v1805_v46, %v1806_v57  ;;  %v1837_v8 = vcombine.low %v1807_v3, %v1808_v40  ;;  %v1818_v63 = vmul.f32 %v3910_v51, %v1799_v7 }
 0x1c8   :  { %v1838_v43 = vcombine.low %v1809_v44, %v1810_v61  ;;  %v1844_v12 = vsub.s32 %v1841_v48, %v4461_v37  ;;  %v1884_v6 = vcombine.low %v1811_v59, %v1812_v9  ;;  %v1885_v42 = vcombine.low %v1813_v27, %v1814_v26  ;;  %v1800_v44 = vld [vmem:[#allocation4] sm:$0xff] }
 0x1c9   :  { %v1886_v54 = vcombine.low %v1815_v38, %v1816_v34  ;;  %v1887_v53 = vcombine.low %v1817_v24, %v1818_v63 }
 0x1ca   :  { %v1845_v22 = vrot.slane %v1835_v39, %v1844_v12  ;;  %v1852_v17 = vrot.slane %v1836_v47, %v1844_v12  ;;  %v1859_v30 = vrot.slane %v1837_v8, %v1844_v12  ;;  %v1866_v2 = vrot.slane %v1838_v43, %v1844_v12 }
 0x1cb   :  { %v1894_v20 = vrot.slane %v1884_v6, %v1844_v12  ;;  %v1901_v32 = vrot.slane %v1885_v42, %v1844_v12  ;;  %v1908_v18 = vrot.slane %v1886_v54, %v1844_v12  ;;  %v1915_v3 = vrot.slane %v1887_v53, %v1844_v12 }
 0x1cc   :  { %v1867_v46 = vcombine.low %v1845_v22, %v1852_v17  ;;  %v1868_v57 = vcombine.low %v1859_v30, %v1866_v2 }
 0x1cd   :  { %v1916_v51 = vcombine.low %v1894_v20, %v1901_v32  ;;  %v1917_v21 = vcombine.low %v1908_v18, %v1915_v3 }
 0x1ce   :  { %v1875_v40 = vrot.slane %v1867_v46, %v1844_v12  ;;  %v1882_v15 = vrot.slane %v1868_v57, %v1844_v12 }
 0x1cf   :  { %v1924_v48 = vrot.slane %v1916_v51, %v1844_v12  ;;  %v1931_v36 = vrot.slane %v1917_v21, %v1844_v12 }
 0x1d0   :  { %v1883_v14 = vcombine.low %v1875_v40, %v1882_v15 }
 0x1d1   :  { %v1932_v35 = vcombine.low %v1924_v48, %v1931_v36 }
 0x1d2   :  { %v1935_v52 = vadd.f32 %v1883_v14, %v1800_v44 }
 0x1d3   :  { %v1936_v13 = vadd.f32 %v1932_v35, %v1801_v19 }
 0x1d4   :  { %1937 = vst [vmem:[#allocation7] sm:$0xff] %v1935_v52 }
 0x1d5   :  { %1938 = vst [vmem:[#allocation7 + $0x8] sm:$0xff] %v1936_v13 }
 0x1d6   :  { %2294 = shalt.err (!%p2291_p12)
}
 0x1d7   :  { %s2295_s4 = scalar_lea.hbm %s4145_s3, 256 }
 0x1d8   :  { %p2296_p13 = scmp.ne.s32.totalorder %s4145_s3, %s2295_s4  ;;  %p2299_p0 = scmp.lt.u32.totalorder %s2295_s4, %s4145_s3 }
 0x1da   :  { %p2301_p1 = pnand %p2299_p0, %p2296_p13 }
 0x1dc   :  { %2304 = shalt.err (!%p2301_p1)
}
 0x1dd   :  { %1948 = dma.vmem_to_hbm [thread:$0]  %s1946_s27, 256, %s4145_s3, [#allocation6]  }
 0x1de   :  { %2307 = dma.done.wait [#allocation6], 256  }
 0x1df   :  { %2308 = vsyncadd [#allocation6], 4294967040 }
 0x1e0   :  { %1952 = vsyncpa [#allocation5], 1 }
 0x1e1   :  { %1953 = vsyncpa [#allocation6], 1 }

</bundles_post_ra>
